<compile_context>
chip_gen: v6e
topology: v6e:2x2x1
jax: 0.10.0
libtpu: 0.0.40
codegen_flags: <defaults>
</compile_context>

<pallas_src>
import functools

import jax
import jax.numpy as jnp
from jax.experimental import pallas as pl
from jax.experimental.pallas import tpu as pltpu

LOG2PI = 1.8378770664093453


def _softplus(x):
    return jnp.maximum(x, 0.0) + jnp.log1p(jnp.exp(-jnp.abs(x)))


# -----------------------------------------------------------------------------
# Fused kernel
# -----------------------------------------------------------------------------
def _latent_sde2_kernel(dims, dts_ref, sqdts_ref, x_ref, z0eps_ref, eps_ref,
                        enc_l1_ref, enc_l2_ref, enc_field_ref, enc_ro_ref,
                        qz0_ref, fh1_ref, fh2_ref, fh3_ref,
                        misc_ref, proj_ref,
                        xs_ref, lq_ref):
    T, B, Din, H, EH, C, L, HD1, HD2, D = dims
    GW = L * HD1                 # width of the fused per-latent diffusion block
    W1K = 2 * HD1 + GW           # fused layer-1 output width   (f | h | g)
    # fused layer-2 output width = 2*HD2 + L  (f | h | g-logit)

    # ---- unpack packed weight slabs (static row slices, done once) ----------
    enc_l1 = enc_l1_ref[...]
    wi, bi = enc_l1[:Din], enc_l1[Din:]
    enc_l2 = enc_l2_ref[...]
    w1, b1 = enc_l2[:H], enc_l2[H:]
    enc_field = enc_field_ref[...]
    w2f, b2f = enc_field[:EH], enc_field[EH:]
    enc_ro = enc_ro_ref[...]
    wr, br = enc_ro[:H], enc_ro[H:]
    qz0_w = qz0_ref[...]
    wq, bq = qz0_w[:C], qz0_w[C:]
    fh1 = fh1_ref[...]
    w1all, wctx, b1all = fh1[:L], fh1[L:L + C], fh1[L + C:]     # (L|C|1, W1K)
    fh2 = fh2_ref[...]
    w2all, b2all = fh2[:W1K], fh2[W1K:]                         # (W1K|1, 2*HD2+L)
    fh3 = fh3_ref[...]
    w3blk, b3cat = fh3[:2 * HD2], fh3[2 * HD2:]                 # (2*HD2|1, 2L)
    misc = misc_ref[...]
    pm, pls = misc[0:1], misc[1:2]
    proj = proj_ref[...]
    wp, bp = proj[:L], proj[L:]

    # ---- CDE encoder: fully-unrolled forward Euler recurrence ----------------
    h_enc = jnp.dot(x_ref[0], wi, preferred_element_type=jnp.float32) + bi  # (B,H)
    h_states = [h_enc]
    for t in range(T - 1):                         # last-step field eval skipped
        hid = _softplus(
            jnp.dot(h_enc, w1, preferred_element_type=jnp.float32) + b1)
        # All Din vector-field heads in one (B,EH)x(EH,Din*H) MXU push.
        field = jnp.tanh(
            jnp.dot(hid, w2f, preferred_element_type=jnp.float32) + b2f)
        dx = x_ref[t + 1] - x_ref[t]                                  # (B, Din)
        dh = jnp.zeros((B, H), jnp.float32)
        for d in range(Din):                       # VPU-only contraction over Din
            dh = dh + field[:, d * H:(d + 1) * H] * dx[:, d:d + 1]
        h_enc = h_enc + dh
        h_states.append(h_enc)
    hs = jnp.concatenate(h_states, axis=0)                            # (T*B, H)

    # Readout for all T time points in a single M=T*B matmul.
    ctx = jnp.dot(hs, wr, preferred_element_type=jnp.float32) + br    # (T*B, C)
    # Context contribution to the fused first layer of (f_net | h_net | g_nets),
    # already zero-padded over the h/g columns; hoisted out of the SDE loop.
    ctxf = jnp.dot(ctx, wctx, preferred_element_type=jnp.float32)     # (T*B, W1K)

    # ---- qz0 + reparameterised z0 sample ------------------------------------
    q = jnp.dot(ctx[:B], wq, preferred_element_type=jnp.float32) + bq  # (B, 2L)
    qm = q[:, :L]
    qls = jnp.clip(q[:, L:], -20.0, 2.0)
    z0 = qm + jnp.exp(qls) * z0eps_ref[...]

    logq = -0.5 * (z0 - qm) ** 2 * jnp.exp(-2.0 * qls) - qls - 0.5 * LOG2PI
    logp = -0.5 * (z0 - pm) ** 2 * jnp.exp(-2.0 * pls) - pls - 0.5 * LOG2PI
    logqp0 = jnp.sum(logp - logq, axis=-1, keepdims=True)              # (B, 1)

    # ---- Euler-Maruyama SDE integration with Girsanov logqp path term -------
    # f_net, h_net and all L diffusion nets share 3 block-diagonal MXU pushes.
    z = z0
    z_states = [z]
    path = jnp.zeros((B, L), jnp.float32)
    for t in range(T - 1):
        dt = dts_ref[t]
        sqdt = sqdts_ref[t]
        # ctx index per the module's searchsorted(ts, t, right=True):
        # i = min(t+1, T-1) == t+1 for the Euler steps taken here.
        ctx_add = ctxf[(t + 1) * B:(t + 2) * B]                      # (B, W1K)

        a1 = _softplus(jnp.dot(z, w1all, preferred_element_type=jnp.float32)
                       + ctx_add + b1all)                            # (B, W1K)
        a2 = jnp.dot(a1, w2all, preferred_element_type=jnp.float32) + b2all
        fh_hidden = _softplus(a2[:, :2 * HD2])                       # (B, 2*HD2)
        glogit = a2[:, 2 * HD2:]                                     # (B, L)
        fh = jnp.dot(fh_hidden, w3blk,
                     preferred_element_type=jnp.float32) + b3cat     # (B, 2L)
        f_drift = fh[:, :L]
        h_drift = fh[:, L:]

        inv_g = 1.0 + jnp.exp(-glogit)                               # exact 1/sigmoid
        g = pl.reciprocal(inv_g, approx=True)                        # EUP, off VALU

        u = (f_drift - h_drift) * inv_g                              # (f - h) / g
        path = path + u * u * dt

        z = z + f_drift * dt + g * sqdt * eps_ref[t]
        z_states.append(z)

    zs = jnp.concatenate(z_states, axis=0)                           # (T*B, L)

    # ---- projection: one M=T*B matmul, single lane-dense writeback ----------
    xs_ref[...] = jnp.dot(zs, wp, preferred_element_type=jnp.float32) + bp
    # Matches the module's return value: logqp0 - logqp_path.
    lq_ref[...] = logqp0 - 0.5 * jnp.sum(path, axis=-1, keepdims=True)


# -----------------------------------------------------------------------------
# Parameter init (deterministic, torch.nn.Linear-style uniform fan-in scaling)
# -----------------------------------------------------------------------------
def _linear(key, fan_in, fan_out):
    k1, k2 = jax.random.split(key)
    lim = float(fan_in) ** -0.5
    w = jax.random.uniform(k1, (fan_in, fan_out), jnp.float32, -lim, lim)
    b = jax.random.uniform(k2, (1, fan_out), jnp.float32, -lim, lim)
    return w, b


def init_params(key, D, L, C, hidden_dims, H, enc_hidden):
    HD1, HD2 = hidden_dims
    EH = enc_hidden[0]
    Din = D + 1
    keys = iter(jax.random.split(key, 64))
    p = {}

    # encoder (CDE)
    enc = {}
    enc['wi'], enc['bi'] = _linear(next(keys), Din, H)
    enc['w1'], enc['b1'] = _linear(next(keys), H, EH)
    w2s, b2s = [], []
    for _ in range(Din):
        w, b = _linear(next(keys), EH, H)
        w2s.append(w); b2s.append(b)
    enc['w2'] = jnp.stack(w2s)          # (Din, EH, H)
    enc['b2'] = jnp.stack(b2s)          # (Din, 1, H)
    enc['wr'], enc['br'] = _linear(next(keys), H, C)
    p['enc'] = enc

    # qz0_net
    p['wq'], p['bq'] = _linear(next(keys), C, 2 * L)

    # f_net : (L + C) -> HD1 -> HD2 -> L  (Softplus)
    wf1, p['bf1'] = _linear(next(keys), L + C, HD1)
    p['wf1z'], p['wf1c'] = wf1[:L], wf1[L:]
    p['wf2'], p['bf2'] = _linear(next(keys), HD1, HD2)
    p['wf3'], p['bf3'] = _linear(next(keys), HD2, L)

    # h_net : L -> HD1 -> HD2 -> L  (Softplus)
    p['wh1'], p['bh1'] = _linear(next(keys), L, HD1)
    p['wh2'], p['bh2'] = _linear(next(keys), HD1, HD2)
    p['wh3'], p['bh3'] = _linear(next(keys), HD2, L)

    # g_nets : L independent 1 -> HD1 -> 1 MLPs (Softplus, Sigmoid), stacked
    wg1, bg1, wg2, bg2 = [], [], [], []
    for _ in range(L):
        w1, b1 = _linear(next(keys), 1, HD1)
        w2, b2 = _linear(next(keys), HD1, 1)
        wg1.append(w1[0]); bg1.append(b1[0]); wg2.append(w2[:, 0]); bg2.append(b2[0, 0])
    p['wg1'] = jnp.stack(wg1)                    # (L, HD1)
    p['bg1'] = jnp.stack(bg1)                    # (L, HD1)
    p['wg2'] = jnp.stack(wg2)                    # (L, HD1)
    p['bg2'] = jnp.stack(bg2)[None, :]           # (1, L)

    # projector
    p['wp'], p['bp'] = _linear(next(keys), L, D)

    # prior z0 params
    p['pz0_mean'] = jnp.zeros((1, L), jnp.float32)
    p['pz0_logstd'] = jnp.zeros((1, L), jnp.float32)
    return p


def _block_diag(blocks):
    """Dense block-diagonal assembly (pure layout; zeros keep fusion exact)."""
    cols = sum(b.shape[1] for b in blocks)
    rows, c0 = [], 0
    for b in blocks:
        r, c = b.shape
        rows.append(jnp.concatenate(
            [jnp.zeros((r, c0), jnp.float32), b,
             jnp.zeros((r, cols - c0 - c), jnp.float32)], axis=1))
        c0 += c
    return jnp.concatenate(rows, axis=0)


# -----------------------------------------------------------------------------
# Pack the ~30 raw parameters into 10 weight slabs consumed by the kernel.
# Pure layout transform; numerics unchanged (zero blocks are exact under f32).
# -----------------------------------------------------------------------------
def pack_params(p):
    enc = p['enc']
    Din, H = enc['wi'].shape
    EH = enc['w1'].shape[1]
    C = enc['wr'].shape[1]
    L, HD1 = p['wh1'].shape
    HD2 = p['wh2'].shape[1]
    GW = L * HD1

    # CDE vector-field heads flattened: W[e, d*H + h] = w2[d, e, h]
    w2f = jnp.transpose(enc['w2'], (1, 0, 2)).reshape(EH, Din * H)
    b2f = enc['b2'].reshape(1, Din * H)

    w = {}
    w['enc_l1'] = jnp.concatenate([enc['wi'], enc['bi']], axis=0)        # (Din+1, H)
    w['enc_l2'] = jnp.concatenate([enc['w1'], enc['b1']], axis=0)        # (H+1, EH)
    w['enc_field'] = jnp.concatenate([w2f, b2f], axis=0)                 # (EH+1, Din*H)
    w['enc_ro'] = jnp.concatenate([enc['wr'], enc['br']], axis=0)        # (H+1, C)
    w['qz0'] = jnp.concatenate([p['wq'], p['bq']], axis=0)               # (C+1, 2L)

    # Per-latent diffusion nets as block-diagonal dense weights.
    wg1_blk = _block_diag([p['wg1'][l][None, :] for l in range(L)])      # (L, GW)
    wg2_blk = _block_diag([p['wg2'][l][:, None] for l in range(L)])      # (GW, L)
    bg1_flat = p['bg1'].reshape(1, GW)

    # Fused first layer of (f_net | h_net | g_nets):
    #   z-rows, ctx-rows (zero over h/g columns), bias row.
    w1_z = jnp.concatenate([p['wf1z'], p['wh1'], wg1_blk], axis=1)       # (L, 2*HD1+GW)
    w1_c = jnp.concatenate(
        [p['wf1c'], jnp.zeros((C, HD1 + GW), jnp.float32)], axis=1)      # (C, 2*HD1+GW)
    b1_all = jnp.concatenate([p['bf1'], p['bh1'], bg1_flat], axis=1)     # (1, 2*HD1+GW)
    w['fh1'] = jnp.concatenate([w1_z, w1_c, b1_all], axis=0)             # (L+C+1, 2*HD1+GW)

    # Fused second layer: block-diag(f2, h2, g2) -> columns (f | h | g-logit).
    w2_all = _block_diag([p['wf2'], p['wh2'], wg2_blk])                  # (2*HD1+GW, 2*HD2+L)
    b2_all = jnp.concatenate([p['bf2'], p['bh2'], p['bg2']], axis=1)     # (1, 2*HD2+L)
    w['fh2'] = jnp.concatenate([w2_all, b2_all], axis=0)                 # (2*HD1+GW+1, 2*HD2+L)

    # Fused third layer of (f_net | h_net) only.
    w3_all = _block_diag([p['wf3'], p['wh3']])                           # (2*HD2, 2L)
    b3_all = jnp.concatenate([p['bf3'], p['bh3']], axis=1)               # (1, 2L)
    w['fh3'] = jnp.concatenate([w3_all, b3_all], axis=0)                 # (2*HD2+1, 2L)

    w['misc'] = jnp.concatenate([p['pz0_mean'], p['pz0_logstd']], axis=0)  # (2, L)
    w['proj'] = jnp.concatenate([p['wp'], p['bp']], axis=0)              # (L+1, D)
    return w


# -----------------------------------------------------------------------------
# Forward pass
# -----------------------------------------------------------------------------
def latent_sde2_forward(params, xs, ts, key):
    # xs: [B, T, D], ts: [T]  ->  ([B, T, D], [B, 1])
    B, T, D = xs.shape
    enc = params['enc']
    Din, H = enc['wi'].shape
    EH = enc['w1'].shape[1]
    C = enc['wr'].shape[1]
    L = params['pz0_mean'].shape[1]
    HD1 = params['wh1'].shape[1]
    HD2 = params['wh2'].shape[1]

    ts_rep = jnp.broadcast_to(ts[None, :, None], (B, T, 1))
    x_aug = jnp.concatenate([xs, ts_rep], axis=-1)                       # [B, T, Din]
    x_tm = jnp.transpose(x_aug, (1, 0, 2)).astype(jnp.float32)           # [T, B, Din]

    k1, k2 = jax.random.split(key)
    z0_eps = jax.random.normal(k1, (B, L), dtype=jnp.float32)
    eps = jax.random.normal(k2, (T - 1, B, L), dtype=jnp.float32)        # dW/sqrt(dt)

    dts = (ts[1:] - ts[:-1]).astype(jnp.float32)                         # (T-1,)
    sqdts = jnp.sqrt(dts)

    w = pack_params(params)
    dims = (T, B, Din, H, EH, C, L, HD1, HD2, D)

    vmem = pl.BlockSpec(memory_space=pltpu.MemorySpace.VMEM)
    smem = pl.BlockSpec(memory_space=pltpu.MemorySpace.SMEM)

    xs_flat, logqp = pl.pallas_call(
        functools.partial(_latent_sde2_kernel, dims),
        out_shape=(jax.ShapeDtypeStruct((T * B, D), jnp.float32),
                   jax.ShapeDtypeStruct((B, 1), jnp.float32)),
        in_specs=[smem, smem] + [vmem] * 13,
        out_specs=(vmem, vmem),
    )(dts, sqdts, x_tm, z0_eps, eps,
      w['enc_l1'], w['enc_l2'], w['enc_field'], w['enc_ro'],
      w['qz0'], w['fh1'], w['fh2'], w['fh3'],
      w['misc'], w['proj'])

    _xs = xs_flat.reshape(T, B, D).transpose(1, 0, 2)                    # [B, T, D]
    return _xs, logqp


if __name__ == "__main__":
    B, T, D = 8, 8, 3
    L, C, H = 8, 16, 16          # latent, context, encoder hidden-state dims
    HD = (32, 32)                # hidden_dims
    EH = (32,)                   # encoder_hidden_dims
    dt = 0.1

    key = jax.random.PRNGKey(0)
    pkey, xkey, fkey = jax.random.split(key, 3)
    params = init_params(pkey, D, L, C, HD, H, EH)

    xs = jax.random.normal(xkey, (B, T, D), dtype=jnp.float32)
    ts = jnp.arange(T, dtype=jnp.float32) * dt

    fwd = jax.jit(latent_sde2_forward)
    out_xs, logqp = fwd(params, xs, ts, fkey)
    jax.block_until_ready((out_xs, logqp))

    assert out_xs.shape == (B, T, D), out_xs.shape
    assert logqp.shape == (B, 1), logqp.shape
    assert bool(jnp.all(jnp.isfinite(out_xs))) and bool(jnp.all(jnp.isfinite(logqp)))
    print("KERNEL_OK")
</pallas_src>

<mosaic_0001>
module attributes {stable_mosaic.version = 11 : i64} {
  func.func @_latent_sde2_kernel(%arg0: memref<7xf32, #tpu.memory_space<smem>>, %arg1: memref<7xf32, #tpu.memory_space<smem>>, %arg2: memref<8x8x4xf32, #tpu.memory_space<vmem>>, %arg3: memref<8x8xf32, #tpu.memory_space<vmem>>, %arg4: memref<7x8x8xf32, #tpu.memory_space<vmem>>, %arg5: memref<5x16xf32, #tpu.memory_space<vmem>>, %arg6: memref<17x32xf32, #tpu.memory_space<vmem>>, %arg7: memref<33x64xf32, #tpu.memory_space<vmem>>, %arg8: memref<17x16xf32, #tpu.memory_space<vmem>>, %arg9: memref<17x16xf32, #tpu.memory_space<vmem>>, %arg10: memref<25x320xf32, #tpu.memory_space<vmem>>, %arg11: memref<321x72xf32, #tpu.memory_space<vmem>>, %arg12: memref<65x16xf32, #tpu.memory_space<vmem>>, %arg13: memref<2x8xf32, #tpu.memory_space<vmem>>, %arg14: memref<9x3xf32, #tpu.memory_space<vmem>>, %arg15: memref<64x3xf32, #tpu.memory_space<vmem>>, %arg16: memref<8x1xf32, #tpu.memory_space<vmem>>) attributes {dimension_semantics = [], scalar_prefetch = 0 : i64, scratch_operands = 0 : i64, tpu.core_type = #tpu.core_type<tc>} {
    %c0 = arith.constant 0 : index
    %c0_0 = arith.constant 0 : index
    %0 = vector.load %arg5[%c0, %c0_0] : memref<5x16xf32, #tpu.memory_space<vmem>>, vector<5x16xf32>
    %1 = vector.extract_strided_slice %0 {offsets = [0, 0], sizes = [4, 16], strides = [1, 1]} : vector<5x16xf32> to vector<4x16xf32>
    %2 = vector.extract_strided_slice %0 {offsets = [4, 0], sizes = [1, 16], strides = [1, 1]} : vector<5x16xf32> to vector<1x16xf32>
    %c0_1 = arith.constant 0 : index
    %c0_2 = arith.constant 0 : index
    %3 = vector.load %arg6[%c0_1, %c0_2] : memref<17x32xf32, #tpu.memory_space<vmem>>, vector<17x32xf32>
    %4 = vector.extract_strided_slice %3 {offsets = [0, 0], sizes = [16, 32], strides = [1, 1]} : vector<17x32xf32> to vector<16x32xf32>
    %5 = vector.extract_strided_slice %3 {offsets = [16, 0], sizes = [1, 32], strides = [1, 1]} : vector<17x32xf32> to vector<1x32xf32>
    %c0_3 = arith.constant 0 : index
    %c0_4 = arith.constant 0 : index
    %6 = vector.load %arg7[%c0_3, %c0_4] : memref<33x64xf32, #tpu.memory_space<vmem>>, vector<33x64xf32>
    %7 = vector.extract_strided_slice %6 {offsets = [0, 0], sizes = [32, 64], strides = [1, 1]} : vector<33x64xf32> to vector<32x64xf32>
    %8 = vector.extract_strided_slice %6 {offsets = [32, 0], sizes = [1, 64], strides = [1, 1]} : vector<33x64xf32> to vector<1x64xf32>
    %c0_5 = arith.constant 0 : index
    %c0_6 = arith.constant 0 : index
    %9 = vector.load %arg8[%c0_5, %c0_6] : memref<17x16xf32, #tpu.memory_space<vmem>>, vector<17x16xf32>
    %10 = vector.extract_strided_slice %9 {offsets = [0, 0], sizes = [16, 16], strides = [1, 1]} : vector<17x16xf32> to vector<16x16xf32>
    %11 = vector.extract_strided_slice %9 {offsets = [16, 0], sizes = [1, 16], strides = [1, 1]} : vector<17x16xf32> to vector<1x16xf32>
    %c0_7 = arith.constant 0 : index
    %c0_8 = arith.constant 0 : index
    %12 = vector.load %arg9[%c0_7, %c0_8] : memref<17x16xf32, #tpu.memory_space<vmem>>, vector<17x16xf32>
    %13 = vector.extract_strided_slice %12 {offsets = [0, 0], sizes = [16, 16], strides = [1, 1]} : vector<17x16xf32> to vector<16x16xf32>
    %14 = vector.extract_strided_slice %12 {offsets = [16, 0], sizes = [1, 16], strides = [1, 1]} : vector<17x16xf32> to vector<1x16xf32>
    %c0_9 = arith.constant 0 : index
    %c0_10 = arith.constant 0 : index
    %15 = vector.load %arg10[%c0_9, %c0_10] : memref<25x320xf32, #tpu.memory_space<vmem>>, vector<25x320xf32>
    %16 = vector.extract_strided_slice %15 {offsets = [0, 0], sizes = [8, 320], strides = [1, 1]} : vector<25x320xf32> to vector<8x320xf32>
    %17 = vector.extract_strided_slice %15 {offsets = [8, 0], sizes = [16, 320], strides = [1, 1]} : vector<25x320xf32> to vector<16x320xf32>
    %18 = vector.extract_strided_slice %15 {offsets = [24, 0], sizes = [1, 320], strides = [1, 1]} : vector<25x320xf32> to vector<1x320xf32>
    %c0_11 = arith.constant 0 : index
    %c0_12 = arith.constant 0 : index
    %19 = vector.load %arg11[%c0_11, %c0_12] : memref<321x72xf32, #tpu.memory_space<vmem>>, vector<321x72xf32>
    %20 = vector.extract_strided_slice %19 {offsets = [0, 0], sizes = [320, 72], strides = [1, 1]} : vector<321x72xf32> to vector<320x72xf32>
    %21 = vector.extract_strided_slice %19 {offsets = [320, 0], sizes = [1, 72], strides = [1, 1]} : vector<321x72xf32> to vector<1x72xf32>
    %c0_13 = arith.constant 0 : index
    %c0_14 = arith.constant 0 : index
    %22 = vector.load %arg12[%c0_13, %c0_14] : memref<65x16xf32, #tpu.memory_space<vmem>>, vector<65x16xf32>
    %23 = vector.extract_strided_slice %22 {offsets = [0, 0], sizes = [64, 16], strides = [1, 1]} : vector<65x16xf32> to vector<64x16xf32>
    %24 = vector.extract_strided_slice %22 {offsets = [64, 0], sizes = [1, 16], strides = [1, 1]} : vector<65x16xf32> to vector<1x16xf32>
    %c0_15 = arith.constant 0 : index
    %c0_16 = arith.constant 0 : index
    %25 = vector.load %arg13[%c0_15, %c0_16] : memref<2x8xf32, #tpu.memory_space<vmem>>, vector<2x8xf32>
    %26 = vector.extract_strided_slice %25 {offsets = [0, 0], sizes = [1, 8], strides = [1, 1]} : vector<2x8xf32> to vector<1x8xf32>
    %27 = vector.extract_strided_slice %25 {offsets = [1, 0], sizes = [1, 8], strides = [1, 1]} : vector<2x8xf32> to vector<1x8xf32>
    %c0_17 = arith.constant 0 : index
    %c0_18 = arith.constant 0 : index
    %28 = vector.load %arg14[%c0_17, %c0_18] : memref<9x3xf32, #tpu.memory_space<vmem>>, vector<9x3xf32>
    %29 = vector.extract_strided_slice %28 {offsets = [0, 0], sizes = [8, 3], strides = [1, 1]} : vector<9x3xf32> to vector<8x3xf32>
    %30 = vector.extract_strided_slice %28 {offsets = [8, 0], sizes = [1, 3], strides = [1, 1]} : vector<9x3xf32> to vector<1x3xf32>
    %c0_19 = arith.constant 0 : index
    %c0_20 = arith.constant 0 : index
    %c0_21 = arith.constant 0 : index
    %31 = vector.load %arg2[%c0_19, %c0_20, %c0_21] : memref<8x8x4xf32, #tpu.memory_space<vmem>>, vector<1x8x4xf32>
    %32 = vector.shape_cast %31 : vector<1x8x4xf32> to vector<8x4xf32>
    %cst = arith.constant dense<0.000000e+00> : vector<8x16xf32>
    %33 = tpu.matmul %32, %1, %cst {dimension_numbers = #tpu.dot_dimension_numbers<[1], [0], [0], [1], [0, 0, 1, 1], [], []>} : vector<8x4xf32>, vector<4x16xf32>, vector<8x16xf32> -> vector<8x16xf32>
    %34 = vector.broadcast %2 : vector<1x16xf32> to vector<8x16xf32>
    %35 = arith.addf %33, %34 : vector<8x16xf32>
    %cst_22 = arith.constant dense<0.000000e+00> : vector<8x32xf32>
    %36 = tpu.matmul %35, %4, %cst_22 {dimension_numbers = #tpu.dot_dimension_numbers<[1], [0], [0], [1], [0, 0, 1, 1], [], []>} : vector<8x16xf32>, vector<16x32xf32>, vector<8x32xf32> -> vector<8x32xf32>
    %37 = vector.broadcast %5 : vector<1x32xf32> to vector<8x32xf32>
    %38 = arith.addf %36, %37 : vector<8x32xf32>
    %cst_23 = arith.constant 0.000000e+00 : f32
    %39 = vector.broadcast %cst_23 : f32 to vector<8x32xf32>
    %40 = arith.maximumf %38, %39 : vector<8x32xf32>
    %41 = math.absf %38 : vector<8x32xf32>
    %cst_24 = arith.constant 0.000000e+00 : f32
    %42 = vector.broadcast %cst_24 : f32 to vector<8x32xf32>
    %43 = arith.subf %42, %41 : vector<8x32xf32>
    %44 = math.exp %43 : vector<8x32xf32>
    %45 = math.log1p %44 : vector<8x32xf32>
    %46 = arith.addf %40, %45 : vector<8x32xf32>
    %cst_25 = arith.constant dense<0.000000e+00> : vector<8x64xf32>
    %47 = tpu.matmul %46, %7, %cst_25 {dimension_numbers = #tpu.dot_dimension_numbers<[1], [0], [0], [1], [0, 0, 1, 1], [], []>} : vector<8x32xf32>, vector<32x64xf32>, vector<8x64xf32> -> vector<8x64xf32>
    %48 = vector.broadcast %8 : vector<1x64xf32> to vector<8x64xf32>
    %49 = arith.addf %47, %48 : vector<8x64xf32>
    %50 = math.tanh %49 : vector<8x64xf32>
    %c1 = arith.constant 1 : index
    %c0_26 = arith.constant 0 : index
    %c0_27 = arith.constant 0 : index
    %51 = vector.load %arg2[%c1, %c0_26, %c0_27] : memref<8x8x4xf32, #tpu.memory_space<vmem>>, vector<1x8x4xf32>
    %52 = vector.shape_cast %51 : vector<1x8x4xf32> to vector<8x4xf32>
    %c0_28 = arith.constant 0 : index
    %c0_29 = arith.constant 0 : index
    %c0_30 = arith.constant 0 : index
    %53 = vector.load %arg2[%c0_28, %c0_29, %c0_30] : memref<8x8x4xf32, #tpu.memory_space<vmem>>, vector<1x8x4xf32>
    %54 = vector.shape_cast %53 : vector<1x8x4xf32> to vector<8x4xf32>
    %55 = arith.subf %52, %54 : vector<8x4xf32>
    %cst_31 = arith.constant 0.000000e+00 : f32
    %56 = vector.broadcast %cst_31 : f32 to vector<8x16xf32>
    %57 = vector.extract_strided_slice %50 {offsets = [0, 0], sizes = [8, 16], strides = [1, 1]} : vector<8x64xf32> to vector<8x16xf32>
    %58 = vector.extract_strided_slice %55 {offsets = [0, 0], sizes = [8, 1], strides = [1, 1]} : vector<8x4xf32> to vector<8x1xf32>
    %59 = vector.broadcast %58 : vector<8x1xf32> to vector<8x16xf32>
    %60 = arith.mulf %57, %59 : vector<8x16xf32>
    %61 = arith.addf %56, %60 : vector<8x16xf32>
    %62 = vector.extract_strided_slice %50 {offsets = [0, 16], sizes = [8, 16], strides = [1, 1]} : vector<8x64xf32> to vector<8x16xf32>
    %63 = vector.extract_strided_slice %55 {offsets = [0, 1], sizes = [8, 1], strides = [1, 1]} : vector<8x4xf32> to vector<8x1xf32>
    %64 = vector.broadcast %63 : vector<8x1xf32> to vector<8x16xf32>
    %65 = arith.mulf %62, %64 : vector<8x16xf32>
    %66 = arith.addf %61, %65 : vector<8x16xf32>
    %67 = vector.extract_strided_slice %50 {offsets = [0, 32], sizes = [8, 16], strides = [1, 1]} : vector<8x64xf32> to vector<8x16xf32>
    %68 = vector.extract_strided_slice %55 {offsets = [0, 2], sizes = [8, 1], strides = [1, 1]} : vector<8x4xf32> to vector<8x1xf32>
    %69 = vector.broadcast %68 : vector<8x1xf32> to vector<8x16xf32>
    %70 = arith.mulf %67, %69 : vector<8x16xf32>
    %71 = arith.addf %66, %70 : vector<8x16xf32>
    %72 = vector.extract_strided_slice %50 {offsets = [0, 48], sizes = [8, 16], strides = [1, 1]} : vector<8x64xf32> to vector<8x16xf32>
    %73 = vector.extract_strided_slice %55 {offsets = [0, 3], sizes = [8, 1], strides = [1, 1]} : vector<8x4xf32> to vector<8x1xf32>
    %74 = vector.broadcast %73 : vector<8x1xf32> to vector<8x16xf32>
    %75 = arith.mulf %72, %74 : vector<8x16xf32>
    %76 = arith.addf %71, %75 : vector<8x16xf32>
    %77 = arith.addf %35, %76 : vector<8x16xf32>
    %cst_32 = arith.constant dense<0.000000e+00> : vector<8x32xf32>
    %78 = tpu.matmul %77, %4, %cst_32 {dimension_numbers = #tpu.dot_dimension_numbers<[1], [0], [0], [1], [0, 0, 1, 1], [], []>} : vector<8x16xf32>, vector<16x32xf32>, vector<8x32xf32> -> vector<8x32xf32>
    %79 = vector.broadcast %5 : vector<1x32xf32> to vector<8x32xf32>
    %80 = arith.addf %78, %79 : vector<8x32xf32>
    %cst_33 = arith.constant 0.000000e+00 : f32
    %81 = vector.broadcast %cst_33 : f32 to vector<8x32xf32>
    %82 = arith.maximumf %80, %81 : vector<8x32xf32>
    %83 = math.absf %80 : vector<8x32xf32>
    %cst_34 = arith.constant 0.000000e+00 : f32
    %84 = vector.broadcast %cst_34 : f32 to vector<8x32xf32>
    %85 = arith.subf %84, %83 : vector<8x32xf32>
    %86 = math.exp %85 : vector<8x32xf32>
    %87 = math.log1p %86 : vector<8x32xf32>
    %88 = arith.addf %82, %87 : vector<8x32xf32>
    %cst_35 = arith.constant dense<0.000000e+00> : vector<8x64xf32>
    %89 = tpu.matmul %88, %7, %cst_35 {dimension_numbers = #tpu.dot_dimension_numbers<[1], [0], [0], [1], [0, 0, 1, 1], [], []>} : vector<8x32xf32>, vector<32x64xf32>, vector<8x64xf32> -> vector<8x64xf32>
    %90 = vector.broadcast %8 : vector<1x64xf32> to vector<8x64xf32>
    %91 = arith.addf %89, %90 : vector<8x64xf32>
    %92 = math.tanh %91 : vector<8x64xf32>
    %c2 = arith.constant 2 : index
    %c0_36 = arith.constant 0 : index
    %c0_37 = arith.constant 0 : index
    %93 = vector.load %arg2[%c2, %c0_36, %c0_37] : memref<8x8x4xf32, #tpu.memory_space<vmem>>, vector<1x8x4xf32>
    %94 = vector.shape_cast %93 : vector<1x8x4xf32> to vector<8x4xf32>
    %c1_38 = arith.constant 1 : index
    %c0_39 = arith.constant 0 : index
    %c0_40 = arith.constant 0 : index
    %95 = vector.load %arg2[%c1_38, %c0_39, %c0_40] : memref<8x8x4xf32, #tpu.memory_space<vmem>>, vector<1x8x4xf32>
    %96 = vector.shape_cast %95 : vector<1x8x4xf32> to vector<8x4xf32>
    %97 = arith.subf %94, %96 : vector<8x4xf32>
    %cst_41 = arith.constant 0.000000e+00 : f32
    %98 = vector.broadcast %cst_41 : f32 to vector<8x16xf32>
    %99 = vector.extract_strided_slice %92 {offsets = [0, 0], sizes = [8, 16], strides = [1, 1]} : vector<8x64xf32> to vector<8x16xf32>
    %100 = vector.extract_strided_slice %97 {offsets = [0, 0], sizes = [8, 1], strides = [1, 1]} : vector<8x4xf32> to vector<8x1xf32>
    %101 = vector.broadcast %100 : vector<8x1xf32> to vector<8x16xf32>
    %102 = arith.mulf %99, %101 : vector<8x16xf32>
    %103 = arith.addf %98, %102 : vector<8x16xf32>
    %104 = vector.extract_strided_slice %92 {offsets = [0, 16], sizes = [8, 16], strides = [1, 1]} : vector<8x64xf32> to vector<8x16xf32>
    %105 = vector.extract_strided_slice %97 {offsets = [0, 1], sizes = [8, 1], strides = [1, 1]} : vector<8x4xf32> to vector<8x1xf32>
    %106 = vector.broadcast %105 : vector<8x1xf32> to vector<8x16xf32>
    %107 = arith.mulf %104, %106 : vector<8x16xf32>
    %108 = arith.addf %103, %107 : vector<8x16xf32>
    %109 = vector.extract_strided_slice %92 {offsets = [0, 32], sizes = [8, 16], strides = [1, 1]} : vector<8x64xf32> to vector<8x16xf32>
    %110 = vector.extract_strided_slice %97 {offsets = [0, 2], sizes = [8, 1], strides = [1, 1]} : vector<8x4xf32> to vector<8x1xf32>
    %111 = vector.broadcast %110 : vector<8x1xf32> to vector<8x16xf32>
    %112 = arith.mulf %109, %111 : vector<8x16xf32>
    %113 = arith.addf %108, %112 : vector<8x16xf32>
    %114 = vector.extract_strided_slice %92 {offsets = [0, 48], sizes = [8, 16], strides = [1, 1]} : vector<8x64xf32> to vector<8x16xf32>
    %115 = vector.extract_strided_slice %97 {offsets = [0, 3], sizes = [8, 1], strides = [1, 1]} : vector<8x4xf32> to vector<8x1xf32>
    %116 = vector.broadcast %115 : vector<8x1xf32> to vector<8x16xf32>
    %117 = arith.mulf %114, %116 : vector<8x16xf32>
    %118 = arith.addf %113, %117 : vector<8x16xf32>
    %119 = arith.addf %77, %118 : vector<8x16xf32>
    %cst_42 = arith.constant dense<0.000000e+00> : vector<8x32xf32>
    %120 = tpu.matmul %119, %4, %cst_42 {dimension_numbers = #tpu.dot_dimension_numbers<[1], [0], [0], [1], [0, 0, 1, 1], [], []>} : vector<8x16xf32>, vector<16x32xf32>, vector<8x32xf32> -> vector<8x32xf32>
    %121 = vector.broadcast %5 : vector<1x32xf32> to vector<8x32xf32>
    %122 = arith.addf %120, %121 : vector<8x32xf32>
    %cst_43 = arith.constant 0.000000e+00 : f32
    %123 = vector.broadcast %cst_43 : f32 to vector<8x32xf32>
    %124 = arith.maximumf %122, %123 : vector<8x32xf32>
    %125 = math.absf %122 : vector<8x32xf32>
    %cst_44 = arith.constant 0.000000e+00 : f32
    %126 = vector.broadcast %cst_44 : f32 to vector<8x32xf32>
    %127 = arith.subf %126, %125 : vector<8x32xf32>
    %128 = math.exp %127 : vector<8x32xf32>
    %129 = math.log1p %128 : vector<8x32xf32>
    %130 = arith.addf %124, %129 : vector<8x32xf32>
    %cst_45 = arith.constant dense<0.000000e+00> : vector<8x64xf32>
    %131 = tpu.matmul %130, %7, %cst_45 {dimension_numbers = #tpu.dot_dimension_numbers<[1], [0], [0], [1], [0, 0, 1, 1], [], []>} : vector<8x32xf32>, vector<32x64xf32>, vector<8x64xf32> -> vector<8x64xf32>
    %132 = vector.broadcast %8 : vector<1x64xf32> to vector<8x64xf32>
    %133 = arith.addf %131, %132 : vector<8x64xf32>
    %134 = math.tanh %133 : vector<8x64xf32>
    %c3 = arith.constant 3 : index
    %c0_46 = arith.constant 0 : index
    %c0_47 = arith.constant 0 : index
    %135 = vector.load %arg2[%c3, %c0_46, %c0_47] : memref<8x8x4xf32, #tpu.memory_space<vmem>>, vector<1x8x4xf32>
    %136 = vector.shape_cast %135 : vector<1x8x4xf32> to vector<8x4xf32>
    %c2_48 = arith.constant 2 : index
    %c0_49 = arith.constant 0 : index
    %c0_50 = arith.constant 0 : index
    %137 = vector.load %arg2[%c2_48, %c0_49, %c0_50] : memref<8x8x4xf32, #tpu.memory_space<vmem>>, vector<1x8x4xf32>
    %138 = vector.shape_cast %137 : vector<1x8x4xf32> to vector<8x4xf32>
    %139 = arith.subf %136, %138 : vector<8x4xf32>
    %cst_51 = arith.constant 0.000000e+00 : f32
    %140 = vector.broadcast %cst_51 : f32 to vector<8x16xf32>
    %141 = vector.extract_strided_slice %134 {offsets = [0, 0], sizes = [8, 16], strides = [1, 1]} : vector<8x64xf32> to vector<8x16xf32>
    %142 = vector.extract_strided_slice %139 {offsets = [0, 0], sizes = [8, 1], strides = [1, 1]} : vector<8x4xf32> to vector<8x1xf32>
    %143 = vector.broadcast %142 : vector<8x1xf32> to vector<8x16xf32>
    %144 = arith.mulf %141, %143 : vector<8x16xf32>
    %145 = arith.addf %140, %144 : vector<8x16xf32>
    %146 = vector.extract_strided_slice %134 {offsets = [0, 16], sizes = [8, 16], strides = [1, 1]} : vector<8x64xf32> to vector<8x16xf32>
    %147 = vector.extract_strided_slice %139 {offsets = [0, 1], sizes = [8, 1], strides = [1, 1]} : vector<8x4xf32> to vector<8x1xf32>
    %148 = vector.broadcast %147 : vector<8x1xf32> to vector<8x16xf32>
    %149 = arith.mulf %146, %148 : vector<8x16xf32>
    %150 = arith.addf %145, %149 : vector<8x16xf32>
    %151 = vector.extract_strided_slice %134 {offsets = [0, 32], sizes = [8, 16], strides = [1, 1]} : vector<8x64xf32> to vector<8x16xf32>
    %152 = vector.extract_strided_slice %139 {offsets = [0, 2], sizes = [8, 1], strides = [1, 1]} : vector<8x4xf32> to vector<8x1xf32>
    %153 = vector.broadcast %152 : vector<8x1xf32> to vector<8x16xf32>
    %154 = arith.mulf %151, %153 : vector<8x16xf32>
    %155 = arith.addf %150, %154 : vector<8x16xf32>
    %156 = vector.extract_strided_slice %134 {offsets = [0, 48], sizes = [8, 16], strides = [1, 1]} : vector<8x64xf32> to vector<8x16xf32>
    %157 = vector.extract_strided_slice %139 {offsets = [0, 3], sizes = [8, 1], strides = [1, 1]} : vector<8x4xf32> to vector<8x1xf32>
    %158 = vector.broadcast %157 : vector<8x1xf32> to vector<8x16xf32>
    %159 = arith.mulf %156, %158 : vector<8x16xf32>
    %160 = arith.addf %155, %159 : vector<8x16xf32>
    %161 = arith.addf %119, %160 : vector<8x16xf32>
    %cst_52 = arith.constant dense<0.000000e+00> : vector<8x32xf32>
    %162 = tpu.matmul %161, %4, %cst_52 {dimension_numbers = #tpu.dot_dimension_numbers<[1], [0], [0], [1], [0, 0, 1, 1], [], []>} : vector<8x16xf32>, vector<16x32xf32>, vector<8x32xf32> -> vector<8x32xf32>
    %163 = vector.broadcast %5 : vector<1x32xf32> to vector<8x32xf32>
    %164 = arith.addf %162, %163 : vector<8x32xf32>
    %cst_53 = arith.constant 0.000000e+00 : f32
    %165 = vector.broadcast %cst_53 : f32 to vector<8x32xf32>
    %166 = arith.maximumf %164, %165 : vector<8x32xf32>
    %167 = math.absf %164 : vector<8x32xf32>
    %cst_54 = arith.constant 0.000000e+00 : f32
    %168 = vector.broadcast %cst_54 : f32 to vector<8x32xf32>
    %169 = arith.subf %168, %167 : vector<8x32xf32>
    %170 = math.exp %169 : vector<8x32xf32>
    %171 = math.log1p %170 : vector<8x32xf32>
    %172 = arith.addf %166, %171 : vector<8x32xf32>
    %cst_55 = arith.constant dense<0.000000e+00> : vector<8x64xf32>
    %173 = tpu.matmul %172, %7, %cst_55 {dimension_numbers = #tpu.dot_dimension_numbers<[1], [0], [0], [1], [0, 0, 1, 1], [], []>} : vector<8x32xf32>, vector<32x64xf32>, vector<8x64xf32> -> vector<8x64xf32>
    %174 = vector.broadcast %8 : vector<1x64xf32> to vector<8x64xf32>
    %175 = arith.addf %173, %174 : vector<8x64xf32>
    %176 = math.tanh %175 : vector<8x64xf32>
    %c4 = arith.constant 4 : index
    %c0_56 = arith.constant 0 : index
    %c0_57 = arith.constant 0 : index
    %177 = vector.load %arg2[%c4, %c0_56, %c0_57] : memref<8x8x4xf32, #tpu.memory_space<vmem>>, vector<1x8x4xf32>
    %178 = vector.shape_cast %177 : vector<1x8x4xf32> to vector<8x4xf32>
    %c3_58 = arith.constant 3 : index
    %c0_59 = arith.constant 0 : index
    %c0_60 = arith.constant 0 : index
    %179 = vector.load %arg2[%c3_58, %c0_59, %c0_60] : memref<8x8x4xf32, #tpu.memory_space<vmem>>, vector<1x8x4xf32>
    %180 = vector.shape_cast %179 : vector<1x8x4xf32> to vector<8x4xf32>
    %181 = arith.subf %178, %180 : vector<8x4xf32>
    %cst_61 = arith.constant 0.000000e+00 : f32
    %182 = vector.broadcast %cst_61 : f32 to vector<8x16xf32>
    %183 = vector.extract_strided_slice %176 {offsets = [0, 0], sizes = [8, 16], strides = [1, 1]} : vector<8x64xf32> to vector<8x16xf32>
    %184 = vector.extract_strided_slice %181 {offsets = [0, 0], sizes = [8, 1], strides = [1, 1]} : vector<8x4xf32> to vector<8x1xf32>
    %185 = vector.broadcast %184 : vector<8x1xf32> to vector<8x16xf32>
    %186 = arith.mulf %183, %185 : vector<8x16xf32>
    %187 = arith.addf %182, %186 : vector<8x16xf32>
    %188 = vector.extract_strided_slice %176 {offsets = [0, 16], sizes = [8, 16], strides = [1, 1]} : vector<8x64xf32> to vector<8x16xf32>
    %189 = vector.extract_strided_slice %181 {offsets = [0, 1], sizes = [8, 1], strides = [1, 1]} : vector<8x4xf32> to vector<8x1xf32>
    %190 = vector.broadcast %189 : vector<8x1xf32> to vector<8x16xf32>
    %191 = arith.mulf %188, %190 : vector<8x16xf32>
    %192 = arith.addf %187, %191 : vector<8x16xf32>
    %193 = vector.extract_strided_slice %176 {offsets = [0, 32], sizes = [8, 16], strides = [1, 1]} : vector<8x64xf32> to vector<8x16xf32>
    %194 = vector.extract_strided_slice %181 {offsets = [0, 2], sizes = [8, 1], strides = [1, 1]} : vector<8x4xf32> to vector<8x1xf32>
    %195 = vector.broadcast %194 : vector<8x1xf32> to vector<8x16xf32>
    %196 = arith.mulf %193, %195 : vector<8x16xf32>
    %197 = arith.addf %192, %196 : vector<8x16xf32>
    %198 = vector.extract_strided_slice %176 {offsets = [0, 48], sizes = [8, 16], strides = [1, 1]} : vector<8x64xf32> to vector<8x16xf32>
    %199 = vector.extract_strided_slice %181 {offsets = [0, 3], sizes = [8, 1], strides = [1, 1]} : vector<8x4xf32> to vector<8x1xf32>
    %200 = vector.broadcast %199 : vector<8x1xf32> to vector<8x16xf32>
    %201 = arith.mulf %198, %200 : vector<8x16xf32>
    %202 = arith.addf %197, %201 : vector<8x16xf32>
    %203 = arith.addf %161, %202 : vector<8x16xf32>
    %cst_62 = arith.constant dense<0.000000e+00> : vector<8x32xf32>
    %204 = tpu.matmul %203, %4, %cst_62 {dimension_numbers = #tpu.dot_dimension_numbers<[1], [0], [0], [1], [0, 0, 1, 1], [], []>} : vector<8x16xf32>, vector<16x32xf32>, vector<8x32xf32> -> vector<8x32xf32>
    %205 = vector.broadcast %5 : vector<1x32xf32> to vector<8x32xf32>
    %206 = arith.addf %204, %205 : vector<8x32xf32>
    %cst_63 = arith.constant 0.000000e+00 : f32
    %207 = vector.broadcast %cst_63 : f32 to vector<8x32xf32>
    %208 = arith.maximumf %206, %207 : vector<8x32xf32>
    %209 = math.absf %206 : vector<8x32xf32>
    %cst_64 = arith.constant 0.000000e+00 : f32
    %210 = vector.broadcast %cst_64 : f32 to vector<8x32xf32>
    %211 = arith.subf %210, %209 : vector<8x32xf32>
    %212 = math.exp %211 : vector<8x32xf32>
    %213 = math.log1p %212 : vector<8x32xf32>
    %214 = arith.addf %208, %213 : vector<8x32xf32>
    %cst_65 = arith.constant dense<0.000000e+00> : vector<8x64xf32>
    %215 = tpu.matmul %214, %7, %cst_65 {dimension_numbers = #tpu.dot_dimension_numbers<[1], [0], [0], [1], [0, 0, 1, 1], [], []>} : vector<8x32xf32>, vector<32x64xf32>, vector<8x64xf32> -> vector<8x64xf32>
    %216 = vector.broadcast %8 : vector<1x64xf32> to vector<8x64xf32>
    %217 = arith.addf %215, %216 : vector<8x64xf32>
    %218 = math.tanh %217 : vector<8x64xf32>
    %c5 = arith.constant 5 : index
    %c0_66 = arith.constant 0 : index
    %c0_67 = arith.constant 0 : index
    %219 = vector.load %arg2[%c5, %c0_66, %c0_67] : memref<8x8x4xf32, #tpu.memory_space<vmem>>, vector<1x8x4xf32>
    %220 = vector.shape_cast %219 : vector<1x8x4xf32> to vector<8x4xf32>
    %c4_68 = arith.constant 4 : index
    %c0_69 = arith.constant 0 : index
    %c0_70 = arith.constant 0 : index
    %221 = vector.load %arg2[%c4_68, %c0_69, %c0_70] : memref<8x8x4xf32, #tpu.memory_space<vmem>>, vector<1x8x4xf32>
    %222 = vector.shape_cast %221 : vector<1x8x4xf32> to vector<8x4xf32>
    %223 = arith.subf %220, %222 : vector<8x4xf32>
    %cst_71 = arith.constant 0.000000e+00 : f32
    %224 = vector.broadcast %cst_71 : f32 to vector<8x16xf32>
    %225 = vector.extract_strided_slice %218 {offsets = [0, 0], sizes = [8, 16], strides = [1, 1]} : vector<8x64xf32> to vector<8x16xf32>
    %226 = vector.extract_strided_slice %223 {offsets = [0, 0], sizes = [8, 1], strides = [1, 1]} : vector<8x4xf32> to vector<8x1xf32>
    %227 = vector.broadcast %226 : vector<8x1xf32> to vector<8x16xf32>
    %228 = arith.mulf %225, %227 : vector<8x16xf32>
    %229 = arith.addf %224, %228 : vector<8x16xf32>
    %230 = vector.extract_strided_slice %218 {offsets = [0, 16], sizes = [8, 16], strides = [1, 1]} : vector<8x64xf32> to vector<8x16xf32>
    %231 = vector.extract_strided_slice %223 {offsets = [0, 1], sizes = [8, 1], strides = [1, 1]} : vector<8x4xf32> to vector<8x1xf32>
    %232 = vector.broadcast %231 : vector<8x1xf32> to vector<8x16xf32>
    %233 = arith.mulf %230, %232 : vector<8x16xf32>
    %234 = arith.addf %229, %233 : vector<8x16xf32>
    %235 = vector.extract_strided_slice %218 {offsets = [0, 32], sizes = [8, 16], strides = [1, 1]} : vector<8x64xf32> to vector<8x16xf32>
    %236 = vector.extract_strided_slice %223 {offsets = [0, 2], sizes = [8, 1], strides = [1, 1]} : vector<8x4xf32> to vector<8x1xf32>
    %237 = vector.broadcast %236 : vector<8x1xf32> to vector<8x16xf32>
    %238 = arith.mulf %235, %237 : vector<8x16xf32>
    %239 = arith.addf %234, %238 : vector<8x16xf32>
    %240 = vector.extract_strided_slice %218 {offsets = [0, 48], sizes = [8, 16], strides = [1, 1]} : vector<8x64xf32> to vector<8x16xf32>
    %241 = vector.extract_strided_slice %223 {offsets = [0, 3], sizes = [8, 1], strides = [1, 1]} : vector<8x4xf32> to vector<8x1xf32>
    %242 = vector.broadcast %241 : vector<8x1xf32> to vector<8x16xf32>
    %243 = arith.mulf %240, %242 : vector<8x16xf32>
    %244 = arith.addf %239, %243 : vector<8x16xf32>
    %245 = arith.addf %203, %244 : vector<8x16xf32>
    %cst_72 = arith.constant dense<0.000000e+00> : vector<8x32xf32>
    %246 = tpu.matmul %245, %4, %cst_72 {dimension_numbers = #tpu.dot_dimension_numbers<[1], [0], [0], [1], [0, 0, 1, 1], [], []>} : vector<8x16xf32>, vector<16x32xf32>, vector<8x32xf32> -> vector<8x32xf32>
    %247 = vector.broadcast %5 : vector<1x32xf32> to vector<8x32xf32>
    %248 = arith.addf %246, %247 : vector<8x32xf32>
    %cst_73 = arith.constant 0.000000e+00 : f32
    %249 = vector.broadcast %cst_73 : f32 to vector<8x32xf32>
    %250 = arith.maximumf %248, %249 : vector<8x32xf32>
    %251 = math.absf %248 : vector<8x32xf32>
    %cst_74 = arith.constant 0.000000e+00 : f32
    %252 = vector.broadcast %cst_74 : f32 to vector<8x32xf32>
    %253 = arith.subf %252, %251 : vector<8x32xf32>
    %254 = math.exp %253 : vector<8x32xf32>
    %255 = math.log1p %254 : vector<8x32xf32>
    %256 = arith.addf %250, %255 : vector<8x32xf32>
    %cst_75 = arith.constant dense<0.000000e+00> : vector<8x64xf32>
    %257 = tpu.matmul %256, %7, %cst_75 {dimension_numbers = #tpu.dot_dimension_numbers<[1], [0], [0], [1], [0, 0, 1, 1], [], []>} : vector<8x32xf32>, vector<32x64xf32>, vector<8x64xf32> -> vector<8x64xf32>
    %258 = vector.broadcast %8 : vector<1x64xf32> to vector<8x64xf32>
    %259 = arith.addf %257, %258 : vector<8x64xf32>
    %260 = math.tanh %259 : vector<8x64xf32>
    %c6 = arith.constant 6 : index
    %c0_76 = arith.constant 0 : index
    %c0_77 = arith.constant 0 : index
    %261 = vector.load %arg2[%c6, %c0_76, %c0_77] : memref<8x8x4xf32, #tpu.memory_space<vmem>>, vector<1x8x4xf32>
    %262 = vector.shape_cast %261 : vector<1x8x4xf32> to vector<8x4xf32>
    %c5_78 = arith.constant 5 : index
    %c0_79 = arith.constant 0 : index
    %c0_80 = arith.constant 0 : index
    %263 = vector.load %arg2[%c5_78, %c0_79, %c0_80] : memref<8x8x4xf32, #tpu.memory_space<vmem>>, vector<1x8x4xf32>
    %264 = vector.shape_cast %263 : vector<1x8x4xf32> to vector<8x4xf32>
    %265 = arith.subf %262, %264 : vector<8x4xf32>
    %cst_81 = arith.constant 0.000000e+00 : f32
    %266 = vector.broadcast %cst_81 : f32 to vector<8x16xf32>
    %267 = vector.extract_strided_slice %260 {offsets = [0, 0], sizes = [8, 16], strides = [1, 1]} : vector<8x64xf32> to vector<8x16xf32>
    %268 = vector.extract_strided_slice %265 {offsets = [0, 0], sizes = [8, 1], strides = [1, 1]} : vector<8x4xf32> to vector<8x1xf32>
    %269 = vector.broadcast %268 : vector<8x1xf32> to vector<8x16xf32>
    %270 = arith.mulf %267, %269 : vector<8x16xf32>
    %271 = arith.addf %266, %270 : vector<8x16xf32>
    %272 = vector.extract_strided_slice %260 {offsets = [0, 16], sizes = [8, 16], strides = [1, 1]} : vector<8x64xf32> to vector<8x16xf32>
    %273 = vector.extract_strided_slice %265 {offsets = [0, 1], sizes = [8, 1], strides = [1, 1]} : vector<8x4xf32> to vector<8x1xf32>
    %274 = vector.broadcast %273 : vector<8x1xf32> to vector<8x16xf32>
    %275 = arith.mulf %272, %274 : vector<8x16xf32>
    %276 = arith.addf %271, %275 : vector<8x16xf32>
    %277 = vector.extract_strided_slice %260 {offsets = [0, 32], sizes = [8, 16], strides = [1, 1]} : vector<8x64xf32> to vector<8x16xf32>
    %278 = vector.extract_strided_slice %265 {offsets = [0, 2], sizes = [8, 1], strides = [1, 1]} : vector<8x4xf32> to vector<8x1xf32>
    %279 = vector.broadcast %278 : vector<8x1xf32> to vector<8x16xf32>
    %280 = arith.mulf %277, %279 : vector<8x16xf32>
    %281 = arith.addf %276, %280 : vector<8x16xf32>
    %282 = vector.extract_strided_slice %260 {offsets = [0, 48], sizes = [8, 16], strides = [1, 1]} : vector<8x64xf32> to vector<8x16xf32>
    %283 = vector.extract_strided_slice %265 {offsets = [0, 3], sizes = [8, 1], strides = [1, 1]} : vector<8x4xf32> to vector<8x1xf32>
    %284 = vector.broadcast %283 : vector<8x1xf32> to vector<8x16xf32>
    %285 = arith.mulf %282, %284 : vector<8x16xf32>
    %286 = arith.addf %281, %285 : vector<8x16xf32>
    %287 = arith.addf %245, %286 : vector<8x16xf32>
    %cst_82 = arith.constant dense<0.000000e+00> : vector<8x32xf32>
    %288 = tpu.matmul %287, %4, %cst_82 {dimension_numbers = #tpu.dot_dimension_numbers<[1], [0], [0], [1], [0, 0, 1, 1], [], []>} : vector<8x16xf32>, vector<16x32xf32>, vector<8x32xf32> -> vector<8x32xf32>
    %289 = vector.broadcast %5 : vector<1x32xf32> to vector<8x32xf32>
    %290 = arith.addf %288, %289 : vector<8x32xf32>
    %cst_83 = arith.constant 0.000000e+00 : f32
    %291 = vector.broadcast %cst_83 : f32 to vector<8x32xf32>
    %292 = arith.maximumf %290, %291 : vector<8x32xf32>
    %293 = math.absf %290 : vector<8x32xf32>
    %cst_84 = arith.constant 0.000000e+00 : f32
    %294 = vector.broadcast %cst_84 : f32 to vector<8x32xf32>
    %295 = arith.subf %294, %293 : vector<8x32xf32>
    %296 = math.exp %295 : vector<8x32xf32>
    %297 = math.log1p %296 : vector<8x32xf32>
    %298 = arith.addf %292, %297 : vector<8x32xf32>
    %cst_85 = arith.constant dense<0.000000e+00> : vector<8x64xf32>
    %299 = tpu.matmul %298, %7, %cst_85 {dimension_numbers = #tpu.dot_dimension_numbers<[1], [0], [0], [1], [0, 0, 1, 1], [], []>} : vector<8x32xf32>, vector<32x64xf32>, vector<8x64xf32> -> vector<8x64xf32>
    %300 = vector.broadcast %8 : vector<1x64xf32> to vector<8x64xf32>
    %301 = arith.addf %299, %300 : vector<8x64xf32>
    %302 = math.tanh %301 : vector<8x64xf32>
    %c7 = arith.constant 7 : index
    %c0_86 = arith.constant 0 : index
    %c0_87 = arith.constant 0 : index
    %303 = vector.load %arg2[%c7, %c0_86, %c0_87] : memref<8x8x4xf32, #tpu.memory_space<vmem>>, vector<1x8x4xf32>
    %304 = vector.shape_cast %303 : vector<1x8x4xf32> to vector<8x4xf32>
    %c6_88 = arith.constant 6 : index
    %c0_89 = arith.constant 0 : index
    %c0_90 = arith.constant 0 : index
    %305 = vector.load %arg2[%c6_88, %c0_89, %c0_90] : memref<8x8x4xf32, #tpu.memory_space<vmem>>, vector<1x8x4xf32>
    %306 = vector.shape_cast %305 : vector<1x8x4xf32> to vector<8x4xf32>
    %307 = arith.subf %304, %306 : vector<8x4xf32>
    %cst_91 = arith.constant 0.000000e+00 : f32
    %308 = vector.broadcast %cst_91 : f32 to vector<8x16xf32>
    %309 = vector.extract_strided_slice %302 {offsets = [0, 0], sizes = [8, 16], strides = [1, 1]} : vector<8x64xf32> to vector<8x16xf32>
    %310 = vector.extract_strided_slice %307 {offsets = [0, 0], sizes = [8, 1], strides = [1, 1]} : vector<8x4xf32> to vector<8x1xf32>
    %311 = vector.broadcast %310 : vector<8x1xf32> to vector<8x16xf32>
    %312 = arith.mulf %309, %311 : vector<8x16xf32>
    %313 = arith.addf %308, %312 : vector<8x16xf32>
    %314 = vector.extract_strided_slice %302 {offsets = [0, 16], sizes = [8, 16], strides = [1, 1]} : vector<8x64xf32> to vector<8x16xf32>
    %315 = vector.extract_strided_slice %307 {offsets = [0, 1], sizes = [8, 1], strides = [1, 1]} : vector<8x4xf32> to vector<8x1xf32>
    %316 = vector.broadcast %315 : vector<8x1xf32> to vector<8x16xf32>
    %317 = arith.mulf %314, %316 : vector<8x16xf32>
    %318 = arith.addf %313, %317 : vector<8x16xf32>
    %319 = vector.extract_strided_slice %302 {offsets = [0, 32], sizes = [8, 16], strides = [1, 1]} : vector<8x64xf32> to vector<8x16xf32>
    %320 = vector.extract_strided_slice %307 {offsets = [0, 2], sizes = [8, 1], strides = [1, 1]} : vector<8x4xf32> to vector<8x1xf32>
    %321 = vector.broadcast %320 : vector<8x1xf32> to vector<8x16xf32>
    %322 = arith.mulf %319, %321 : vector<8x16xf32>
    %323 = arith.addf %318, %322 : vector<8x16xf32>
    %324 = vector.extract_strided_slice %302 {offsets = [0, 48], sizes = [8, 16], strides = [1, 1]} : vector<8x64xf32> to vector<8x16xf32>
    %325 = vector.extract_strided_slice %307 {offsets = [0, 3], sizes = [8, 1], strides = [1, 1]} : vector<8x4xf32> to vector<8x1xf32>
    %326 = vector.broadcast %325 : vector<8x1xf32> to vector<8x16xf32>
    %327 = arith.mulf %324, %326 : vector<8x16xf32>
    %328 = arith.addf %323, %327 : vector<8x16xf32>
    %329 = arith.addf %287, %328 : vector<8x16xf32>
    %330 = tpu.concatenate %35, %77, %119, %161, %203, %245, %287, %329 in 0 : vector<8x16xf32>, vector<8x16xf32>, vector<8x16xf32>, vector<8x16xf32>, vector<8x16xf32>, vector<8x16xf32>, vector<8x16xf32>, vector<8x16xf32> -> vector<64x16xf32>
    %cst_92 = arith.constant dense<0.000000e+00> : vector<64x16xf32>
    %331 = tpu.matmul %330, %10, %cst_92 {dimension_numbers = #tpu.dot_dimension_numbers<[1], [0], [0], [1], [0, 0, 1, 1], [], []>} : vector<64x16xf32>, vector<16x16xf32>, vector<64x16xf32> -> vector<64x16xf32>
    %332 = vector.broadcast %11 : vector<1x16xf32> to vector<64x16xf32>
    %333 = arith.addf %331, %332 : vector<64x16xf32>
    %cst_93 = arith.constant dense<0.000000e+00> : vector<64x320xf32>
    %334 = tpu.matmul %333, %17, %cst_93 {dimension_numbers = #tpu.dot_dimension_numbers<[1], [0], [0], [1], [0, 0, 1, 1], [], []>} : vector<64x16xf32>, vector<16x320xf32>, vector<64x320xf32> -> vector<64x320xf32>
    %335 = vector.extract_strided_slice %333 {offsets = [0, 0], sizes = [8, 16], strides = [1, 1]} : vector<64x16xf32> to vector<8x16xf32>
    %cst_94 = arith.constant dense<0.000000e+00> : vector<8x16xf32>
    %336 = tpu.matmul %335, %13, %cst_94 {dimension_numbers = #tpu.dot_dimension_numbers<[1], [0], [0], [1], [0, 0, 1, 1], [], []>} : vector<8x16xf32>, vector<16x16xf32>, vector<8x16xf32> -> vector<8x16xf32>
    %337 = vector.broadcast %14 : vector<1x16xf32> to vector<8x16xf32>
    %338 = arith.addf %336, %337 : vector<8x16xf32>
    %339 = vector.extract_strided_slice %338 {offsets = [0, 0], sizes = [8, 8], strides = [1, 1]} : vector<8x16xf32> to vector<8x8xf32>
    %340 = vector.extract_strided_slice %338 {offsets = [0, 8], sizes = [8, 8], strides = [1, 1]} : vector<8x16xf32> to vector<8x8xf32>
    %cst_95 = arith.constant -2.000000e+01 : f32
    %cst_96 = arith.constant 2.000000e+00 : f32
    %341 = vector.broadcast %cst_95 : f32 to vector<8x8xf32>
    %342 = arith.maximumf %341, %340 : vector<8x8xf32>
    %343 = vector.broadcast %cst_96 : f32 to vector<8x8xf32>
    %344 = arith.minimumf %343, %342 : vector<8x8xf32>
    %345 = math.exp %344 : vector<8x8xf32>
    %c0_97 = arith.constant 0 : index
    %c0_98 = arith.constant 0 : index
    %346 = vector.load %arg3[%c0_97, %c0_98] : memref<8x8xf32, #tpu.memory_space<vmem>>, vector<8x8xf32>
    %347 = arith.mulf %345, %346 : vector<8x8xf32>
    %348 = arith.addf %339, %347 : vector<8x8xf32>
    %349 = arith.subf %348, %339 : vector<8x8xf32>
    %350 = arith.mulf %349, %349 : vector<8x8xf32>
    %cst_99 = arith.constant -5.000000e-01 : f32
    %351 = vector.broadcast %cst_99 : f32 to vector<8x8xf32>
    %352 = arith.mulf %351, %350 : vector<8x8xf32>
    %cst_100 = arith.constant -2.000000e+00 : f32
    %353 = vector.broadcast %cst_100 : f32 to vector<8x8xf32>
    %354 = arith.mulf %353, %344 : vector<8x8xf32>
    %355 = math.exp %354 : vector<8x8xf32>
    %356 = arith.mulf %352, %355 : vector<8x8xf32>
    %357 = arith.subf %356, %344 : vector<8x8xf32>
    %cst_101 = arith.constant 0.918938517 : f32
    %358 = vector.broadcast %cst_101 : f32 to vector<8x8xf32>
    %359 = arith.subf %357, %358 : vector<8x8xf32>
    %360 = vector.broadcast %26 : vector<1x8xf32> to vector<8x8xf32>
    %361 = arith.subf %348, %360 : vector<8x8xf32>
    %362 = arith.mulf %361, %361 : vector<8x8xf32>
    %cst_102 = arith.constant -5.000000e-01 : f32
    %363 = vector.broadcast %cst_102 : f32 to vector<8x8xf32>
    %364 = arith.mulf %363, %362 : vector<8x8xf32>
    %cst_103 = arith.constant -2.000000e+00 : f32
    %365 = vector.broadcast %cst_103 : f32 to vector<1x8xf32>
    %366 = arith.mulf %365, %27 : vector<1x8xf32>
    %367 = math.exp %366 : vector<1x8xf32>
    %368 = vector.broadcast %367 : vector<1x8xf32> to vector<8x8xf32>
    %369 = arith.mulf %364, %368 : vector<8x8xf32>
    %370 = vector.broadcast %27 : vector<1x8xf32> to vector<8x8xf32>
    %371 = arith.subf %369, %370 : vector<8x8xf32>
    %cst_104 = arith.constant 0.918938517 : f32
    %372 = vector.broadcast %cst_104 : f32 to vector<8x8xf32>
    %373 = arith.subf %371, %372 : vector<8x8xf32>
    %374 = arith.subf %373, %359 : vector<8x8xf32>
    %cst_105 = arith.constant dense<0.000000e+00> : vector<8xf32>
    %375 = vector.multi_reduction <add>, %374, %cst_105 [1] : vector<8x8xf32> to vector<8xf32>
    %376 = vector.shape_cast %375 : vector<8xf32> to vector<8x1xf32>
    %cst_106 = arith.constant 0.000000e+00 : f32
    %377 = vector.broadcast %cst_106 : f32 to vector<8x8xf32>
    %c0_107 = arith.constant 0 : index
    %378 = memref.load %arg0[%c0_107] : memref<7xf32, #tpu.memory_space<smem>>
    %c0_108 = arith.constant 0 : index
    %379 = memref.load %arg1[%c0_108] : memref<7xf32, #tpu.memory_space<smem>>
    %380 = vector.extract_strided_slice %334 {offsets = [8, 0], sizes = [8, 320], strides = [1, 1]} : vector<64x320xf32> to vector<8x320xf32>
    %cst_109 = arith.constant dense<0.000000e+00> : vector<8x320xf32>
    %381 = tpu.matmul %348, %16, %cst_109 {dimension_numbers = #tpu.dot_dimension_numbers<[1], [0], [0], [1], [0, 0, 1, 1], [], []>} : vector<8x8xf32>, vector<8x320xf32>, vector<8x320xf32> -> vector<8x320xf32>
    %382 = arith.addf %381, %380 : vector<8x320xf32>
    %383 = vector.broadcast %18 : vector<1x320xf32> to vector<8x320xf32>
    %384 = arith.addf %382, %383 : vector<8x320xf32>
    %cst_110 = arith.constant 0.000000e+00 : f32
    %385 = vector.broadcast %cst_110 : f32 to vector<8x320xf32>
    %386 = arith.maximumf %384, %385 : vector<8x320xf32>
    %387 = math.absf %384 : vector<8x320xf32>
    %cst_111 = arith.constant 0.000000e+00 : f32
    %388 = vector.broadcast %cst_111 : f32 to vector<8x320xf32>
    %389 = arith.subf %388, %387 : vector<8x320xf32>
    %390 = math.exp %389 : vector<8x320xf32>
    %391 = math.log1p %390 : vector<8x320xf32>
    %392 = arith.addf %386, %391 : vector<8x320xf32>
    %cst_112 = arith.constant dense<0.000000e+00> : vector<8x72xf32>
    %393 = tpu.matmul %392, %20, %cst_112 {dimension_numbers = #tpu.dot_dimension_numbers<[1], [0], [0], [1], [0, 0, 1, 1], [], []>} : vector<8x320xf32>, vector<320x72xf32>, vector<8x72xf32> -> vector<8x72xf32>
    %394 = vector.broadcast %21 : vector<1x72xf32> to vector<8x72xf32>
    %395 = arith.addf %393, %394 : vector<8x72xf32>
    %396 = vector.extract_strided_slice %395 {offsets = [0, 0], sizes = [8, 64], strides = [1, 1]} : vector<8x72xf32> to vector<8x64xf32>
    %cst_113 = arith.constant 0.000000e+00 : f32
    %397 = vector.broadcast %cst_113 : f32 to vector<8x64xf32>
    %398 = arith.maximumf %396, %397 : vector<8x64xf32>
    %399 = math.absf %396 : vector<8x64xf32>
    %cst_114 = arith.constant 0.000000e+00 : f32
    %400 = vector.broadcast %cst_114 : f32 to vector<8x64xf32>
    %401 = arith.subf %400, %399 : vector<8x64xf32>
    %402 = math.exp %401 : vector<8x64xf32>
    %403 = math.log1p %402 : vector<8x64xf32>
    %404 = arith.addf %398, %403 : vector<8x64xf32>
    %405 = vector.extract_strided_slice %395 {offsets = [0, 64], sizes = [8, 8], strides = [1, 1]} : vector<8x72xf32> to vector<8x8xf32>
    %cst_115 = arith.constant dense<0.000000e+00> : vector<8x16xf32>
    %406 = tpu.matmul %404, %23, %cst_115 {dimension_numbers = #tpu.dot_dimension_numbers<[1], [0], [0], [1], [0, 0, 1, 1], [], []>} : vector<8x64xf32>, vector<64x16xf32>, vector<8x16xf32> -> vector<8x16xf32>
    %407 = vector.broadcast %24 : vector<1x16xf32> to vector<8x16xf32>
    %408 = arith.addf %406, %407 : vector<8x16xf32>
    %409 = vector.extract_strided_slice %408 {offsets = [0, 0], sizes = [8, 8], strides = [1, 1]} : vector<8x16xf32> to vector<8x8xf32>
    %410 = vector.extract_strided_slice %408 {offsets = [0, 8], sizes = [8, 8], strides = [1, 1]} : vector<8x16xf32> to vector<8x8xf32>
    %cst_116 = arith.constant 0.000000e+00 : f32
    %411 = vector.broadcast %cst_116 : f32 to vector<8x8xf32>
    %412 = arith.subf %411, %405 : vector<8x8xf32>
    %413 = math.exp %412 : vector<8x8xf32>
    %cst_117 = arith.constant 1.000000e+00 : f32
    %414 = vector.broadcast %cst_117 : f32 to vector<8x8xf32>
    %415 = arith.addf %414, %413 : vector<8x8xf32>
    %416 = tpu.reciprocal %415 {approx = true} : vector<8x8xf32> -> vector<8x8xf32>
    %417 = arith.subf %409, %410 : vector<8x8xf32>
    %418 = arith.mulf %417, %415 : vector<8x8xf32>
    %419 = arith.mulf %418, %418 : vector<8x8xf32>
    %420 = vector.broadcast %378 : f32 to vector<8x8xf32>
    %421 = arith.mulf %419, %420 : vector<8x8xf32>
    %422 = arith.addf %377, %421 : vector<8x8xf32>
    %423 = vector.broadcast %378 : f32 to vector<8x8xf32>
    %424 = arith.mulf %409, %423 : vector<8x8xf32>
    %425 = arith.addf %348, %424 : vector<8x8xf32>
    %426 = vector.broadcast %379 : f32 to vector<8x8xf32>
    %427 = arith.mulf %416, %426 : vector<8x8xf32>
    %c0_118 = arith.constant 0 : index
    %c0_119 = arith.constant 0 : index
    %c0_120 = arith.constant 0 : index
    %428 = vector.load %arg4[%c0_118, %c0_119, %c0_120] : memref<7x8x8xf32, #tpu.memory_space<vmem>>, vector<1x8x8xf32>
    %429 = vector.shape_cast %428 : vector<1x8x8xf32> to vector<8x8xf32>
    %430 = arith.mulf %427, %429 : vector<8x8xf32>
    %431 = arith.addf %425, %430 : vector<8x8xf32>
    %c1_121 = arith.constant 1 : index
    %432 = memref.load %arg0[%c1_121] : memref<7xf32, #tpu.memory_space<smem>>
    %c1_122 = arith.constant 1 : index
    %433 = memref.load %arg1[%c1_122] : memref<7xf32, #tpu.memory_space<smem>>
    %434 = vector.extract_strided_slice %334 {offsets = [16, 0], sizes = [8, 320], strides = [1, 1]} : vector<64x320xf32> to vector<8x320xf32>
    %cst_123 = arith.constant dense<0.000000e+00> : vector<8x320xf32>
    %435 = tpu.matmul %431, %16, %cst_123 {dimension_numbers = #tpu.dot_dimension_numbers<[1], [0], [0], [1], [0, 0, 1, 1], [], []>} : vector<8x8xf32>, vector<8x320xf32>, vector<8x320xf32> -> vector<8x320xf32>
    %436 = arith.addf %435, %434 : vector<8x320xf32>
    %437 = vector.broadcast %18 : vector<1x320xf32> to vector<8x320xf32>
    %438 = arith.addf %436, %437 : vector<8x320xf32>
    %cst_124 = arith.constant 0.000000e+00 : f32
    %439 = vector.broadcast %cst_124 : f32 to vector<8x320xf32>
    %440 = arith.maximumf %438, %439 : vector<8x320xf32>
    %441 = math.absf %438 : vector<8x320xf32>
    %cst_125 = arith.constant 0.000000e+00 : f32
    %442 = vector.broadcast %cst_125 : f32 to vector<8x320xf32>
    %443 = arith.subf %442, %441 : vector<8x320xf32>
    %444 = math.exp %443 : vector<8x320xf32>
    %445 = math.log1p %444 : vector<8x320xf32>
    %446 = arith.addf %440, %445 : vector<8x320xf32>
    %cst_126 = arith.constant dense<0.000000e+00> : vector<8x72xf32>
    %447 = tpu.matmul %446, %20, %cst_126 {dimension_numbers = #tpu.dot_dimension_numbers<[1], [0], [0], [1], [0, 0, 1, 1], [], []>} : vector<8x320xf32>, vector<320x72xf32>, vector<8x72xf32> -> vector<8x72xf32>
    %448 = vector.broadcast %21 : vector<1x72xf32> to vector<8x72xf32>
    %449 = arith.addf %447, %448 : vector<8x72xf32>
    %450 = vector.extract_strided_slice %449 {offsets = [0, 0], sizes = [8, 64], strides = [1, 1]} : vector<8x72xf32> to vector<8x64xf32>
    %cst_127 = arith.constant 0.000000e+00 : f32
    %451 = vector.broadcast %cst_127 : f32 to vector<8x64xf32>
    %452 = arith.maximumf %450, %451 : vector<8x64xf32>
    %453 = math.absf %450 : vector<8x64xf32>
    %cst_128 = arith.constant 0.000000e+00 : f32
    %454 = vector.broadcast %cst_128 : f32 to vector<8x64xf32>
    %455 = arith.subf %454, %453 : vector<8x64xf32>
    %456 = math.exp %455 : vector<8x64xf32>
    %457 = math.log1p %456 : vector<8x64xf32>
    %458 = arith.addf %452, %457 : vector<8x64xf32>
    %459 = vector.extract_strided_slice %449 {offsets = [0, 64], sizes = [8, 8], strides = [1, 1]} : vector<8x72xf32> to vector<8x8xf32>
    %cst_129 = arith.constant dense<0.000000e+00> : vector<8x16xf32>
    %460 = tpu.matmul %458, %23, %cst_129 {dimension_numbers = #tpu.dot_dimension_numbers<[1], [0], [0], [1], [0, 0, 1, 1], [], []>} : vector<8x64xf32>, vector<64x16xf32>, vector<8x16xf32> -> vector<8x16xf32>
    %461 = vector.broadcast %24 : vector<1x16xf32> to vector<8x16xf32>
    %462 = arith.addf %460, %461 : vector<8x16xf32>
    %463 = vector.extract_strided_slice %462 {offsets = [0, 0], sizes = [8, 8], strides = [1, 1]} : vector<8x16xf32> to vector<8x8xf32>
    %464 = vector.extract_strided_slice %462 {offsets = [0, 8], sizes = [8, 8], strides = [1, 1]} : vector<8x16xf32> to vector<8x8xf32>
    %cst_130 = arith.constant 0.000000e+00 : f32
    %465 = vector.broadcast %cst_130 : f32 to vector<8x8xf32>
    %466 = arith.subf %465, %459 : vector<8x8xf32>
    %467 = math.exp %466 : vector<8x8xf32>
    %cst_131 = arith.constant 1.000000e+00 : f32
    %468 = vector.broadcast %cst_131 : f32 to vector<8x8xf32>
    %469 = arith.addf %468, %467 : vector<8x8xf32>
    %470 = tpu.reciprocal %469 {approx = true} : vector<8x8xf32> -> vector<8x8xf32>
    %471 = arith.subf %463, %464 : vector<8x8xf32>
    %472 = arith.mulf %471, %469 : vector<8x8xf32>
    %473 = arith.mulf %472, %472 : vector<8x8xf32>
    %474 = vector.broadcast %432 : f32 to vector<8x8xf32>
    %475 = arith.mulf %473, %474 : vector<8x8xf32>
    %476 = arith.addf %422, %475 : vector<8x8xf32>
    %477 = vector.broadcast %432 : f32 to vector<8x8xf32>
    %478 = arith.mulf %463, %477 : vector<8x8xf32>
    %479 = arith.addf %431, %478 : vector<8x8xf32>
    %480 = vector.broadcast %433 : f32 to vector<8x8xf32>
    %481 = arith.mulf %470, %480 : vector<8x8xf32>
    %c1_132 = arith.constant 1 : index
    %c0_133 = arith.constant 0 : index
    %c0_134 = arith.constant 0 : index
    %482 = vector.load %arg4[%c1_132, %c0_133, %c0_134] : memref<7x8x8xf32, #tpu.memory_space<vmem>>, vector<1x8x8xf32>
    %483 = vector.shape_cast %482 : vector<1x8x8xf32> to vector<8x8xf32>
    %484 = arith.mulf %481, %483 : vector<8x8xf32>
    %485 = arith.addf %479, %484 : vector<8x8xf32>
    %c2_135 = arith.constant 2 : index
    %486 = memref.load %arg0[%c2_135] : memref<7xf32, #tpu.memory_space<smem>>
    %c2_136 = arith.constant 2 : index
    %487 = memref.load %arg1[%c2_136] : memref<7xf32, #tpu.memory_space<smem>>
    %488 = vector.extract_strided_slice %334 {offsets = [24, 0], sizes = [8, 320], strides = [1, 1]} : vector<64x320xf32> to vector<8x320xf32>
    %cst_137 = arith.constant dense<0.000000e+00> : vector<8x320xf32>
    %489 = tpu.matmul %485, %16, %cst_137 {dimension_numbers = #tpu.dot_dimension_numbers<[1], [0], [0], [1], [0, 0, 1, 1], [], []>} : vector<8x8xf32>, vector<8x320xf32>, vector<8x320xf32> -> vector<8x320xf32>
    %490 = arith.addf %489, %488 : vector<8x320xf32>
    %491 = vector.broadcast %18 : vector<1x320xf32> to vector<8x320xf32>
    %492 = arith.addf %490, %491 : vector<8x320xf32>
    %cst_138 = arith.constant 0.000000e+00 : f32
    %493 = vector.broadcast %cst_138 : f32 to vector<8x320xf32>
    %494 = arith.maximumf %492, %493 : vector<8x320xf32>
    %495 = math.absf %492 : vector<8x320xf32>
    %cst_139 = arith.constant 0.000000e+00 : f32
    %496 = vector.broadcast %cst_139 : f32 to vector<8x320xf32>
    %497 = arith.subf %496, %495 : vector<8x320xf32>
    %498 = math.exp %497 : vector<8x320xf32>
    %499 = math.log1p %498 : vector<8x320xf32>
    %500 = arith.addf %494, %499 : vector<8x320xf32>
    %cst_140 = arith.constant dense<0.000000e+00> : vector<8x72xf32>
    %501 = tpu.matmul %500, %20, %cst_140 {dimension_numbers = #tpu.dot_dimension_numbers<[1], [0], [0], [1], [0, 0, 1, 1], [], []>} : vector<8x320xf32>, vector<320x72xf32>, vector<8x72xf32> -> vector<8x72xf32>
    %502 = vector.broadcast %21 : vector<1x72xf32> to vector<8x72xf32>
    %503 = arith.addf %501, %502 : vector<8x72xf32>
    %504 = vector.extract_strided_slice %503 {offsets = [0, 0], sizes = [8, 64], strides = [1, 1]} : vector<8x72xf32> to vector<8x64xf32>
    %cst_141 = arith.constant 0.000000e+00 : f32
    %505 = vector.broadcast %cst_141 : f32 to vector<8x64xf32>
    %506 = arith.maximumf %504, %505 : vector<8x64xf32>
    %507 = math.absf %504 : vector<8x64xf32>
    %cst_142 = arith.constant 0.000000e+00 : f32
    %508 = vector.broadcast %cst_142 : f32 to vector<8x64xf32>
    %509 = arith.subf %508, %507 : vector<8x64xf32>
    %510 = math.exp %509 : vector<8x64xf32>
    %511 = math.log1p %510 : vector<8x64xf32>
    %512 = arith.addf %506, %511 : vector<8x64xf32>
    %513 = vector.extract_strided_slice %503 {offsets = [0, 64], sizes = [8, 8], strides = [1, 1]} : vector<8x72xf32> to vector<8x8xf32>
    %cst_143 = arith.constant dense<0.000000e+00> : vector<8x16xf32>
    %514 = tpu.matmul %512, %23, %cst_143 {dimension_numbers = #tpu.dot_dimension_numbers<[1], [0], [0], [1], [0, 0, 1, 1], [], []>} : vector<8x64xf32>, vector<64x16xf32>, vector<8x16xf32> -> vector<8x16xf32>
    %515 = vector.broadcast %24 : vector<1x16xf32> to vector<8x16xf32>
    %516 = arith.addf %514, %515 : vector<8x16xf32>
    %517 = vector.extract_strided_slice %516 {offsets = [0, 0], sizes = [8, 8], strides = [1, 1]} : vector<8x16xf32> to vector<8x8xf32>
    %518 = vector.extract_strided_slice %516 {offsets = [0, 8], sizes = [8, 8], strides = [1, 1]} : vector<8x16xf32> to vector<8x8xf32>
    %cst_144 = arith.constant 0.000000e+00 : f32
    %519 = vector.broadcast %cst_144 : f32 to vector<8x8xf32>
    %520 = arith.subf %519, %513 : vector<8x8xf32>
    %521 = math.exp %520 : vector<8x8xf32>
    %cst_145 = arith.constant 1.000000e+00 : f32
    %522 = vector.broadcast %cst_145 : f32 to vector<8x8xf32>
    %523 = arith.addf %522, %521 : vector<8x8xf32>
    %524 = tpu.reciprocal %523 {approx = true} : vector<8x8xf32> -> vector<8x8xf32>
    %525 = arith.subf %517, %518 : vector<8x8xf32>
    %526 = arith.mulf %525, %523 : vector<8x8xf32>
    %527 = arith.mulf %526, %526 : vector<8x8xf32>
    %528 = vector.broadcast %486 : f32 to vector<8x8xf32>
    %529 = arith.mulf %527, %528 : vector<8x8xf32>
    %530 = arith.addf %476, %529 : vector<8x8xf32>
    %531 = vector.broadcast %486 : f32 to vector<8x8xf32>
    %532 = arith.mulf %517, %531 : vector<8x8xf32>
    %533 = arith.addf %485, %532 : vector<8x8xf32>
    %534 = vector.broadcast %487 : f32 to vector<8x8xf32>
    %535 = arith.mulf %524, %534 : vector<8x8xf32>
    %c2_146 = arith.constant 2 : index
    %c0_147 = arith.constant 0 : index
    %c0_148 = arith.constant 0 : index
    %536 = vector.load %arg4[%c2_146, %c0_147, %c0_148] : memref<7x8x8xf32, #tpu.memory_space<vmem>>, vector<1x8x8xf32>
    %537 = vector.shape_cast %536 : vector<1x8x8xf32> to vector<8x8xf32>
    %538 = arith.mulf %535, %537 : vector<8x8xf32>
    %539 = arith.addf %533, %538 : vector<8x8xf32>
    %c3_149 = arith.constant 3 : index
    %540 = memref.load %arg0[%c3_149] : memref<7xf32, #tpu.memory_space<smem>>
    %c3_150 = arith.constant 3 : index
    %541 = memref.load %arg1[%c3_150] : memref<7xf32, #tpu.memory_space<smem>>
    %542 = vector.extract_strided_slice %334 {offsets = [32, 0], sizes = [8, 320], strides = [1, 1]} : vector<64x320xf32> to vector<8x320xf32>
    %cst_151 = arith.constant dense<0.000000e+00> : vector<8x320xf32>
    %543 = tpu.matmul %539, %16, %cst_151 {dimension_numbers = #tpu.dot_dimension_numbers<[1], [0], [0], [1], [0, 0, 1, 1], [], []>} : vector<8x8xf32>, vector<8x320xf32>, vector<8x320xf32> -> vector<8x320xf32>
    %544 = arith.addf %543, %542 : vector<8x320xf32>
    %545 = vector.broadcast %18 : vector<1x320xf32> to vector<8x320xf32>
    %546 = arith.addf %544, %545 : vector<8x320xf32>
    %cst_152 = arith.constant 0.000000e+00 : f32
    %547 = vector.broadcast %cst_152 : f32 to vector<8x320xf32>
    %548 = arith.maximumf %546, %547 : vector<8x320xf32>
    %549 = math.absf %546 : vector<8x320xf32>
    %cst_153 = arith.constant 0.000000e+00 : f32
    %550 = vector.broadcast %cst_153 : f32 to vector<8x320xf32>
    %551 = arith.subf %550, %549 : vector<8x320xf32>
    %552 = math.exp %551 : vector<8x320xf32>
    %553 = math.log1p %552 : vector<8x320xf32>
    %554 = arith.addf %548, %553 : vector<8x320xf32>
    %cst_154 = arith.constant dense<0.000000e+00> : vector<8x72xf32>
    %555 = tpu.matmul %554, %20, %cst_154 {dimension_numbers = #tpu.dot_dimension_numbers<[1], [0], [0], [1], [0, 0, 1, 1], [], []>} : vector<8x320xf32>, vector<320x72xf32>, vector<8x72xf32> -> vector<8x72xf32>
    %556 = vector.broadcast %21 : vector<1x72xf32> to vector<8x72xf32>
    %557 = arith.addf %555, %556 : vector<8x72xf32>
    %558 = vector.extract_strided_slice %557 {offsets = [0, 0], sizes = [8, 64], strides = [1, 1]} : vector<8x72xf32> to vector<8x64xf32>
    %cst_155 = arith.constant 0.000000e+00 : f32
    %559 = vector.broadcast %cst_155 : f32 to vector<8x64xf32>
    %560 = arith.maximumf %558, %559 : vector<8x64xf32>
    %561 = math.absf %558 : vector<8x64xf32>
    %cst_156 = arith.constant 0.000000e+00 : f32
    %562 = vector.broadcast %cst_156 : f32 to vector<8x64xf32>
    %563 = arith.subf %562, %561 : vector<8x64xf32>
    %564 = math.exp %563 : vector<8x64xf32>
    %565 = math.log1p %564 : vector<8x64xf32>
    %566 = arith.addf %560, %565 : vector<8x64xf32>
    %567 = vector.extract_strided_slice %557 {offsets = [0, 64], sizes = [8, 8], strides = [1, 1]} : vector<8x72xf32> to vector<8x8xf32>
    %cst_157 = arith.constant dense<0.000000e+00> : vector<8x16xf32>
    %568 = tpu.matmul %566, %23, %cst_157 {dimension_numbers = #tpu.dot_dimension_numbers<[1], [0], [0], [1], [0, 0, 1, 1], [], []>} : vector<8x64xf32>, vector<64x16xf32>, vector<8x16xf32> -> vector<8x16xf32>
    %569 = vector.broadcast %24 : vector<1x16xf32> to vector<8x16xf32>
    %570 = arith.addf %568, %569 : vector<8x16xf32>
    %571 = vector.extract_strided_slice %570 {offsets = [0, 0], sizes = [8, 8], strides = [1, 1]} : vector<8x16xf32> to vector<8x8xf32>
    %572 = vector.extract_strided_slice %570 {offsets = [0, 8], sizes = [8, 8], strides = [1, 1]} : vector<8x16xf32> to vector<8x8xf32>
    %cst_158 = arith.constant 0.000000e+00 : f32
    %573 = vector.broadcast %cst_158 : f32 to vector<8x8xf32>
    %574 = arith.subf %573, %567 : vector<8x8xf32>
    %575 = math.exp %574 : vector<8x8xf32>
    %cst_159 = arith.constant 1.000000e+00 : f32
    %576 = vector.broadcast %cst_159 : f32 to vector<8x8xf32>
    %577 = arith.addf %576, %575 : vector<8x8xf32>
    %578 = tpu.reciprocal %577 {approx = true} : vector<8x8xf32> -> vector<8x8xf32>
    %579 = arith.subf %571, %572 : vector<8x8xf32>
    %580 = arith.mulf %579, %577 : vector<8x8xf32>
    %581 = arith.mulf %580, %580 : vector<8x8xf32>
    %582 = vector.broadcast %540 : f32 to vector<8x8xf32>
    %583 = arith.mulf %581, %582 : vector<8x8xf32>
    %584 = arith.addf %530, %583 : vector<8x8xf32>
    %585 = vector.broadcast %540 : f32 to vector<8x8xf32>
    %586 = arith.mulf %571, %585 : vector<8x8xf32>
    %587 = arith.addf %539, %586 : vector<8x8xf32>
    %588 = vector.broadcast %541 : f32 to vector<8x8xf32>
    %589 = arith.mulf %578, %588 : vector<8x8xf32>
    %c3_160 = arith.constant 3 : index
    %c0_161 = arith.constant 0 : index
    %c0_162 = arith.constant 0 : index
    %590 = vector.load %arg4[%c3_160, %c0_161, %c0_162] : memref<7x8x8xf32, #tpu.memory_space<vmem>>, vector<1x8x8xf32>
    %591 = vector.shape_cast %590 : vector<1x8x8xf32> to vector<8x8xf32>
    %592 = arith.mulf %589, %591 : vector<8x8xf32>
    %593 = arith.addf %587, %592 : vector<8x8xf32>
    %c4_163 = arith.constant 4 : index
    %594 = memref.load %arg0[%c4_163] : memref<7xf32, #tpu.memory_space<smem>>
    %c4_164 = arith.constant 4 : index
    %595 = memref.load %arg1[%c4_164] : memref<7xf32, #tpu.memory_space<smem>>
    %596 = vector.extract_strided_slice %334 {offsets = [40, 0], sizes = [8, 320], strides = [1, 1]} : vector<64x320xf32> to vector<8x320xf32>
    %cst_165 = arith.constant dense<0.000000e+00> : vector<8x320xf32>
    %597 = tpu.matmul %593, %16, %cst_165 {dimension_numbers = #tpu.dot_dimension_numbers<[1], [0], [0], [1], [0, 0, 1, 1], [], []>} : vector<8x8xf32>, vector<8x320xf32>, vector<8x320xf32> -> vector<8x320xf32>
    %598 = arith.addf %597, %596 : vector<8x320xf32>
    %599 = vector.broadcast %18 : vector<1x320xf32> to vector<8x320xf32>
    %600 = arith.addf %598, %599 : vector<8x320xf32>
    %cst_166 = arith.constant 0.000000e+00 : f32
    %601 = vector.broadcast %cst_166 : f32 to vector<8x320xf32>
    %602 = arith.maximumf %600, %601 : vector<8x320xf32>
    %603 = math.absf %600 : vector<8x320xf32>
    %cst_167 = arith.constant 0.000000e+00 : f32
    %604 = vector.broadcast %cst_167 : f32 to vector<8x320xf32>
    %605 = arith.subf %604, %603 : vector<8x320xf32>
    %606 = math.exp %605 : vector<8x320xf32>
    %607 = math.log1p %606 : vector<8x320xf32>
    %608 = arith.addf %602, %607 : vector<8x320xf32>
    %cst_168 = arith.constant dense<0.000000e+00> : vector<8x72xf32>
    %609 = tpu.matmul %608, %20, %cst_168 {dimension_numbers = #tpu.dot_dimension_numbers<[1], [0], [0], [1], [0, 0, 1, 1], [], []>} : vector<8x320xf32>, vector<320x72xf32>, vector<8x72xf32> -> vector<8x72xf32>
    %610 = vector.broadcast %21 : vector<1x72xf32> to vector<8x72xf32>
    %611 = arith.addf %609, %610 : vector<8x72xf32>
    %612 = vector.extract_strided_slice %611 {offsets = [0, 0], sizes = [8, 64], strides = [1, 1]} : vector<8x72xf32> to vector<8x64xf32>
    %cst_169 = arith.constant 0.000000e+00 : f32
    %613 = vector.broadcast %cst_169 : f32 to vector<8x64xf32>
    %614 = arith.maximumf %612, %613 : vector<8x64xf32>
    %615 = math.absf %612 : vector<8x64xf32>
    %cst_170 = arith.constant 0.000000e+00 : f32
    %616 = vector.broadcast %cst_170 : f32 to vector<8x64xf32>
    %617 = arith.subf %616, %615 : vector<8x64xf32>
    %618 = math.exp %617 : vector<8x64xf32>
    %619 = math.log1p %618 : vector<8x64xf32>
    %620 = arith.addf %614, %619 : vector<8x64xf32>
    %621 = vector.extract_strided_slice %611 {offsets = [0, 64], sizes = [8, 8], strides = [1, 1]} : vector<8x72xf32> to vector<8x8xf32>
    %cst_171 = arith.constant dense<0.000000e+00> : vector<8x16xf32>
    %622 = tpu.matmul %620, %23, %cst_171 {dimension_numbers = #tpu.dot_dimension_numbers<[1], [0], [0], [1], [0, 0, 1, 1], [], []>} : vector<8x64xf32>, vector<64x16xf32>, vector<8x16xf32> -> vector<8x16xf32>
    %623 = vector.broadcast %24 : vector<1x16xf32> to vector<8x16xf32>
    %624 = arith.addf %622, %623 : vector<8x16xf32>
    %625 = vector.extract_strided_slice %624 {offsets = [0, 0], sizes = [8, 8], strides = [1, 1]} : vector<8x16xf32> to vector<8x8xf32>
    %626 = vector.extract_strided_slice %624 {offsets = [0, 8], sizes = [8, 8], strides = [1, 1]} : vector<8x16xf32> to vector<8x8xf32>
    %cst_172 = arith.constant 0.000000e+00 : f32
    %627 = vector.broadcast %cst_172 : f32 to vector<8x8xf32>
    %628 = arith.subf %627, %621 : vector<8x8xf32>
    %629 = math.exp %628 : vector<8x8xf32>
    %cst_173 = arith.constant 1.000000e+00 : f32
    %630 = vector.broadcast %cst_173 : f32 to vector<8x8xf32>
    %631 = arith.addf %630, %629 : vector<8x8xf32>
    %632 = tpu.reciprocal %631 {approx = true} : vector<8x8xf32> -> vector<8x8xf32>
    %633 = arith.subf %625, %626 : vector<8x8xf32>
    %634 = arith.mulf %633, %631 : vector<8x8xf32>
    %635 = arith.mulf %634, %634 : vector<8x8xf32>
    %636 = vector.broadcast %594 : f32 to vector<8x8xf32>
    %637 = arith.mulf %635, %636 : vector<8x8xf32>
    %638 = arith.addf %584, %637 : vector<8x8xf32>
    %639 = vector.broadcast %594 : f32 to vector<8x8xf32>
    %640 = arith.mulf %625, %639 : vector<8x8xf32>
    %641 = arith.addf %593, %640 : vector<8x8xf32>
    %642 = vector.broadcast %595 : f32 to vector<8x8xf32>
    %643 = arith.mulf %632, %642 : vector<8x8xf32>
    %c4_174 = arith.constant 4 : index
    %c0_175 = arith.constant 0 : index
    %c0_176 = arith.constant 0 : index
    %644 = vector.load %arg4[%c4_174, %c0_175, %c0_176] : memref<7x8x8xf32, #tpu.memory_space<vmem>>, vector<1x8x8xf32>
    %645 = vector.shape_cast %644 : vector<1x8x8xf32> to vector<8x8xf32>
    %646 = arith.mulf %643, %645 : vector<8x8xf32>
    %647 = arith.addf %641, %646 : vector<8x8xf32>
    %c5_177 = arith.constant 5 : index
    %648 = memref.load %arg0[%c5_177] : memref<7xf32, #tpu.memory_space<smem>>
    %c5_178 = arith.constant 5 : index
    %649 = memref.load %arg1[%c5_178] : memref<7xf32, #tpu.memory_space<smem>>
    %650 = vector.extract_strided_slice %334 {offsets = [48, 0], sizes = [8, 320], strides = [1, 1]} : vector<64x320xf32> to vector<8x320xf32>
    %cst_179 = arith.constant dense<0.000000e+00> : vector<8x320xf32>
    %651 = tpu.matmul %647, %16, %cst_179 {dimension_numbers = #tpu.dot_dimension_numbers<[1], [0], [0], [1], [0, 0, 1, 1], [], []>} : vector<8x8xf32>, vector<8x320xf32>, vector<8x320xf32> -> vector<8x320xf32>
    %652 = arith.addf %651, %650 : vector<8x320xf32>
    %653 = vector.broadcast %18 : vector<1x320xf32> to vector<8x320xf32>
    %654 = arith.addf %652, %653 : vector<8x320xf32>
    %cst_180 = arith.constant 0.000000e+00 : f32
    %655 = vector.broadcast %cst_180 : f32 to vector<8x320xf32>
    %656 = arith.maximumf %654, %655 : vector<8x320xf32>
    %657 = math.absf %654 : vector<8x320xf32>
    %cst_181 = arith.constant 0.000000e+00 : f32
    %658 = vector.broadcast %cst_181 : f32 to vector<8x320xf32>
    %659 = arith.subf %658, %657 : vector<8x320xf32>
    %660 = math.exp %659 : vector<8x320xf32>
    %661 = math.log1p %660 : vector<8x320xf32>
    %662 = arith.addf %656, %661 : vector<8x320xf32>
    %cst_182 = arith.constant dense<0.000000e+00> : vector<8x72xf32>
    %663 = tpu.matmul %662, %20, %cst_182 {dimension_numbers = #tpu.dot_dimension_numbers<[1], [0], [0], [1], [0, 0, 1, 1], [], []>} : vector<8x320xf32>, vector<320x72xf32>, vector<8x72xf32> -> vector<8x72xf32>
    %664 = vector.broadcast %21 : vector<1x72xf32> to vector<8x72xf32>
    %665 = arith.addf %663, %664 : vector<8x72xf32>
    %666 = vector.extract_strided_slice %665 {offsets = [0, 0], sizes = [8, 64], strides = [1, 1]} : vector<8x72xf32> to vector<8x64xf32>
    %cst_183 = arith.constant 0.000000e+00 : f32
    %667 = vector.broadcast %cst_183 : f32 to vector<8x64xf32>
    %668 = arith.maximumf %666, %667 : vector<8x64xf32>
    %669 = math.absf %666 : vector<8x64xf32>
    %cst_184 = arith.constant 0.000000e+00 : f32
    %670 = vector.broadcast %cst_184 : f32 to vector<8x64xf32>
    %671 = arith.subf %670, %669 : vector<8x64xf32>
    %672 = math.exp %671 : vector<8x64xf32>
    %673 = math.log1p %672 : vector<8x64xf32>
    %674 = arith.addf %668, %673 : vector<8x64xf32>
    %675 = vector.extract_strided_slice %665 {offsets = [0, 64], sizes = [8, 8], strides = [1, 1]} : vector<8x72xf32> to vector<8x8xf32>
    %cst_185 = arith.constant dense<0.000000e+00> : vector<8x16xf32>
    %676 = tpu.matmul %674, %23, %cst_185 {dimension_numbers = #tpu.dot_dimension_numbers<[1], [0], [0], [1], [0, 0, 1, 1], [], []>} : vector<8x64xf32>, vector<64x16xf32>, vector<8x16xf32> -> vector<8x16xf32>
    %677 = vector.broadcast %24 : vector<1x16xf32> to vector<8x16xf32>
    %678 = arith.addf %676, %677 : vector<8x16xf32>
    %679 = vector.extract_strided_slice %678 {offsets = [0, 0], sizes = [8, 8], strides = [1, 1]} : vector<8x16xf32> to vector<8x8xf32>
    %680 = vector.extract_strided_slice %678 {offsets = [0, 8], sizes = [8, 8], strides = [1, 1]} : vector<8x16xf32> to vector<8x8xf32>
    %cst_186 = arith.constant 0.000000e+00 : f32
    %681 = vector.broadcast %cst_186 : f32 to vector<8x8xf32>
    %682 = arith.subf %681, %675 : vector<8x8xf32>
    %683 = math.exp %682 : vector<8x8xf32>
    %cst_187 = arith.constant 1.000000e+00 : f32
    %684 = vector.broadcast %cst_187 : f32 to vector<8x8xf32>
    %685 = arith.addf %684, %683 : vector<8x8xf32>
    %686 = tpu.reciprocal %685 {approx = true} : vector<8x8xf32> -> vector<8x8xf32>
    %687 = arith.subf %679, %680 : vector<8x8xf32>
    %688 = arith.mulf %687, %685 : vector<8x8xf32>
    %689 = arith.mulf %688, %688 : vector<8x8xf32>
    %690 = vector.broadcast %648 : f32 to vector<8x8xf32>
    %691 = arith.mulf %689, %690 : vector<8x8xf32>
    %692 = arith.addf %638, %691 : vector<8x8xf32>
    %693 = vector.broadcast %648 : f32 to vector<8x8xf32>
    %694 = arith.mulf %679, %693 : vector<8x8xf32>
    %695 = arith.addf %647, %694 : vector<8x8xf32>
    %696 = vector.broadcast %649 : f32 to vector<8x8xf32>
    %697 = arith.mulf %686, %696 : vector<8x8xf32>
    %c5_188 = arith.constant 5 : index
    %c0_189 = arith.constant 0 : index
    %c0_190 = arith.constant 0 : index
    %698 = vector.load %arg4[%c5_188, %c0_189, %c0_190] : memref<7x8x8xf32, #tpu.memory_space<vmem>>, vector<1x8x8xf32>
    %699 = vector.shape_cast %698 : vector<1x8x8xf32> to vector<8x8xf32>
    %700 = arith.mulf %697, %699 : vector<8x8xf32>
    %701 = arith.addf %695, %700 : vector<8x8xf32>
    %c6_191 = arith.constant 6 : index
    %702 = memref.load %arg0[%c6_191] : memref<7xf32, #tpu.memory_space<smem>>
    %c6_192 = arith.constant 6 : index
    %703 = memref.load %arg1[%c6_192] : memref<7xf32, #tpu.memory_space<smem>>
    %704 = vector.extract_strided_slice %334 {offsets = [56, 0], sizes = [8, 320], strides = [1, 1]} : vector<64x320xf32> to vector<8x320xf32>
    %cst_193 = arith.constant dense<0.000000e+00> : vector<8x320xf32>
    %705 = tpu.matmul %701, %16, %cst_193 {dimension_numbers = #tpu.dot_dimension_numbers<[1], [0], [0], [1], [0, 0, 1, 1], [], []>} : vector<8x8xf32>, vector<8x320xf32>, vector<8x320xf32> -> vector<8x320xf32>
    %706 = arith.addf %705, %704 : vector<8x320xf32>
    %707 = vector.broadcast %18 : vector<1x320xf32> to vector<8x320xf32>
    %708 = arith.addf %706, %707 : vector<8x320xf32>
    %cst_194 = arith.constant 0.000000e+00 : f32
    %709 = vector.broadcast %cst_194 : f32 to vector<8x320xf32>
    %710 = arith.maximumf %708, %709 : vector<8x320xf32>
    %711 = math.absf %708 : vector<8x320xf32>
    %cst_195 = arith.constant 0.000000e+00 : f32
    %712 = vector.broadcast %cst_195 : f32 to vector<8x320xf32>
    %713 = arith.subf %712, %711 : vector<8x320xf32>
    %714 = math.exp %713 : vector<8x320xf32>
    %715 = math.log1p %714 : vector<8x320xf32>
    %716 = arith.addf %710, %715 : vector<8x320xf32>
    %cst_196 = arith.constant dense<0.000000e+00> : vector<8x72xf32>
    %717 = tpu.matmul %716, %20, %cst_196 {dimension_numbers = #tpu.dot_dimension_numbers<[1], [0], [0], [1], [0, 0, 1, 1], [], []>} : vector<8x320xf32>, vector<320x72xf32>, vector<8x72xf32> -> vector<8x72xf32>
    %718 = vector.broadcast %21 : vector<1x72xf32> to vector<8x72xf32>
    %719 = arith.addf %717, %718 : vector<8x72xf32>
    %720 = vector.extract_strided_slice %719 {offsets = [0, 0], sizes = [8, 64], strides = [1, 1]} : vector<8x72xf32> to vector<8x64xf32>
    %cst_197 = arith.constant 0.000000e+00 : f32
    %721 = vector.broadcast %cst_197 : f32 to vector<8x64xf32>
    %722 = arith.maximumf %720, %721 : vector<8x64xf32>
    %723 = math.absf %720 : vector<8x64xf32>
    %cst_198 = arith.constant 0.000000e+00 : f32
    %724 = vector.broadcast %cst_198 : f32 to vector<8x64xf32>
    %725 = arith.subf %724, %723 : vector<8x64xf32>
    %726 = math.exp %725 : vector<8x64xf32>
    %727 = math.log1p %726 : vector<8x64xf32>
    %728 = arith.addf %722, %727 : vector<8x64xf32>
    %729 = vector.extract_strided_slice %719 {offsets = [0, 64], sizes = [8, 8], strides = [1, 1]} : vector<8x72xf32> to vector<8x8xf32>
    %cst_199 = arith.constant dense<0.000000e+00> : vector<8x16xf32>
    %730 = tpu.matmul %728, %23, %cst_199 {dimension_numbers = #tpu.dot_dimension_numbers<[1], [0], [0], [1], [0, 0, 1, 1], [], []>} : vector<8x64xf32>, vector<64x16xf32>, vector<8x16xf32> -> vector<8x16xf32>
    %731 = vector.broadcast %24 : vector<1x16xf32> to vector<8x16xf32>
    %732 = arith.addf %730, %731 : vector<8x16xf32>
    %733 = vector.extract_strided_slice %732 {offsets = [0, 0], sizes = [8, 8], strides = [1, 1]} : vector<8x16xf32> to vector<8x8xf32>
    %734 = vector.extract_strided_slice %732 {offsets = [0, 8], sizes = [8, 8], strides = [1, 1]} : vector<8x16xf32> to vector<8x8xf32>
    %cst_200 = arith.constant 0.000000e+00 : f32
    %735 = vector.broadcast %cst_200 : f32 to vector<8x8xf32>
    %736 = arith.subf %735, %729 : vector<8x8xf32>
    %737 = math.exp %736 : vector<8x8xf32>
    %cst_201 = arith.constant 1.000000e+00 : f32
    %738 = vector.broadcast %cst_201 : f32 to vector<8x8xf32>
    %739 = arith.addf %738, %737 : vector<8x8xf32>
    %740 = tpu.reciprocal %739 {approx = true} : vector<8x8xf32> -> vector<8x8xf32>
    %741 = arith.subf %733, %734 : vector<8x8xf32>
    %742 = arith.mulf %741, %739 : vector<8x8xf32>
    %743 = arith.mulf %742, %742 : vector<8x8xf32>
    %744 = vector.broadcast %702 : f32 to vector<8x8xf32>
    %745 = arith.mulf %743, %744 : vector<8x8xf32>
    %746 = arith.addf %692, %745 : vector<8x8xf32>
    %747 = vector.broadcast %702 : f32 to vector<8x8xf32>
    %748 = arith.mulf %733, %747 : vector<8x8xf32>
    %749 = arith.addf %701, %748 : vector<8x8xf32>
    %750 = vector.broadcast %703 : f32 to vector<8x8xf32>
    %751 = arith.mulf %740, %750 : vector<8x8xf32>
    %c6_202 = arith.constant 6 : index
    %c0_203 = arith.constant 0 : index
    %c0_204 = arith.constant 0 : index
    %752 = vector.load %arg4[%c6_202, %c0_203, %c0_204] : memref<7x8x8xf32, #tpu.memory_space<vmem>>, vector<1x8x8xf32>
    %753 = vector.shape_cast %752 : vector<1x8x8xf32> to vector<8x8xf32>
    %754 = arith.mulf %751, %753 : vector<8x8xf32>
    %755 = arith.addf %749, %754 : vector<8x8xf32>
    %756 = tpu.concatenate %348, %431, %485, %539, %593, %647, %701, %755 in 0 : vector<8x8xf32>, vector<8x8xf32>, vector<8x8xf32>, vector<8x8xf32>, vector<8x8xf32>, vector<8x8xf32>, vector<8x8xf32>, vector<8x8xf32> -> vector<64x8xf32>
    %cst_205 = arith.constant dense<0.000000e+00> : vector<64x3xf32>
    %757 = tpu.matmul %756, %29, %cst_205 {dimension_numbers = #tpu.dot_dimension_numbers<[1], [0], [0], [1], [0, 0, 1, 1], [], []>} : vector<64x8xf32>, vector<8x3xf32>, vector<64x3xf32> -> vector<64x3xf32>
    %758 = vector.broadcast %30 : vector<1x3xf32> to vector<64x3xf32>
    %759 = arith.addf %757, %758 : vector<64x3xf32>
    %c0_206 = arith.constant 0 : index
    %c0_207 = arith.constant 0 : index
    %760 = vector.load %arg15[%c0_206, %c0_207] : memref<64x3xf32, #tpu.memory_space<vmem>>, vector<64x3xf32>
    tpu.vector_store %arg15[%c0_206, %c0_207], %759 {strides = array<i32>} : memref<64x3xf32, #tpu.memory_space<vmem>>, vector<64x3xf32>,
    %cst_208 = arith.constant dense<0.000000e+00> : vector<8xf32>
    %761 = vector.multi_reduction <add>, %746, %cst_208 [1] : vector<8x8xf32> to vector<8xf32>
    %762 = vector.shape_cast %761 : vector<8xf32> to vector<8x1xf32>
    %cst_209 = arith.constant 5.000000e-01 : f32
    %763 = vector.broadcast %cst_209 : f32 to vector<8x1xf32>
    %764 = arith.mulf %763, %762 : vector<8x1xf32>
    %765 = arith.subf %376, %764 : vector<8x1xf32>
    %c0_210 = arith.constant 0 : index
    %c0_211 = arith.constant 0 : index
    %766 = vector.load %arg16[%c0_210, %c0_211] : memref<8x1xf32, #tpu.memory_space<vmem>>, vector<8x1xf32>
    tpu.vector_store %arg16[%c0_210, %c0_211], %765 {strides = array<i32>} : memref<8x1xf32, #tpu.memory_space<vmem>>, vector<8x1xf32>,
    return
  }
}

</mosaic_0001>

<bundles_post_ra>
// kernel: latent_sde2_forward.3
= control target key start
LH: loop header
LB: loop body
LE: loop exit
PB: predicated region body
PF: predicated region fallthrough
CT: control target
= control target key end

     0   :  { %s9080_s0 = inlined_call_operand.vmem [shape: f32[7], index: 0, kind: input, shape index: {}]   ;;  %s9081_s1 = inlined_call_operand.vmem [shape: f32[7], index: 1, kind: input, shape index: {}]   ;;  %s9082_s2 = inlined_call_operand.vmem [shape: f32[8,8,4], index: 2, kind: input, shape index: {}]   ;;  %s9083_s3 = inlined_call_operand.vmem [shape: f32[8,8], index: 3, kind: input, shape index: {}]   ;;  %s9084_s4 = inlined_call_operand.vmem [shape: f32[7,8,8], index: 4, kind: input, shape index: {}]   ;;  %s9085_s5 = inlined_call_operand.vmem [shape: f32[5,16], index: 5, kind: input, shape index: {}]   ;;  %s9086_s6 = inlined_call_operand.vmem [shape: f32[17,32], index: 6, kind: input, shape index: {}]   ;;  %s9087_s7 = inlined_call_operand.vmem [shape: f32[33,64], index: 7, kind: input, shape index: {}]   ;;  %s9088_s8 = inlined_call_operand.vmem [shape: f32[17,16], index: 8, kind: input, shape index: {}]   ;;  %s9089_s9 = inlined_call_operand.vmem [shape: f32[17,16], index: 9, kind: input, shape index: {}]   ;;  %s9090_s10 = inlined_call_operand.vmem [shape: f32[25,320], index: 10, kind: input, shape index: {}]   ;;  %s9091_s11 = inlined_call_operand.vmem [shape: f32[321,72], index: 11, kind: input, shape index: {}]   ;;  %s9092_s12 = inlined_call_operand.vmem [shape: f32[65,16], index: 12, kind: input, shape index: {}]   ;;  %s9093_s13 = inlined_call_operand.vmem [shape: f32[2,8], index: 13, kind: input, shape index: {}]   ;;  %s9094_s14 = inlined_call_operand.vmem [shape: f32[9,3], index: 14, kind: input, shape index: {}]   ;;  %s9095_s15 = inlined_call_operand.vmem [shape: f32[64,3], index: 15, kind: output, shape index: {0}]   ;;  %s9096_s16 = inlined_call_operand.vmem [shape: f32[8,1], index: 16, kind: output, shape index: {1}]  }
   0x1   :  { %9189 = sst [smem:[#allocation55_spill]] %s9080_s0 }
   0x2   :  { %22 = vsyncpa [#allocation3], 0  ;;  %s9190_s23 = sld [smem:[#allocation55_spill]] }
   0x8   :  { %s30_s24 = sshll.u32 %s9190_s23, 4  ;;  %s31_s24 = int_to_ptr.vmem [resolvable:$true] %s30_s24 }
   0x9   :  { %23 = vsyncpa [#allocation5], 0  ;;  %s40_s27 = sshll.u32 %s9081_s1, 4  ;;  %s6947_s28 = scalar_lea.vmem %s31_s24, 16  ;;  %s41_s27 = int_to_ptr.vmem [resolvable:$true] %s40_s27 }
   0xa   :  { %p6948_p0 = scmp.ne.s32.totalorder %s31_s24, %s6947_s28  ;;  %p6952_p1 = scmp.lt.s32.totalorder %s31_s24, %s31_s24 }
   0xb   :  { %p6953_p2 = scmp.lt.s32.totalorder %s6947_s28, %s6947_s28 }
   0xd   :  { %p6954_p3 = por %p6953_p2, %p6952_p1 }
   0xf   :  { %p6955_p4 = pnand %p6954_p3, %p6948_p0 }
  0x11   :  { %6958 = shalt.err (!%p6955_p4)
}
  0x12   :  { %s6975_s29 = smov [#allocation2]   ;;  %s6959_s30 = scalar_lea.vmem %s41_s27, 16 }
  0x13   :  { %33 = dma.vmem_to_smem %s31_s24, 16, %s6975_s29, [#allocation3]  }
  0x14   :  { %p6960_p5 = scmp.ne.s32.totalorder %s41_s27, %s6959_s30  ;;  %p6964_p6 = scmp.lt.s32.totalorder %s41_s27, %s41_s27 }
  0x15   :  { %p6965_p7 = scmp.lt.s32.totalorder %s6959_s30, %s6959_s30 }
  0x17   :  { %p6966_p8 = por %p6965_p7, %p6964_p6 }
  0x19   :  { %p6967_p9 = pnand %p6966_p8, %p6960_p5 }
  0x1b   :  { %6970 = shalt.err (!%p6967_p9)
}
  0x1c   :  { %s6976_s0 = smov [#allocation4]  }
  0x1d   :  { %43 = dma.vmem_to_smem %s41_s27, 16, %s6976_s0, [#allocation5]  }
  0x1e   :  { %6971 = dma.done.wait [#allocation3], 16  }
  0x1f   :  { %6972 = vsyncadd [#allocation3], 4294967280 }
  0x20   :  { %6973 = dma.done.wait [#allocation5], 16  }
  0x21   :  { %6974 = vsyncadd [#allocation5], 4294967280 }
  0x22   :  { %76 = sfence }
  0x23   :  { %v77_v0 = vld [vmem:[%s9085_s5] sm:$0x1f]  ;;  %vm166_vm0 = vcmask 1043456   ;;  %v9097_v2 = vmov 0.0   ;;  %vm6978_vm1 = vmmov 0   ;;  %vm162_vm2 = vcmask 31744  }
  0x24   :  { %v157_v1 = vld [vmem:[%s9082_s2] sm:$0xff]  ;;  %6121 = vmatprep.subr.mxu0 %v9097_v2  ;;  %6123 = vmatprep.mubr.msk.f32.mxu0 %vm6978_vm1, %v9097_v2  ;;  %v7098_v3 = vld [vmem:[%s9086_s6 + $0x8] sm:$0xff]  ;;  %v158_v5 = vlaneseq  ;;  %vm244_vm3 = vcmask 130048   ;;  %v7125_v12 = vld [vmem:[%s9087_s7 + $0x18] sm:$0xff]  ;;  %v6979_v18 = vmov 3   ;;  %v6980_v19 = vmov 1  }
  0x25   :  { %6122 = vmatpush3.msk.msra.mxu0 %vm166_vm0, %v77_v0  ;;  %6126 = vmatprep.subr.mxu1 %v9097_v2  ;;  %v7105_v4 = vld [vmem:[%s9086_s6] sm:$0xff]  ;;  %v7132_v13 = vld [vmem:[%s9087_s7 + $0x10] sm:$0xff]  ;;  %v7137_v14 = vld [vmem:[%s9082_s2 + $0x8] sm:$0xff]  ;;  %v6981_v20 = vmov 0   ;;  %v6982_v21 = vmov 2   ;;  %vm337_vm5 = vcmask 261120  }
  0x26   :  { %6124 = vmatmul.mubr.msk.f32.vlgmr.msra.gmra.mxu0 %vm162_vm2, %v157_v1  ;;  %6130 = vmatprep.mubr.msk.f32.mxu1 %vm6978_vm1, %v9097_v2  ;;  %v7109_v6 = vshrl.u32 %v158_v5, 7  ;;  %v7144_v15 = vld [vmem:[%s9087_s7 + $0x8] sm:$0xff]  ;;  %v414_v16 = vsub.f32 %v7137_v14, %v157_v1  ;;  %v7152_v17 = vld [vmem:[%s9087_s7] sm:$0xff]  ;;  %v7165_v22 = vld [vmem:[%s9086_s6 + $0x10] ss:$0 sm:$0xff]  ;;  %s6984_s21 = smov 112  }
  0x27   :  { %6133 = vmatprep.subr.mxu0 %v9097_v2  ;;  %6141 = vmatprep.mubr.msk.f32.mxu0 %vm6978_vm1, %v9097_v2  ;;  %v7182_v40 = vld [vmem:[%s9087_s7 + $0x20] ss:$0 sm:$0xff]  ;;  %v7188_v47 = vld [vmem:[%s9082_s2 + $0x10] sm:$0xff]  ;;  %s6983_s7 = smov 96   ;;  %s6985_s22 = smov 80   ;;  %vm2150_vm12 = vcmask 64512  }
  0x28   :  { %6127 = vmatpush3.msra.mxu1 %v7098_v3  ;;  %9191 = vst [vmem:[#allocation8_spill] sm:$0xff] %v7109_v6  ;;  %v160_v7 = vsub.s32 4, %v7109_v6  ;;  %6134 = vmatpush3.msra.mxu0 %v7125_v12  ;;  %v617_v50 = vsub.f32 %v7188_v47, %v7137_v14  ;;  %s6986_s19 = smov 8   ;;  %s6987_s27 = smov 120   ;;  %vm2364_vm14 = vcmask 523264  }
  0x29   :  { %6128 = vmatprep.subr.mxu1 %v9097_v2  ;;  %6135 = vmatprep.subr.mxu0 %v9097_v2  ;;  %s6988_s20 = smov 64   ;;  %s2155_s25 = sld [smem:[#allocation4]] }
  0x2a   :  { %6129 = vmatpush3.msra.mxu1 %v7105_v4  ;;  %v161_v8 = vrot.slane %v77_v0, %v160_v7  ;;  %6136 = vmatpush3.msra.mxu0 %v7132_v13  ;;  %s7930_s18 = sld [smem:[#allocation2]] }
  0x2b   :  { %6144 = vmatprep.subr.mxu1 %v9097_v2  ;;  %6137 = vmatprep.subr.mxu0 %v9097_v2  ;;  %s5610_s6 = sld [smem:[#allocation4 + $0x3]] }
  0x2c   :  { %6138 = vmatpush3.msra.mxu0 %v7144_v15  ;;  %6622 = vset.pattern.permute.xlu1 %v6979_v18  ;;  %s8638_s23 = sld [smem:[#allocation2 + $0x4]] }
  0x2d   :  { %6139 = vmatprep.subr.mxu0 %v9097_v2  ;;  %6620 = vset.pattern.permute.xlu0 %v6980_v19  ;;  %s5624_s30 = sld [smem:[#allocation4 + $0x5]] }
  0x2e   :  { %6140 = vmatpush3.msra.mxu0 %v7152_v17  ;;  %443 = vperm.xlu1 %6622, %v414_v16   ;;  %s5631_s17 = sld [smem:[#allocation4 + $0x6]] }
  0x2f   :  { %6151 = vmatprep.subr.mxu0 %v9097_v2  ;;  %423 = vperm.xlu0 %6620, %v414_v16  }
  0x32   :  { %6623 = vset.pattern.permute.xlu1 %v6981_v20 }
  0x33   :  { %6621 = vset.pattern.permute.xlu0 %v6982_v21  ;;  %417 = vperm.xlu1 %6623, %v414_v16  }
  0x34   :  { %433 = vperm.xlu0 %6621, %v414_v16  }
  0x37   :  { %6625 = vset.pattern.permute.xlu1 %v6982_v21 }
  0x38   :  { %6624 = vset.pattern.permute.xlu0 %v6980_v19 }
  0xa9   :  { %v444_v51 = vpop.permute.xlu1 %443 }
  0xaa   :  { %v424_v44 = vpop.permute.xlu0 %423 }
  0xae   :  { %v418_v53 = vpop.permute.xlu1 %417 }
  0xaf   :  { %v434_v45 = vpop.permute.xlu0 %433 }
  0xe6   :  { %v236_v9 = vpop.f32.mrf.mxu0 }
  0xe7   :  { %v7112_v10 = vadd.f32 %v236_v9, %v161_v8 }
  0xe8   :  { %v6125_v11 = vpop.f32.mrf.mxu0 }
  0xe9   :  { %6131 = vmatmul.mubr.msk.f32.vlgmr.msra.gmra.mxu1 %vm244_vm3, %v7112_v10 }
  0xea   :  { %6145 = vmatpush3.msra.mxu1 %v7098_v3  ;;  %6148 = vmatprep.mubr.msk.f32.mxu1 %vm6978_vm1, %v9097_v2 }
  0xeb   :  { %6146 = vmatprep.subr.mxu1 %v9097_v2 }
  0xec   :  { %6147 = vmatpush3.msra.mxu1 %v7105_v4 }
  0xed   :  { %6180 = vmatprep.subr.mxu1 %v9097_v2 }
 0x1a9   :  { %v314_v23 = vpop.f32.mrf.mxu1 }
 0x1aa   :  { %v315_v24 = vadd.f32 %v7165_v22, %v314_v23 }
 0x1ab   :  { %v6132_v25 = vpop.f32.mrf.mxu1 }
 0x1ac   :  { %v319_v26 = vand.u32 2147483647, %v315_v24  ;;  %v318_v37 = vmax.f32 %v315_v24, 0.0 }
 0x1ae   :  { %v320_v27 = vsub.f32 0.0, %v319_v26 }
 0x1b0   :  { %v321_v28 = vmul.f32 1.442695, %v320_v27 }
 0x1b2   :  { %6647 = vpow2.f32 %v321_v28 }
 0x1bf   :  { %v6648_v29 = vpop.eup %6647 }
 0x1c0   :  { %v323_v30 = vadd.f32 1.0, %v6648_v29  ;;  %v326_v31 = vmul.f32 -0.5, %v6648_v29  ;;  %v329_v33 = vand.u32 2147483647, %v6648_v29 }
 0x1c2   :  { %6649 = vlog2.f32 %v323_v30  ;;  %v327_v32 = vadd.f32 1.0, %v326_v31  ;;  %vm330_vm4 = vcmp.lt.f32.partialorder %v329_v33, 0.0004427343 }
 0x1c4   :  { %v328_v36 = vmul.f32 %v6648_v29, %v327_v32 }
 0x1cf   :  { %v6650_v34 = vpop.eup %6649 }
 0x1d0   :  { %v325_v35 = vmul.f32 0.6931472, %v6650_v34 }
 0x1d2   :  { %v331_v38 = vsel %vm330_vm4, %v328_v36, %v325_v35 }
 0x1d3   :  { %v332_v39 = vadd.f32 %v331_v38, %v318_v37 }
 0x1d5   :  { %6142 = vmatmul.mubr.msk.f32.vlgmr.msra.gmra.mxu0 %vm337_vm5, %v332_v39 }
 0x1d6   :  { %6152 = vmatpush3.msra.mxu0 %v7125_v12  ;;  %6159 = vmatprep.mubr.msk.f32.mxu0 %vm6978_vm1, %v9097_v2 }
 0x1d7   :  { %6153 = vmatprep.subr.mxu0 %v9097_v2 }
 0x1d8   :  { %6154 = vmatpush3.msra.mxu0 %v7132_v13 }
 0x1d9   :  { %6155 = vmatprep.subr.mxu0 %v9097_v2 }
 0x1da   :  { %6156 = vmatpush3.msra.mxu0 %v7144_v15 }
 0x1db   :  { %6157 = vmatprep.subr.mxu0 %v9097_v2 }
 0x1dc   :  { %6158 = vmatpush3.msra.mxu0 %v7152_v17 }
 0x1dd   :  { %6162 = vmatprep.subr.mxu0 %v9097_v2 }
 0x295   :  { %v407_v41 = vpop.f32.mrf.mxu0 }
 0x296   :  { %v408_v42 = vadd.f32 %v7182_v40, %v407_v41 }
 0x297   :  { %v6143_v43 = vpop.f32.mrf.mxu0 }
 0x298   :  { %6651 = vtanh.f32 %v408_v42 }
 0x2a5   :  { %v6652_v46 = vpop.eup %6651 }
 0x2a6   :  { %v426_v48 = vmul.f32 %v6652_v46, %v424_v44  ;;  %v436_v49 = vmul.f32 %v6652_v46, %v434_v45  ;;  %v446_v52 = vmul.f32 %v6652_v46, %v444_v51  ;;  %v420_v54 = vmul.f32 %v6652_v46, %v418_v53 }
 0x2a8   :  { %438 = vrot.lane.b32.xlu0 %v436_v49, %s6983_s7  ;;  %428 = vrot.lane.b32.xlu1 %v426_v48, %s6984_s21 }
 0x2ac   :  { %448 = vrot.lane.b32.xlu1 %v446_v52, %s6985_s22  ;;  %626 = vperm.xlu0 %6624, %v617_v50  }
 0x2b0   :  { %636 = vperm.xlu1 %6625, %v617_v50   ;;  %6627 = vset.pattern.permute.xlu0 %v6981_v20 }
 0x2b1   :  { %620 = vperm.xlu0 %6627, %v617_v50  }
 0x2b4   :  { %6626 = vset.pattern.permute.xlu1 %v6979_v18 }
 0x2b5   :  { %646 = vperm.xlu1 %6626, %v617_v50   ;;  %6629 = vset.pattern.permute.xlu0 %v6982_v21  ;;  %v5544_v50 = vld [vmem:[%s9082_s2 + $0x18] sm:$0xff] }
 0x2b6   :  { %v820_v51 = vsub.f32 %v5544_v50, %v7188_v47 }
 0x2b9   :  { %6628 = vset.pattern.permute.xlu1 %v6980_v19 }
 0x31a   :  { %v429_v55 = vpop.permute.xlu1 %428  ;;  %v439_v57 = vpop.permute.xlu0 %438 }
 0x31b   :  { %v431_v56 = vadd.f32 %v429_v55, %v420_v54 }
 0x31d   :  { %v441_v58 = vadd.f32 %v439_v57, %v431_v56 }
 0x31e   :  { %v449_v59 = vpop.permute.xlu1 %448 }
 0x31f   :  { %v451_v60 = vadd.f32 %v449_v59, %v441_v58 }
 0x321   :  { %v7200_v61 = vadd.f32 %v451_v60, %v7112_v10 }
 0x323   :  { %6149 = vmatmul.mubr.msk.f32.vlgmr.msra.gmra.mxu1 %vm244_vm3, %v7200_v61 }
 0x324   :  { %6181 = vmatpush3.msra.mxu1 %v7098_v3  ;;  %6184 = vmatprep.mubr.msk.f32.mxu1 %vm6978_vm1, %v9097_v2 }
 0x325   :  { %6182 = vmatprep.subr.mxu1 %v9097_v2 }
 0x326   :  { %6183 = vmatpush3.msra.mxu1 %v7105_v4 }
 0x327   :  { %6187 = vmatprep.subr.mxu1 %v9097_v2  ;;  %v627_v35 = vpop.permute.xlu0 %626 }
 0x32b   :  { %v637_v32 = vpop.permute.xlu1 %636 }
 0x32c   :  { %v621_v39 = vpop.permute.xlu0 %620 }
 0x330   :  { %v647_v33 = vpop.permute.xlu1 %646 }
 0x3e3   :  { %v522_v62 = vpop.f32.mrf.mxu1 }
 0x3e4   :  { %v523_v63 = vadd.f32 %v7165_v22, %v522_v62 }
 0x3e5   :  { %v6150_v0 = vpop.f32.mrf.mxu1 }
 0x3e6   :  { %v527_v1 = vand.u32 2147483647, %v523_v63  ;;  %v526_v26 = vmax.f32 %v523_v63, 0.0 }
 0x3e8   :  { %v528_v5 = vsub.f32 0.0, %v527_v1 }
 0x3ea   :  { %v529_v7 = vmul.f32 1.442695, %v528_v5 }
 0x3ec   :  { %6653 = vpow2.f32 %v529_v7 }
 0x3f9   :  { %v6654_v8 = vpop.eup %6653 }
 0x3fa   :  { %v531_v9 = vadd.f32 1.0, %v6654_v8  ;;  %v534_v11 = vmul.f32 -0.5, %v6654_v8  ;;  %v537_v16 = vand.u32 2147483647, %v6654_v8 }
 0x3fc   :  { %6655 = vlog2.f32 %v531_v9  ;;  %v535_v14 = vadd.f32 1.0, %v534_v11  ;;  %vm538_vm6 = vcmp.lt.f32.partialorder %v537_v16, 0.0004427343 }
 0x3fe   :  { %v536_v25 = vmul.f32 %v6654_v8, %v535_v14 }
 0x409   :  { %v6656_v23 = vpop.eup %6655 }
 0x40a   :  { %v533_v24 = vmul.f32 0.6931472, %v6656_v23 }
 0x40c   :  { %v539_v27 = vsel %vm538_vm6, %v536_v25, %v533_v24 }
 0x40d   :  { %v540_v28 = vadd.f32 %v539_v27, %v526_v26  ;;  %v7256_v27 = vld [vmem:[%s9082_s2 + $0x20] sm:$0xff] }
 0x40f   :  { %6160 = vmatmul.mubr.msk.f32.vlgmr.msra.gmra.mxu0 %vm337_vm5, %v540_v28 }
 0x410   :  { %6163 = vmatpush3.msra.mxu0 %v7098_v3  ;;  %6166 = vmatprep.mubr.msk.f32.mxu0 %vm6978_vm1, %v9097_v2 }
 0x411   :  { %6164 = vmatprep.subr.mxu0 %v9097_v2 }
 0x412   :  { %6165 = vmatpush3.msra.mxu0 %v7105_v4 }
 0x413   :  { %6169 = vmatprep.subr.mxu0 %v9097_v2 }
 0x4cf   :  { %v610_v29 = vpop.f32.mrf.mxu0 }
 0x4d0   :  { %v611_v30 = vadd.f32 %v7182_v40, %v610_v29 }
 0x4d1   :  { %v6161_v31 = vpop.f32.mrf.mxu0 }
 0x4d2   :  { %6657 = vtanh.f32 %v611_v30  ;;  %v1023_v30 = vsub.f32 %v7256_v27, %v5544_v50 }
 0x4df   :  { %v6658_v34 = vpop.eup %6657 }
 0x4e0   :  { %v629_v36 = vmul.f32 %v6658_v34, %v627_v35  ;;  %v649_v37 = vmul.f32 %v6658_v34, %v647_v33  ;;  %v639_v38 = vmul.f32 %v6658_v34, %v637_v32  ;;  %v623_v42 = vmul.f32 %v6658_v34, %v621_v39 }
 0x4e2   :  { %651 = vrot.lane.b32.xlu0 %v649_v37, %s6985_s22  ;;  %631 = vrot.lane.b32.xlu1 %v629_v36, %s6984_s21 }
 0x4e6   :  { %641 = vrot.lane.b32.xlu1 %v639_v38, %s6983_s7  ;;  %839 = vperm.xlu0 %6629, %v820_v51  }
 0x4ea   :  { %829 = vperm.xlu1 %6628, %v820_v51  }
 0x4ee   :  { %6630 = vset.pattern.permute.xlu1 %v6979_v18 }
 0x4ef   :  { %849 = vperm.xlu1 %6630, %v820_v51  }
 0x4f3   :  { %6631 = vset.pattern.permute.xlu1 %v6981_v20 }
 0x4f4   :  { %823 = vperm.xlu1 %6631, %v820_v51  }
 0x4f8   :  { %6632 = vset.pattern.permute.xlu1 %v6980_v19 }
 0x554   :  { %v632_v41 = vpop.permute.xlu1 %631  ;;  %v652_v46 = vpop.permute.xlu0 %651 }
 0x555   :  { %v634_v43 = vadd.f32 %v632_v41, %v623_v42 }
 0x558   :  { %v642_v44 = vpop.permute.xlu1 %641 }
 0x559   :  { %v644_v45 = vadd.f32 %v642_v44, %v634_v43 }
 0x55b   :  { %v654_v48 = vadd.f32 %v652_v46, %v644_v45 }
 0x55d   :  { %v7223_v49 = vadd.f32 %v654_v48, %v7200_v61 }
 0x55f   :  { %6167 = vmatmul.mubr.msk.f32.vlgmr.msra.gmra.mxu0 %vm244_vm3, %v7223_v49 }
 0x560   :  { %6170 = vmatpush3.msra.mxu0 %v7125_v12  ;;  %6177 = vmatprep.mubr.msk.f32.mxu0 %vm6978_vm1, %v9097_v2 }
 0x561   :  { %6171 = vmatprep.subr.mxu0 %v9097_v2  ;;  %v840_v23 = vpop.permute.xlu0 %839 }
 0x562   :  { %6172 = vmatpush3.msra.mxu0 %v7132_v13 }
 0x563   :  { %6173 = vmatprep.subr.mxu0 %v9097_v2 }
 0x564   :  { %6174 = vmatpush3.msra.mxu0 %v7144_v15 }
 0x565   :  { %6175 = vmatprep.subr.mxu0 %v9097_v2  ;;  %v830_v16 = vpop.permute.xlu1 %829 }
 0x566   :  { %6176 = vmatpush3.msra.mxu0 %v7152_v17 }
 0x567   :  { %6198 = vmatprep.subr.mxu0 %v9097_v2 }
 0x56a   :  { %v850_v28 = vpop.permute.xlu1 %849 }
 0x56f   :  { %v824_v31 = vpop.permute.xlu1 %823 }
 0x61f   :  { %v725_v52 = vpop.f32.mrf.mxu0 }
 0x620   :  { %v726_v53 = vadd.f32 %v7165_v22, %v725_v52 }
 0x621   :  { %v6168_v54 = vpop.f32.mrf.mxu0 }
 0x622   :  { %v730_v55 = vand.u32 2147483647, %v726_v53  ;;  %v729_v5 = vmax.f32 %v726_v53, 0.0 }
 0x624   :  { %v731_v56 = vsub.f32 0.0, %v730_v55 }
 0x626   :  { %v732_v57 = vmul.f32 1.442695, %v731_v56 }
 0x628   :  { %6659 = vpow2.f32 %v732_v57 }
 0x635   :  { %v6660_v58 = vpop.eup %6659 }
 0x636   :  { %v734_v47 = vadd.f32 1.0, %v6660_v58  ;;  %v737_v59 = vmul.f32 -0.5, %v6660_v58  ;;  %v740_v62 = vand.u32 2147483647, %v6660_v58 }
 0x638   :  { %6661 = vlog2.f32 %v734_v47  ;;  %v738_v60 = vadd.f32 1.0, %v737_v59  ;;  %vm741_vm7 = vcmp.lt.f32.partialorder %v740_v62, 0.0004427343 }
 0x63a   :  { %v739_v1 = vmul.f32 %v6660_v58, %v738_v60 }
 0x645   :  { %v6662_v63 = vpop.eup %6661 }
 0x646   :  { %v736_v0 = vmul.f32 0.6931472, %v6662_v63 }
 0x648   :  { %v742_v7 = vsel %vm741_vm7, %v739_v1, %v736_v0 }
 0x649   :  { %v743_v8 = vadd.f32 %v742_v7, %v729_v5 }
 0x64b   :  { %6178 = vmatmul.mubr.msk.f32.vlgmr.msra.gmra.mxu0 %vm337_vm5, %v743_v8 }
 0x64c   :  { %6199 = vmatpush3.msra.mxu0 %v7098_v3  ;;  %6202 = vmatprep.mubr.msk.f32.mxu0 %vm6978_vm1, %v9097_v2 }
 0x64d   :  { %6200 = vmatprep.subr.mxu0 %v9097_v2 }
 0x64e   :  { %6201 = vmatpush3.msra.mxu0 %v7105_v4 }
 0x64f   :  { %6205 = vmatprep.subr.mxu0 %v9097_v2 }
 0x70b   :  { %v813_v9 = vpop.f32.mrf.mxu0 }
 0x70c   :  { %v814_v11 = vadd.f32 %v7182_v40, %v813_v9 }
 0x70d   :  { %v6179_v14 = vpop.f32.mrf.mxu0 }
 0x70e   :  { %6663 = vtanh.f32 %v814_v11 }
 0x71b   :  { %v6664_v24 = vpop.eup %6663 }
 0x71c   :  { %v832_v25 = vmul.f32 %v6664_v24, %v830_v16  ;;  %v842_v26 = vmul.f32 %v6664_v24, %v840_v23  ;;  %v852_v29 = vmul.f32 %v6664_v24, %v850_v28  ;;  %v826_v32 = vmul.f32 %v6664_v24, %v824_v31 }
 0x71e   :  { %844 = vrot.lane.b32.xlu1 %v842_v26, %s6983_s7  ;;  %834 = vrot.lane.b32.xlu0 %v832_v25, %s6984_s21 }
 0x722   :  { %854 = vrot.lane.b32.xlu0 %v852_v29, %s6985_s22  ;;  %1032 = vperm.xlu1 %6632, %v1023_v30  }
 0x726   :  { %1042 = vperm.xlu0 %6629, %v1023_v30   ;;  %6633 = vset.pattern.permute.xlu1 %v6979_v18 }
 0x727   :  { %1052 = vperm.xlu1 %6633, %v1023_v30  }
 0x72a   :  { %6634 = vset.pattern.permute.xlu0 %v6981_v20 }
 0x72b   :  { %1026 = vperm.xlu0 %6634, %v1023_v30   ;;  %6635 = vset.pattern.permute.xlu1 %v6980_v19  ;;  %v5550_v30 = vld [vmem:[%s9082_s2 + $0x28] sm:$0xff] }
 0x72c   :  { %v1226_v31 = vsub.f32 %v5550_v30, %v7256_v27 }
 0x72f   :  { %6636 = vset.pattern.permute.xlu0 %v6982_v21 }
 0x790   :  { %v835_v33 = vpop.permute.xlu0 %834  ;;  %v845_v35 = vpop.permute.xlu1 %844 }
 0x791   :  { %v837_v34 = vadd.f32 %v835_v33, %v826_v32 }
 0x793   :  { %v847_v36 = vadd.f32 %v845_v35, %v837_v34 }
 0x794   :  { %v855_v37 = vpop.permute.xlu0 %854 }
 0x795   :  { %v857_v38 = vadd.f32 %v855_v37, %v847_v36 }
 0x797   :  { %v7267_v39 = vadd.f32 %v857_v38, %v7223_v49 }
 0x799   :  { %6185 = vmatmul.mubr.msk.f32.vlgmr.msra.gmra.mxu1 %vm244_vm3, %v7267_v39 }
 0x79a   :  { %6188 = vmatpush3.msra.mxu1 %v7125_v12  ;;  %6195 = vmatprep.mubr.msk.f32.mxu1 %vm6978_vm1, %v9097_v2 }
 0x79b   :  { %6189 = vmatprep.subr.mxu1 %v9097_v2 }
 0x79c   :  { %6190 = vmatpush3.msra.mxu1 %v7132_v13 }
 0x79d   :  { %6191 = vmatprep.subr.mxu1 %v9097_v2  ;;  %v1033_v63 = vpop.permute.xlu1 %1032 }
 0x79e   :  { %6192 = vmatpush3.msra.mxu1 %v7144_v15 }
 0x79f   :  { %6193 = vmatprep.subr.mxu1 %v9097_v2 }
 0x7a0   :  { %6194 = vmatpush3.msra.mxu1 %v7152_v17 }
 0x7a1   :  { %6216 = vmatprep.subr.mxu1 %v9097_v2  ;;  %v1043_v8 = vpop.permute.xlu0 %1042 }
 0x7a2   :  { %v1053_v0 = vpop.permute.xlu1 %1052 }
 0x7a6   :  { %v1027_v11 = vpop.permute.xlu0 %1026 }
 0x859   :  { %v928_v41 = vpop.f32.mrf.mxu1 }
 0x85a   :  { %v929_v42 = vadd.f32 %v7165_v22, %v928_v41 }
 0x85b   :  { %v6186_v43 = vpop.f32.mrf.mxu1 }
 0x85c   :  { %v933_v44 = vand.u32 2147483647, %v929_v42  ;;  %v932_v57 = vmax.f32 %v929_v42, 0.0 }
 0x85e   :  { %v934_v45 = vsub.f32 0.0, %v933_v44 }
 0x860   :  { %v935_v46 = vmul.f32 1.442695, %v934_v45 }
 0x862   :  { %6665 = vpow2.f32 %v935_v46 }
 0x86f   :  { %v6666_v48 = vpop.eup %6665 }
 0x870   :  { %v937_v50 = vadd.f32 1.0, %v6666_v48  ;;  %v940_v51 = vmul.f32 -0.5, %v6666_v48  ;;  %v943_v53 = vand.u32 2147483647, %v6666_v48 }
 0x872   :  { %6667 = vlog2.f32 %v937_v50  ;;  %v941_v52 = vadd.f32 1.0, %v940_v51  ;;  %vm944_vm8 = vcmp.lt.f32.partialorder %v943_v53, 0.0004427343 }
 0x874   :  { %v942_v56 = vmul.f32 %v6666_v48, %v941_v52 }
 0x87f   :  { %v6668_v54 = vpop.eup %6667 }
 0x880   :  { %v939_v55 = vmul.f32 0.6931472, %v6668_v54 }
 0x882   :  { %v945_v58 = vsel %vm944_vm8, %v942_v56, %v939_v55 }
 0x883   :  { %v946_v47 = vadd.f32 %v945_v58, %v932_v57 }
 0x885   :  { %6196 = vmatmul.mubr.msk.f32.vlgmr.msra.gmra.mxu1 %vm337_vm5, %v946_v47 }
 0x886   :  { %6217 = vmatpush3.msra.mxu1 %v7098_v3  ;;  %6220 = vmatprep.mubr.msk.f32.mxu1 %vm6978_vm1, %v9097_v2 }
 0x887   :  { %6218 = vmatprep.subr.mxu1 %v9097_v2 }
 0x888   :  { %6219 = vmatpush3.msra.mxu1 %v7105_v4 }
 0x889   :  { %6223 = vmatprep.subr.mxu1 %v9097_v2 }
 0x945   :  { %v1016_v59 = vpop.f32.mrf.mxu1 }
 0x946   :  { %v1017_v60 = vadd.f32 %v7182_v40, %v1016_v59 }
 0x947   :  { %v6197_v62 = vpop.f32.mrf.mxu1 }
 0x948   :  { %6669 = vtanh.f32 %v1017_v60 }
 0x955   :  { %v6670_v1 = vpop.eup %6669 }
 0x956   :  { %v1035_v5 = vmul.f32 %v6670_v1, %v1033_v63  ;;  %v1055_v7 = vmul.f32 %v6670_v1, %v1053_v0  ;;  %v1045_v9 = vmul.f32 %v6670_v1, %v1043_v8  ;;  %v1029_v16 = vmul.f32 %v6670_v1, %v1027_v11 }
 0x958   :  { %1057 = vrot.lane.b32.xlu0 %v1055_v7, %s6985_s22  ;;  %1037 = vrot.lane.b32.xlu1 %v1035_v5, %s6984_s21 }
 0x95c   :  { %1047 = vrot.lane.b32.xlu1 %v1045_v9, %s6983_s7  ;;  %1245 = vperm.xlu0 %6636, %v1226_v31  }
 0x960   :  { %1235 = vperm.xlu1 %6635, %v1226_v31  }
 0x964   :  { %6637 = vset.pattern.permute.xlu1 %v6979_v18 }
 0x965   :  { %1255 = vperm.xlu1 %6637, %v1226_v31  }
 0x969   :  { %6638 = vset.pattern.permute.xlu1 %v6981_v20 }
 0x96a   :  { %1229 = vperm.xlu1 %6638, %v1226_v31  }
 0x96e   :  { %6639 = vset.pattern.permute.xlu1 %v6980_v19 }
 0x9ca   :  { %v1038_v14 = vpop.permute.xlu1 %1037  ;;  %v1058_v26 = vpop.permute.xlu0 %1057 }
 0x9cb   :  { %v1040_v23 = vadd.f32 %v1038_v14, %v1029_v16 }
 0x9ce   :  { %v1048_v24 = vpop.permute.xlu1 %1047 }
 0x9cf   :  { %v1050_v25 = vadd.f32 %v1048_v24, %v1040_v23 }
 0x9d1   :  { %v1060_v28 = vadd.f32 %v1058_v26, %v1050_v25 }
 0x9d3   :  { %v7294_v29 = vadd.f32 %v1060_v28, %v7267_v39 }
 0x9d5   :  { %6203 = vmatmul.mubr.msk.f32.vlgmr.msra.gmra.mxu0 %vm244_vm3, %v7294_v29 }
 0x9d6   :  { %6206 = vmatpush3.msra.mxu0 %v7125_v12  ;;  %6213 = vmatprep.mubr.msk.f32.mxu0 %vm6978_vm1, %v9097_v2 }
 0x9d7   :  { %6207 = vmatprep.subr.mxu0 %v9097_v2  ;;  %v1246_v56 = vpop.permute.xlu0 %1245 }
 0x9d8   :  { %6208 = vmatpush3.msra.mxu0 %v7132_v13 }
 0x9d9   :  { %6209 = vmatprep.subr.mxu0 %v9097_v2 }
 0x9da   :  { %6210 = vmatpush3.msra.mxu0 %v7144_v15 }
 0x9db   :  { %6211 = vmatprep.subr.mxu0 %v9097_v2  ;;  %v1236_v55 = vpop.permute.xlu1 %1235 }
 0x9dc   :  { %6212 = vmatpush3.msra.mxu0 %v7152_v17 }
 0x9dd   :  { %6234 = vmatprep.subr.mxu0 %v9097_v2 }
 0xa95   :  { %v1131_v32 = vpop.f32.mrf.mxu0 }
 0xa96   :  { %v1132_v33 = vadd.f32 %v7165_v22, %v1131_v32 }
 0xa97   :  { %v6204_v34 = vpop.f32.mrf.mxu0 }
 0xa98   :  { %v1136_v35 = vand.u32 2147483647, %v1132_v33  ;;  %v1135_v48 = vmax.f32 %v1132_v33, 0.0 }
 0xa9a   :  { %v1137_v36 = vsub.f32 0.0, %v1136_v35 }
 0xa9c   :  { %v1138_v37 = vmul.f32 1.442695, %v1137_v36 }
 0xa9e   :  { %6671 = vpow2.f32 %v1138_v37 }
 0xaab   :  { %v6672_v38 = vpop.eup %6671 }
 0xaac   :  { %v1140_v27 = vadd.f32 1.0, %v6672_v38  ;;  %v1143_v41 = vmul.f32 -0.5, %v6672_v38  ;;  %v1146_v43 = vand.u32 2147483647, %v6672_v38 }
 0xaae   :  { %6673 = vlog2.f32 %v1140_v27  ;;  %v1144_v42 = vadd.f32 1.0, %v1143_v41  ;;  %vm1147_vm9 = vcmp.lt.f32.partialorder %v1146_v43, 0.0004427343  ;;  %v86_v27 = vld [vmem:[%s9088_s8] sm:$0xff] }
 0xab0   :  { %v1145_v46 = vmul.f32 %v6672_v38, %v1144_v42 }
 0xabb   :  { %v6674_v44 = vpop.eup %6673 }
 0xabc   :  { %v1142_v45 = vmul.f32 0.6931472, %v6674_v44 }
 0xabe   :  { %v1148_v50 = vsel %vm1147_vm9, %v1145_v46, %v1142_v45 }
 0xabf   :  { %v1149_v51 = vadd.f32 %v1148_v50, %v1135_v48 }
 0xac1   :  { %6214 = vmatmul.mubr.msk.f32.vlgmr.msra.gmra.mxu0 %vm337_vm5, %v1149_v51 }
 0xac2   :  { %6235 = vmatpush3.msra.mxu0 %v7098_v3  ;;  %6238 = vmatprep.mubr.msk.f32.mxu0 %vm6978_vm1, %v9097_v2  ;;  %v7327_v3 = vld [vmem:[%s9082_s2 + $0x30] sm:$0xff] }
 0xac3   :  { %6236 = vmatprep.subr.mxu0 %v9097_v2  ;;  %v1429_v60 = vsub.f32 %v7327_v3, %v5550_v30 }
 0xac4   :  { %6237 = vmatpush3.msra.mxu0 %v7105_v4  ;;  %v1256_v4 = vpop.permute.xlu1 %1255 }
 0xac5   :  { %6241 = vmatprep.subr.mxu0 %v9097_v2 }
 0xac8   :  { %v1230_v62 = vpop.permute.xlu1 %1229 }
 0xb81   :  { %v1219_v52 = vpop.f32.mrf.mxu0 }
 0xb82   :  { %v1220_v53 = vadd.f32 %v7182_v40, %v1219_v52 }
 0xb83   :  { %v6215_v54 = vpop.f32.mrf.mxu0 }
 0xb84   :  { %6675 = vtanh.f32 %v1220_v53 }
 0xb91   :  { %v6676_v57 = vpop.eup %6675 }
 0xb92   :  { %v1238_v58 = vmul.f32 %v6676_v57, %v1236_v55  ;;  %v1248_v47 = vmul.f32 %v6676_v57, %v1246_v56  ;;  %v1258_v59 = vmul.f32 %v6676_v57, %v1256_v4  ;;  %v1232_v63 = vmul.f32 %v6676_v57, %v1230_v62  ;;  %v99_v57 = vld [vmem:[%s9090_s10 + $0x38] sm:$0xff] }
 0xb94   :  { %1250 = vrot.lane.b32.xlu1 %v1248_v47, %s6983_s7  ;;  %1240 = vrot.lane.b32.xlu0 %v1238_v58, %s6984_s21 }
 0xb98   :  { %1260 = vrot.lane.b32.xlu0 %v1258_v59, %s6985_s22  ;;  %1438 = vperm.xlu1 %6639, %v1429_v60  }
 0xb9c   :  { %1448 = vperm.xlu0 %6636, %v1429_v60   ;;  %6640 = vset.pattern.permute.xlu1 %v6979_v18 }
 0xb9d   :  { %1458 = vperm.xlu1 %6640, %v1429_v60  }
 0xba0   :  { %6641 = vset.pattern.permute.xlu0 %v6981_v20 }
 0xba1   :  { %1432 = vperm.xlu0 %6641, %v1429_v60   ;;  %6642 = vset.pattern.permute.xlu1 %v6980_v19  ;;  %v87_v19 = vld [vmem:[%s9088_s8 + $0x8] sm:$0xff] }
 0xba5   :  { %6643 = vset.pattern.permute.xlu0 %v6982_v21 }
 0xc06   :  { %v1241_v0 = vpop.permute.xlu0 %1240  ;;  %v1251_v5 = vpop.permute.xlu1 %1250 }
 0xc07   :  { %v1243_v1 = vadd.f32 %v1241_v0, %v1232_v63 }
 0xc09   :  { %v1253_v7 = vadd.f32 %v1251_v5, %v1243_v1 }
 0xc0a   :  { %v1261_v8 = vpop.permute.xlu0 %1260 }
 0xc0b   :  { %v1263_v9 = vadd.f32 %v1261_v8, %v1253_v7 }
 0xc0d   :  { %v7338_v11 = vadd.f32 %v1263_v9, %v7294_v29 }
 0xc0f   :  { %6221 = vmatmul.mubr.msk.f32.vlgmr.msra.gmra.mxu1 %vm244_vm3, %v7338_v11 }
 0xc10   :  { %6224 = vmatpush3.msra.mxu1 %v7125_v12  ;;  %6231 = vmatprep.mubr.msk.f32.mxu1 %vm6978_vm1, %v9097_v2 }
 0xc11   :  { %6225 = vmatprep.subr.mxu1 %v9097_v2 }
 0xc12   :  { %6226 = vmatpush3.msra.mxu1 %v7132_v13 }
 0xc13   :  { %6227 = vmatprep.subr.mxu1 %v9097_v2  ;;  %v1439_v43 = vpop.permute.xlu1 %1438 }
 0xc14   :  { %6228 = vmatpush3.msra.mxu1 %v7144_v15 }
 0xc15   :  { %6229 = vmatprep.subr.mxu1 %v9097_v2 }
 0xc16   :  { %6230 = vmatpush3.msra.mxu1 %v7152_v17 }
 0xc17   :  { %6252 = vmatprep.subr.mxu1 %v87_v19 }
 0xc18   :  { %v1459_v44 = vpop.permute.xlu1 %1458 }
 0xccf   :  { %v1334_v21 = vpop.f32.mrf.mxu1 }
 0xcd0   :  { %v1335_v14 = vadd.f32 %v7165_v22, %v1334_v21  ;;  %v95_v21 = vld [vmem:[%s9090_s10 + $0x18] sm:$0xff] }
 0xcd1   :  { %v6222_v16 = vpop.f32.mrf.mxu1 }
 0xcd2   :  { %v1339_v23 = vand.u32 2147483647, %v1335_v14  ;;  %v1338_v36 = vmax.f32 %v1335_v14, 0.0  ;;  %v7415_v14 = vld [vmem:[%s9088_s8 + $0x10] ss:$0 sm:$0xff]  ;;  %s8166_s8 = sld [smem:[#allocation2 + $0x2]] }
 0xcd4   :  { %v1340_v24 = vsub.f32 0.0, %v1339_v23 }
 0xcd6   :  { %v1341_v25 = vmul.f32 1.442695, %v1340_v24 }
 0xcd8   :  { %6677 = vpow2.f32 %v1341_v25 }
 0xce5   :  { %v6678_v26 = vpop.eup %6677 }
 0xce6   :  { %v1343_v28 = vadd.f32 1.0, %v6678_v26  ;;  %v1346_v30 = vmul.f32 -0.5, %v6678_v26  ;;  %v1349_v32 = vand.u32 2147483647, %v6678_v26 }
 0xce8   :  { %6679 = vlog2.f32 %v1343_v28  ;;  %v1347_v31 = vadd.f32 1.0, %v1346_v30  ;;  %vm1350_vm10 = vcmp.lt.f32.partialorder %v1349_v32, 0.0004427343 }
 0xcea   :  { %v1348_v35 = vmul.f32 %v6678_v26, %v1347_v31 }
 0xcf5   :  { %v6680_v33 = vpop.eup %6679 }
 0xcf6   :  { %v1345_v34 = vmul.f32 0.6931472, %v6680_v33 }
 0xcf8   :  { %v1351_v37 = vsel %vm1350_vm10, %v1348_v35, %v1345_v34 }
 0xcf9   :  { %v1352_v38 = vadd.f32 %v1351_v37, %v1338_v36 }
 0xcfb   :  { %6232 = vmatmul.mubr.msk.f32.vlgmr.msra.gmra.mxu1 %vm337_vm5, %v1352_v38 }
 0xcfc   :  { %6253 = vmatpush3.msra.mxu1 %v87_v19  ;;  %6256 = vmatprep.mubr.msk.f32.mxu1 %vm244_vm3, %v7112_v10  ;;  %v96_v19 = vld [vmem:[%s9090_s10 + $0x20] sm:$0xff] }
 0xcfd   :  { %6254 = vmatprep.subr.mxu1 %v86_v27 }
 0xcfe   :  { %6255 = vmatpush3.msra.mxu1 %v86_v27  ;;  %v100_v27 = vld [vmem:[%s9090_s10 + $0x40] sm:$0xff] }
 0xcff   :  { %6257 = vmatmul.mubr.msk.f32.vlgmr.msra.gmra.mxu1 %vm244_vm3, %v7200_v61  ;;  %6268 = vmatprep.subr.mxu1 %v100_v27 }
 0xd00   :  { %6259 = vmatprep.mubr.msk.f32.mxu1 %vm244_vm3, %v7223_v49  ;;  %v1449_v49 = vpop.permute.xlu0 %1448  ;;  %6269 = vmatpush3.msra.mxu1 %v100_v27  ;;  %v7623_v27 = vld [vmem:[%s9091_s11 + $0xc0] sm:$0xff] }
 0xd01   :  { %9202 = vst [vmem:[#allocation19_spill] sm:$0xff] %v7623_v27 }
 0xd03   :  { %6260 = vmatmul.mubr.msk.f32.gmra.mxu1 %vm244_vm3, %v7267_v39 }
 0xd04   :  { %6262 = vmatprep.mubr.msk.f32.mxu1 %vm244_vm3, %v7294_v29  ;;  %v1433_v29 = vpop.permute.xlu0 %1432 }
 0xd07   :  { %6263 = vmatmul.mubr.msk.f32.gmra.mxu1 %vm244_vm3, %v7338_v11 }
 0xdbb   :  { %v1422_v41 = vpop.f32.mrf.mxu1 }
 0xdbc   :  { %v1423_v10 = vadd.f32 %v7182_v40, %v1422_v41 }
 0xdbd   :  { %v6233_v42 = vpop.f32.mrf.mxu1 }
 0xdbe   :  { %6681 = vtanh.f32 %v1423_v10  ;;  %v97_v42 = vld [vmem:[%s9090_s10 + $0x28] sm:$0xff] }
 0xdbf   :  { %6270 = vmatprep.subr.mxu1 %v97_v42 }
 0xdc0   :  { %6271 = vmatpush3.msra.mxu1 %v97_v42  ;;  %v7642_v42 = vld [vmem:[%s9091_s11 + $0xb8] sm:$0xff] }
 0xdc1   :  { %6284 = vmatprep.subr.mxu1 %v9097_v2  ;;  %9204 = vst [vmem:[#allocation21_spill] sm:$0xff] %v7642_v42 }
 0xdcb   :  { %v6682_v61 = vpop.eup %6681 }
 0xdcc   :  { %v1441_v45 = vmul.f32 %v6682_v61, %v1439_v43  ;;  %v1461_v46 = vmul.f32 %v6682_v61, %v1459_v44  ;;  %v1451_v39 = vmul.f32 %v6682_v61, %v1449_v49  ;;  %v1435_v50 = vmul.f32 %v6682_v61, %v1433_v29 }
 0xdce   :  { %1463 = vrot.lane.b32.xlu0 %v1461_v46, %s6985_s22  ;;  %1443 = vrot.lane.b32.xlu1 %v1441_v45, %s6984_s21 }
 0xdd2   :  { %1453 = vrot.lane.b32.xlu1 %v1451_v39, %s6983_s7 }
 0xe40   :  { %v1444_v48 = vpop.permute.xlu1 %1443  ;;  %v1464_v54 = vpop.permute.xlu0 %1463 }
 0xe41   :  { %v1446_v51 = vadd.f32 %v1444_v48, %v1435_v50 }
 0xe44   :  { %v1454_v52 = vpop.permute.xlu1 %1453 }
 0xe45   :  { %v1456_v53 = vadd.f32 %v1454_v52, %v1446_v51 }
 0xe47   :  { %v1466_v55 = vadd.f32 %v1464_v54, %v1456_v53  ;;  %v90_v54 = vld [vmem:[%s9089_s9 + $0x8] sm:$0xff] }
 0xe49   :  { %v7376_v56 = vadd.f32 %v1466_v55, %v7338_v11  ;;  %v89_v55 = vld [vmem:[%s9089_s9] sm:$0xff] }
 0xe4b   :  { %6239 = vmatmul.mubr.msk.f32.vlgmr.msra.gmra.mxu0 %vm244_vm3, %v7376_v56  ;;  %6265 = vmatprep.mubr.msk.f32.mxu1 %vm244_vm3, %v7376_v56 }
 0xe4c   :  { %6242 = vmatpush3.msra.mxu0 %v7125_v12  ;;  %6249 = vmatprep.mubr.msk.f32.mxu0 %vm6978_vm1, %v9097_v2  ;;  %v5556_v12 = vld [vmem:[%s9082_s2 + $0x38] sm:$0xff]  ;;  %s5617_s2 = sld [smem:[#allocation4 + $0x4]] }
 0xe4d   :  { %6243 = vmatprep.subr.mxu0 %v9097_v2  ;;  %v1632_v58 = vsub.f32 %v5556_v12, %v7327_v3 }
 0xe4e   :  { %6244 = vmatpush3.msra.mxu0 %v7132_v13 }
 0xe4f   :  { %6245 = vmatprep.subr.mxu0 %v9097_v2  ;;  %1641 = vperm.xlu1 %6642, %v1632_v58  }
 0xe50   :  { %6246 = vmatpush3.msra.mxu0 %v7144_v15  ;;  %1651 = vperm.xlu0 %6643, %v1632_v58  }
 0xe51   :  { %6247 = vmatprep.subr.mxu0 %v9097_v2 }
 0xe52   :  { %6248 = vmatpush3.msra.mxu0 %v7152_v17 }
 0xe53   :  { %1835 = vmatprep.subr.mxu0 %v99_v57  ;;  %6644 = vset.pattern.permute.xlu1 %v6979_v18 }
 0xe54   :  { %6646 = vset.pattern.permute.xlu0 %v6979_v18  ;;  %1661 = vperm.xlu1 %6644, %v1632_v58   ;;  %v6258_v18 = vpop.f32.mrf.mxu1 }
 0xe55   :  { %v1750_v24 = vadd.f32 %v6258_v18, %v7415_v14  ;;  %v5582_v18 = vld [vmem:[%s9089_s9 + $0x10] ss:$0 sm:$0xff]  ;;  %s5603_s9 = sld [smem:[#allocation4 + $0x2]] }
 0xe56   :  { %v1744_v11 = vpop.f32.mrf.mxu1 }
 0xe57   :  { %v7419_v16 = vadd.f32 %v7415_v14, %v1744_v11 }
 0xe58   :  { %6645 = vset.pattern.permute.xlu1 %v6981_v20  ;;  %v6261_v23 = vpop.f32.mrf.mxu1 }
 0xe59   :  { %1635 = vperm.xlu1 %6645, %v1632_v58   ;;  %v1760_v30 = vadd.f32 %v6261_v23, %v7415_v14  ;;  %v7539_v23 = vld [vmem:[%s9091_s11 + $0xf8] sm:$0xff] }
 0xe5a   :  { %v1754_v25 = vpop.f32.mrf.mxu1 }
 0xe5b   :  { %v1755_v26 = vadd.f32 %v7415_v14, %v1754_v25  ;;  %v7551_v25 = vld [vmem:[%s9091_s11 + $0xf0] sm:$0xff] }
 0xe5c   :  { %v6264_v28 = vpop.f32.mrf.mxu1 }
 0xe5d   :  { %v1770_v33 = vadd.f32 %v6264_v28, %v7415_v14  ;;  %v7563_v28 = vld [vmem:[%s9091_s11 + $0xe8] sm:$0xff] }
 0xe5e   :  { %v1764_v31 = vpop.f32.mrf.mxu1 }
 0xe5f   :  { %v1765_v32 = vadd.f32 %v7415_v14, %v1764_v31  ;;  %v7575_v31 = vld [vmem:[%s9091_s11 + $0xe0] sm:$0xff] }
 0xeca   :  { %v1642_v41 = vpop.permute.xlu1 %1641 }
 0xecb   :  { %v1652_v10 = vpop.permute.xlu0 %1651 }
 0xecf   :  { %v1662_v61 = vpop.permute.xlu1 %1661 }
 0xed4   :  { %v1636_v46 = vpop.permute.xlu1 %1635 }
 0xf0b   :  { %v1537_v13 = vpop.f32.mrf.mxu0 }
 0xf0c   :  { %v1538_v15 = vadd.f32 %v7165_v22, %v1537_v13  ;;  %v98_v22 = vld [vmem:[%s9090_s10 + $0x30] sm:$0xff] }
 0xf0d   :  { %v6240_v17 = vpop.f32.mrf.mxu0 }
 0xf0e   :  { %v1542_v47 = vand.u32 2147483647, %v1538_v15  ;;  %v1541_v20 = vmax.f32 %v1538_v15, 0.0 }
 0xf10   :  { %v1543_v4 = vsub.f32 0.0, %v1542_v47  ;;  %v7489_v47 = vld [vmem:[%s9090_s10 + $0x10] sm:$0xff] }
 0xf12   :  { %v1544_v59 = vmul.f32 1.442695, %v1543_v4  ;;  %v7494_v4 = vld [vmem:[%s9090_s10 + $0x8] sm:$0xff] }
 0xf13   :  { %9192 = vst [vmem:[#allocation9_spill] sm:$0xff] %v7494_v4 }
 0xf14   :  { %6683 = vpow2.f32 %v1544_v59  ;;  %v7499_v59 = vld [vmem:[%s9090_s10] sm:$0xff] }
 0xf21   :  { %v6684_v60 = vpop.eup %6683 }
 0xf22   :  { %v1546_v3 = vadd.f32 1.0, %v6684_v60  ;;  %v1549_v62 = vmul.f32 -0.5, %v6684_v60  ;;  %v1552_v0 = vand.u32 2147483647, %v6684_v60 }
 0xf24   :  { %6685 = vlog2.f32 %v1546_v3  ;;  %v1550_v63 = vadd.f32 1.0, %v1549_v62  ;;  %vm1553_vm11 = vcmp.lt.f32.partialorder %v1552_v0, 0.0004427343 }
 0xf26   :  { %v1551_v7 = vmul.f32 %v6684_v60, %v1550_v63 }
 0xf31   :  { %v6686_v1 = vpop.eup %6685 }
 0xf32   :  { %v1548_v5 = vmul.f32 0.6931472, %v6686_v1 }
 0xf34   :  { %v1554_v8 = vsel %vm1553_vm11, %v1551_v7, %v1548_v5 }
 0xf35   :  { %v1555_v9 = vadd.f32 %v1554_v8, %v1541_v20 }
 0xf37   :  { %6250 = vmatmul.mubr.msk.f32.vlgmr.msra.gmra.mxu0 %vm337_vm5, %v1555_v9 }
 0xf38   :  { %1836 = vmatpush1.msra.mxu0 %v98_v22  ;;  %1871 = vmatprep.mubr.f32.mxu0 %v9097_v2 }
 0xf39   :  { %1837 = vmatprep.subr.mxu0 %v96_v19 }
 0xf3a   :  { %1838 = vmatpush1.msra.mxu0 %v95_v21 }
 0xf3b   :  { %5566 = vmatmul.mubr.msk.f32.vlgmr.msra.gmra.mxu0 %vm244_vm3, %v7419_v16  ;;  %6291 = vmatprep.subr.mxu0 %v9097_v2 }
 0xf3c   :  { %1875 = vmatprep.mubr.f32.mxu0 %v9097_v2  ;;  %6292 = vmatpush3.msra.mxu0 %v7489_v47 }
 0xf3d   :  { %6296 = vmatprep.subr.mxu0 %v9097_v2 }
 0xf3f   :  { %5567 = vmatmul.mubr.msk.f32.gmra.mxu0 %vm244_vm3, %v1750_v24 }
 0xf40   :  { %1881 = vmatprep.mubr.f32.mxu0 %v9097_v2 }
 0xf43   :  { %5568 = vmatmul.mubr.msk.f32.gmra.mxu0 %vm244_vm3, %v1755_v26 }
 0xf44   :  { %1887 = vmatprep.mubr.f32.mxu0 %v9097_v2 }
 0xf47   :  { %5569 = vmatmul.mubr.msk.f32.gmra.mxu0 %vm244_vm3, %v1760_v30 }
 0xf48   :  { %1893 = vmatprep.mubr.f32.mxu0 %v9097_v2 }
 0xf4b   :  { %5570 = vmatmul.mubr.msk.f32.gmra.mxu0 %vm244_vm3, %v1765_v32 }
 0xf4c   :  { %1899 = vmatprep.mubr.f32.mxu0 %v9097_v2 }
 0xf4f   :  { %5571 = vmatmul.mubr.msk.f32.gmra.mxu0 %vm244_vm3, %v1770_v33 }
 0xf50   :  { %1905 = vmatprep.mubr.f32.mxu0 %v9097_v2 }
 0xff7   :  { %v1625_v34 = vpop.f32.mrf.mxu0 }
 0xff8   :  { %v1626_v35 = vadd.f32 %v7182_v40, %v1625_v34  ;;  %v7593_v34 = vld [vmem:[%s9091_s11 + $0x58] sm:$0xff] }
 0xff9   :  { %v6251_v36 = vpop.f32.mrf.mxu0 }
 0xffa   :  { %6687 = vtanh.f32 %v1626_v35  ;;  %v7599_v35 = vld [vmem:[%s9091_s11 + $0xd0] sm:$0xff] }
 0xffb   :  { %v1873_v37 = vpop.f32.mrf.mxu0  ;;  %v7605_v36 = vld [vmem:[%s9091_s11 + $0x50] sm:$0xff] }
 0xffc   :  { %v7611_v37 = vld [vmem:[%s9091_s11 + $0xc8] sm:$0xff] }
 0xffd   :  { %v1874_v38 = vpop.f32.mrf.mxu0 }
 0xffe   :  { %v7617_v38 = vld [vmem:[%s9091_s11 + $0x48] sm:$0xff] }
0x1007   :  { %v6688_v43 = vpop.eup %6687 }
0x1008   :  { %v1644_v44 = vmul.f32 %v6688_v43, %v1642_v41  ;;  %v1654_v40 = vmul.f32 %v6688_v43, %v1652_v10  ;;  %v1664_v45 = vmul.f32 %v6688_v43, %v1662_v61  ;;  %v1638_v49 = vmul.f32 %v6688_v43, %v1636_v46  ;;  %v7628_v41 = vld [vmem:[%s9091_s11 + $0x138] sm:$0xff]  ;;  %v7635_v10 = vld [vmem:[%s9091_s11 + $0x40] sm:$0xff]  ;;  %v7647_v43 = vld [vmem:[%s9091_s11 + $0x130] sm:$0xff] }
0x1009   :  { %9203 = vst [vmem:[#allocation20_spill] sm:$0xff] %v7635_v10  ;;  %v7666_v61 = vld [vmem:[%s9091_s11 + $0x128] sm:$0xff] }
0x100a   :  { %1656 = vrot.lane.b32.xlu1 %v1654_v40, %s6983_s7  ;;  %1646 = vrot.lane.b32.xlu0 %v1644_v44, %s6984_s21  ;;  %v7654_v44 = vld [vmem:[%s9091_s11 + $0x38] sm:$0xff]  ;;  %v7661_v40 = vld [vmem:[%s9091_s11 + $0xb0] sm:$0xff]  ;;  %s8752_s7 = sld [smem:[#allocation2 + $0x5]] }
0x100b   :  { %9205 = vst [vmem:[#allocation22_spill] sm:$0xff] %v7654_v44  ;;  %9206 = vst [vmem:[#allocation23_spill] sm:$0xff] %v7661_v40  ;;  %v7680_v46 = vld [vmem:[%s9091_s11 + $0xa8] sm:$0xff] }
0x100c   :  { %9208 = vst [vmem:[#allocation25_spill] sm:$0xff] %v7680_v46 }
0x100e   :  { %1666 = vrot.lane.b32.xlu0 %v1664_v45, %s6985_s22  ;;  %v7673_v45 = vld [vmem:[%s9091_s11 + $0x30] sm:$0xff] }
0x100f   :  { %9207 = vst [vmem:[#allocation24_spill] sm:$0xff] %v7673_v45 }
0x107c   :  { %v1647_v39 = vpop.permute.xlu0 %1646  ;;  %v1657_v48 = vpop.permute.xlu1 %1656 }
0x107d   :  { %v1649_v29 = vadd.f32 %v1647_v39, %v1638_v49  ;;  %v7685_v49 = vld [vmem:[%s9091_s11 + $0x120] sm:$0xff]  ;;  %v7692_v39 = vld [vmem:[%s9091_s11 + $0x28] sm:$0xff] }
0x107e   :  { %9209 = vst [vmem:[#allocation26_spill] sm:$0xff] %v7692_v39 }
0x107f   :  { %v1659_v50 = vadd.f32 %v1657_v48, %v1649_v29  ;;  %v7699_v29 = vld [vmem:[%s9091_s11 + $0xa0] sm:$0xff]  ;;  %v7704_v48 = vld [vmem:[%s9091_s11 + $0x118] sm:$0xff] }
0x1080   :  { %v1667_v51 = vpop.permute.xlu0 %1666  ;;  %9210 = vst [vmem:[#allocation27_spill] sm:$0xff] %v7699_v29 }
0x1081   :  { %v1669_v52 = vadd.f32 %v1667_v51, %v1659_v50  ;;  %v7711_v50 = vld [vmem:[%s9091_s11 + $0x20] sm:$0xff]  ;;  %v7718_v51 = vld [vmem:[%s9091_s11 + $0x98] sm:$0xff] }
0x1082   :  { %9211 = vst [vmem:[#allocation28_spill] sm:$0xff] %v7711_v50  ;;  %9212 = vst [vmem:[#allocation29_spill] sm:$0xff] %v7718_v51 }
0x1083   :  { %v1670_v53 = vadd.f32 %v1669_v52, %v7376_v56  ;;  %v2100_v56 = vld [vmem:[%s9083_s3] sm:$0xff]  ;;  %v7723_v52 = vld [vmem:[%s9091_s11 + $0x110] sm:$0xff]  ;;  %s8042_s3 = sld [smem:[#allocation2 + $0x1]] }
0x1084   :  { %2102 = vrot.lane.b32.xlu1 %v2100_v56, %s6986_s19  ;;  %v7749_v56 = vld [vmem:[%s9091_s11 + $0x10] sm:$0xff]  ;;  %s8527_s19 = sld [smem:[#allocation2 + $0x3]] }
0x1085   :  { %6266 = vmatmul.mubr.msk.f32.gmra.mxu1 %vm244_vm3, %v1670_v53  ;;  %v7730_v53 = vld [vmem:[%s9091_s11 + $0x18] sm:$0xff]  ;;  %9215 = vst [vmem:[#allocation32_spill] sm:$0xff] %v7749_v56 }
0x1086   :  { %6272 = vmatprep.mubr.msk.f32.mxu1 %vm244_vm3, %v7419_v16  ;;  %9213 = vst [vmem:[#allocation30_spill] sm:$0xff] %v7730_v53 }
0x1089   :  { %6273 = vmatmul.mubr.msk.f32.vlgmr.msra.gmra.mxu1 %vm244_vm3, %v1750_v24  ;;  %v7545_v24 = vld [vmem:[%s9091_s11 + $0x78] sm:$0xff] }
0x108a   :  { %6275 = vmatprep.mubr.msk.f32.mxu1 %vm244_vm3, %v1755_v26  ;;  %6285 = vmatpush3.msra.mxu1 %v90_v54  ;;  %v7557_v26 = vld [vmem:[%s9091_s11 + $0x70] sm:$0xff] }
0x108b   :  { %6286 = vmatprep.subr.mxu1 %v9097_v2  ;;  %v7737_v54 = vld [vmem:[%s9091_s11 + $0x90] sm:$0xff] }
0x108c   :  { %6287 = vmatpush3.msra.mxu1 %v89_v55  ;;  %9214 = vst [vmem:[#allocation31_spill] sm:$0xff] %v7737_v54  ;;  %v7742_v55 = vld [vmem:[%s9091_s11 + $0x108] sm:$0xff] }
0x108d   :  { %6276 = vmatmul.mubr.msk.f32.gmra.mxu1 %vm244_vm3, %v1760_v30  ;;  %2189 = vmatprep.subr.mxu1 %v7494_v4  ;;  %v7569_v30 = vld [vmem:[%s9091_s11 + $0x68] sm:$0xff] }
0x108e   :  { %6278 = vmatprep.mubr.msk.f32.mxu1 %vm244_vm3, %v1765_v32  ;;  %v7581_v32 = vld [vmem:[%s9091_s11 + $0x60] sm:$0xff] }
0x1091   :  { %6279 = vmatmul.mubr.msk.f32.gmra.mxu1 %vm244_vm3, %v1770_v33  ;;  %v7587_v33 = vld [vmem:[%s9091_s11 + $0xd8] sm:$0xff] }
0x10f6   :  { %v2103_v11 = vpop.permute.xlu1 %2102 }
0x1145   :  { %v6267_v57 = vpop.f32.mrf.mxu1 }
0x1146   :  { %v1780_v13 = vadd.f32 %v6267_v57, %v7415_v14  ;;  %v7756_v57 = vld [vmem:[%s9091_s11 + $0x88] sm:$0xff] }
0x1147   :  { %v1774_v12 = vpop.f32.mrf.mxu1  ;;  %9216 = vst [vmem:[#allocation33_spill] sm:$0xff] %v7756_v57 }
0x1148   :  { %v1775_v58 = vadd.f32 %v7415_v14, %v1774_v12  ;;  %v7761_v12 = vld [vmem:[%s9091_s11 + $0x100] sm:$0xff] }
0x1149   :  { %v7472_v15 = vpop.f32.mrf.mxu1  ;;  %9217 = vst [vmem:[#allocation34_spill] sm:$0xff] %v7761_v12 }
0x114a   :  { %5572 = vmatmul.mubr.msk.f32.gmra.mxu0 %vm244_vm3, %v1775_v58  ;;  %6281 = vmatprep.mubr.msk.f32.mxu1 %vm244_vm3, %v1775_v58  ;;  %v7766_v58 = vld [vmem:[%s9091_s11 + $0x8] sm:$0xff] }
0x114b   :  { %v1984_v17 = vpop.f32.mrf.mxu1  ;;  %6282 = vmatmul.mubr.msk.f32.gmra.mxu1 %vm244_vm3, %v1780_v13  ;;  %1911 = vmatprep.mubr.f32.mxu0 %v9097_v2  ;;  %9218 = vst [vmem:[#allocation35_spill] sm:$0xff] %v7766_v58 }
0x114c   :  { %6288 = vmatprep.mubr.msk.f32.mxu1 %vm6978_vm1, %v9097_v2  ;;  %v7779_v17 = vld [vmem:[%s9091_s11] sm:$0xff] }
0x114d   :  { %v7505_v60 = vpop.f32.mrf.mxu1  ;;  %9220 = vst [vmem:[#allocation37_spill] sm:$0xff] %v7779_v17 }
0x114e   :  { %5573 = vmatmul.mubr.msk.f32.gmra.mxu0 %vm244_vm3, %v1780_v13  ;;  %9193 = vst [vmem:[#allocation10_spill] sm:$0xff] %v7505_v60  ;;  %v7774_v13 = vld [vmem:[%s9091_s11 + $0x80] sm:$0xff] }
0x114f   :  { %6289 = vmatmul.mubr.msk.f32.vlgmr.msra.gmra.mxu1 %vm244_vm3, %v7419_v16  ;;  %6293 = vmatprep.mubr.msk.f32.mxu0 %vm6978_vm1, %v9097_v2  ;;  %v7507_v3 = vpop.f32.mrf.mxu1  ;;  %9219 = vst [vmem:[#allocation36_spill] sm:$0xff] %v7774_v13 }
0x1150   :  { %2223 = vmatprep.mubr.f32.mxu1 %v9097_v2  ;;  %2190 = vmatpush1.msra.mxu1 %v7499_v59  ;;  %9194 = vst [vmem:[#allocation11_spill] sm:$0xff] %v7507_v3 }
0x1151   :  { %v7509_v62 = vpop.f32.mrf.mxu1  ;;  %5729 = vmatprep.subr.mxu1 %v7539_v23 }
0x1152   :  { %9195 = vst [vmem:[#allocation12_spill] sm:$0xff] %v7509_v62 }
0x1153   :  { %v7511_v63 = vpop.f32.mrf.mxu1 }
0x1154   :  { %9196 = vst [vmem:[#allocation13_spill] sm:$0xff] %v7511_v63 }
0x120b   :  { %v7513_v0 = vpop.f32.mrf.mxu1 }
0x120c   :  { %9197 = vst [vmem:[#allocation14_spill] sm:$0xff] %v7513_v0 }
0x120d   :  { %v7515_v1 = vpop.f32.mrf.mxu1 }
0x120e   :  { %9198 = vst [vmem:[#allocation15_spill] sm:$0xff] %v7515_v1  ;;  %v7816_v1 = vld [vmem:[%s9090_s10 + $0x48] ss:$0 sm:$0xff] }
0x120f   :  { %v2092_v5 = vpop.f32.mrf.mxu1  ;;  %9233 = vst [vmem:[#allocation50_spill] sm:$0xff] %v7816_v1 }
0x1210   :  { %v7520_v7 = vadd.f32 %v5582_v18, %v2092_v5  ;;  %v2623_v18 = vld [vmem:[%s9084_s4] sm:$0xff]  ;;  %v1877_v5 = vpop.f32.mrf.mxu0 }
0x1211   :  { %v6290_v20 = vpop.f32.mrf.mxu1  ;;  %2625 = vrot.lane.b32.xlu1 %v2623_v18, %s6988_s20 }
0x1212   :  { %9199 = vst [vmem:[#allocation16_spill] sm:$0xff] %v7520_v7  ;;  %v2096_v8 = vmax.f32 %v7520_v7, -20.0  ;;  %v1879_v20 = vpop.f32.mrf.mxu0 }
0x1214   :  { %v7523_v9 = vmin.f32 %v2096_v8, 2.0  ;;  %v7789_v8 = vpop.f32.mrf.mxu0 }
0x1215   :  { %9221 = vst [vmem:[#allocation38_spill] sm:$0xff] %v7789_v8 }
0x1216   :  { %9200 = vst [vmem:[#allocation17_spill] sm:$0xff] %v7523_v9  ;;  %v2098_v22 = vmul.f32 1.442695, %v7523_v9 }
0x1218   :  { %6689 = vpow2.f32 %v2098_v22  ;;  %v7791_v22 = vpop.f32.mrf.mxu0 }
0x1219   :  { %9222 = vst [vmem:[#allocation39_spill] sm:$0xff] %v7791_v22 }
0x1225   :  { %v6690_v19 = vpop.eup %6689 }
0x1226   :  { %v2105_v21 = vmul.f32 %v6690_v19, %v2103_v11  ;;  %v7793_v11 = vpop.f32.mrf.mxu0 }
0x1227   :  { %9223 = vst [vmem:[#allocation40_spill] sm:$0xff] %v7793_v11 }
0x1228   :  { %2107 = vrot.lane.b32.xlu0 %v2105_v21, %s6987_s27  ;;  %v7795_v19 = vpop.f32.mrf.mxu0 }
0x1229   :  { %9224 = vst [vmem:[#allocation41_spill] sm:$0xff] %v7795_v19 }
0x122a   :  { %v7797_v21 = vpop.f32.mrf.mxu0 }
0x122b   :  { %9225 = vst [vmem:[#allocation42_spill] sm:$0xff] %v7797_v21  ;;  %v7829_v21 = vld [vmem:[%s9090_s10 + $0x50] ss:$0 sm:$0xff] }
0x122c   :  { %9235 = vst [vmem:[#allocation52_spill] sm:$0xff] %v7829_v21 }
0x129a   :  { %v2108_v14 = vpop.permute.xlu0 %2107 }
0x129b   :  { %v7528_v16 = vadd.f32 %v2108_v14, %v7520_v7  ;;  %v7799_v14 = vpop.f32.mrf.mxu0 }
0x129c   :  { %9226 = vst [vmem:[#allocation43_spill] sm:$0xff] %v7799_v14 }
0x129d   :  { %9201 = vst [vmem:[#allocation18_spill] sm:$0xff] %v7528_v16  ;;  %5586 = vmatmul.mubr.msk.f32.vlgmr.msra.gmra.mxu1 %vm2150_vm12, %v7528_v16  ;;  %6294 = vmatmul.mubr.msk.f32.vlgmr.msra.gmra.mxu0 %vm2150_vm12, %v7528_v16 }
0x129e   :  { %6312 = vmatprep.mubr.msk.f32.mxu0 %vm6978_vm1, %v9097_v2  ;;  %5730 = vmatpush3.msra.mxu1 %v7545_v24 }
0x129f   :  { %5731 = vmatprep.subr.mxu1 %v7551_v25  ;;  %6297 = vmatpush3.msra.mxu0 %v7628_v41 }
0x12a0   :  { %5732 = vmatpush3.msra.mxu1 %v7557_v26  ;;  %6298 = vmatprep.subr.mxu0 %v9097_v2 }
0x12a1   :  { %5733 = vmatprep.subr.mxu1 %v7563_v28  ;;  %6299 = vmatpush3.msra.mxu0 %v7647_v43 }
0x12a2   :  { %5734 = vmatpush3.msra.mxu1 %v7569_v30  ;;  %6300 = vmatprep.subr.mxu0 %v9097_v2 }
0x12a3   :  { %5735 = vmatprep.subr.mxu1 %v7575_v31  ;;  %6301 = vmatpush3.msra.mxu0 %v7666_v61 }
0x12a4   :  { %5736 = vmatpush3.msra.mxu1 %v7581_v32  ;;  %6302 = vmatprep.subr.mxu0 %v9097_v2 }
0x12a5   :  { %5737 = vmatprep.subr.mxu1 %v7587_v33  ;;  %6303 = vmatpush3.msra.mxu0 %v7685_v49 }
0x12a6   :  { %5738 = vmatpush3.msra.mxu1 %v7593_v34  ;;  %6304 = vmatprep.subr.mxu0 %v9097_v2 }
0x12a7   :  { %5739 = vmatprep.subr.mxu1 %v7599_v35  ;;  %6305 = vmatpush3.msra.mxu0 %v7704_v48 }
0x12a8   :  { %5740 = vmatpush3.msra.mxu1 %v7605_v36  ;;  %6306 = vmatprep.subr.mxu0 %v9097_v2 }
0x12a9   :  { %5741 = vmatprep.subr.mxu1 %v7611_v37  ;;  %6307 = vmatpush3.msra.mxu0 %v7723_v52 }
0x12aa   :  { %5742 = vmatpush3.msra.mxu1 %v7617_v38  ;;  %6308 = vmatprep.subr.mxu0 %v9097_v2 }
0x12ab   :  { %5743 = vmatprep.subr.mxu1 %v7623_v27  ;;  %6309 = vmatpush3.msra.mxu0 %v7742_v55 }
0x12ac   :  { %5744 = vmatpush3.msra.mxu1 %v7635_v10  ;;  %6310 = vmatprep.subr.mxu0 %v9097_v2 }
0x12ad   :  { %5745 = vmatprep.subr.mxu1 %v7642_v42  ;;  %6311 = vmatpush3.msra.mxu0 %v7761_v12 }
0x12ae   :  { %5746 = vmatpush3.msra.mxu1 %v7654_v44  ;;  %6315 = vmatprep.subr.mxu0 %v9097_v2  ;;  %v7801_v2 = vpop.f32.mrf.mxu0 }
0x12af   :  { %5747 = vmatprep.subr.mxu1 %v7661_v40  ;;  %9227 = vst [vmem:[#allocation44_spill] sm:$0xff] %v7801_v2  ;;  %v7821_v2 = vld [vmem:[%s9090_s10 + $0x58] ss:$0 sm:$0xff] }
0x12b0   :  { %5748 = vmatpush3.msra.mxu1 %v7673_v45  ;;  %v7803_v7 = vpop.f32.mrf.mxu0  ;;  %9234 = vst [vmem:[#allocation51_spill] sm:$0xff] %v7821_v2 }
0x12b1   :  { %5749 = vmatprep.subr.mxu1 %v7680_v46  ;;  %9228 = vst [vmem:[#allocation45_spill] sm:$0xff] %v7803_v7 }
0x12b2   :  { %5750 = vmatpush3.msra.mxu1 %v7692_v39  ;;  %v7805_v6 = vpop.f32.mrf.mxu0 }
0x12b3   :  { %5751 = vmatprep.subr.mxu1 %v7699_v29  ;;  %9229 = vst [vmem:[#allocation46_spill] sm:$0xff] %v7805_v6 }
0x12b4   :  { %5752 = vmatpush3.msra.mxu1 %v7711_v50  ;;  %v7807_v18 = vpop.f32.mrf.mxu0 }
0x12b5   :  { %5753 = vmatprep.subr.mxu1 %v7718_v51  ;;  %9230 = vst [vmem:[#allocation47_spill] sm:$0xff] %v7807_v18 }
0x12b6   :  { %5754 = vmatpush3.msra.mxu1 %v7730_v53  ;;  %v7809_v9 = vpop.f32.mrf.mxu0 }
0x12b7   :  { %5755 = vmatprep.subr.mxu1 %v7737_v54  ;;  %9231 = vst [vmem:[#allocation48_spill] sm:$0xff] %v7809_v9 }
0x12b8   :  { %5756 = vmatpush3.msra.mxu1 %v7749_v56  ;;  %v7811_v0 = vpop.f32.mrf.mxu0 }
0x12b9   :  { %5757 = vmatprep.subr.mxu1 %v7756_v57  ;;  %9232 = vst [vmem:[#allocation49_spill] sm:$0xff] %v7811_v0 }
0x12ba   :  { %5758 = vmatpush3.msra.mxu1 %v7766_v58 }
0x12bb   :  { %5759 = vmatprep.subr.mxu1 %v7774_v13 }
0x12bc   :  { %5760 = vmatpush3.msra.mxu1 %v7779_v17 }
0x12bd   :  { %2669 = vmatprep.subr.mxu1 %v7494_v4 }
0x135d   :  { %v2225_v62 = vpop.f32.mrf.mxu1  ;;  %v2296_v7 = vpop.f32.mrf.mxu0 }
0x135e   :  { %v2226_v14 = vadd.f32 %v2225_v62, %v1877_v5  ;;  %v2297_v6 = vadd.f32 %v7472_v15, %v2296_v7 }
0x135f   :  { %v2227_v18 = vpop.f32.mrf.mxu1  ;;  %v6295_v63 = vpop.f32.mrf.mxu0 }
0x1360   :  { %v2312_v9 = vadd.f32 %v7816_v1, %v2226_v14  ;;  %v2314_v0 = vadd.f32 %v7821_v2, %v2297_v6  ;;  %v2228_v19 = vadd.f32 %v2227_v18, %v1879_v20 }
0x1362   :  { %v2318_v60 = vand.u32 2147483647, %v2312_v9  ;;  %v2320_v11 = vand.u32 2147483647, %v2314_v0  ;;  %v2313_v22 = vadd.f32 %v7829_v21, %v2228_v19  ;;  %v2315_v53 = vmax.f32 %v2312_v9, 0.0  ;;  %v7855_v9 = vld [vmem:[%s9092_s12 + $0x28] sm:$0xff] }
0x1364   :  { %v2321_v3 = vsub.f32 0.0, %v2318_v60  ;;  %v2323_v62 = vsub.f32 0.0, %v2320_v11  ;;  %v2319_v5 = vand.u32 2147483647, %v2313_v22  ;;  %v2316_v54 = vmax.f32 %v2313_v22, 0.0 }
0x1366   :  { %v2324_v15 = vmul.f32 1.442695, %v2321_v3  ;;  %v2328_v7 = vmul.f32 1.442695, %v2323_v62  ;;  %v2322_v63 = vsub.f32 0.0, %v2319_v5 }
0x1368   :  { %6691 = vpow2.f32 %v2324_v15  ;;  %v2326_v14 = vmul.f32 1.442695, %v2322_v63 }
0x1369   :  { %6693 = vpow2.f32 %v2328_v7 }
0x136a   :  { %6695 = vpow2.f32 %v2326_v14 }
0x1375   :  { %v6692_v6 = vpop.eup %6691 }
0x1376   :  { %v6694_v2 = vpop.eup %6693  ;;  %v2330_v1 = vadd.f32 1.0, %v6692_v6  ;;  %v2333_v60 = vmul.f32 -0.5, %v6692_v6  ;;  %v2336_v15 = vand.u32 2147483647, %v6692_v6 }
0x1377   :  { %v2348_v8 = vadd.f32 1.0, %v6694_v2  ;;  %v6696_v4 = vpop.eup %6695  ;;  %v2351_v19 = vmul.f32 -0.5, %v6694_v2  ;;  %v2354_v62 = vand.u32 2147483647, %v6694_v2 }
0x1378   :  { %6697 = vlog2.f32 %v2330_v1  ;;  %v2339_v20 = vadd.f32 1.0, %v6696_v4  ;;  %v2342_v11 = vmul.f32 -0.5, %v6696_v4  ;;  %v2334_v3 = vadd.f32 1.0, %v2333_v60 }
0x1379   :  { %6699 = vlog2.f32 %v2348_v8  ;;  %v2352_v18 = vadd.f32 1.0, %v2351_v19  ;;  %v2345_v21 = vand.u32 2147483647, %v6696_v4  ;;  %v2317_v1 = vmax.f32 %v2314_v0, 0.0  ;;  %v7848_v0 = vld [vmem:[%s9092_s12 + $0x30] sm:$0xff] }
0x137a   :  { %6701 = vlog2.f32 %v2339_v20  ;;  %v2343_v7 = vadd.f32 1.0, %v2342_v11  ;;  %v2335_v57 = vmul.f32 %v6692_v6, %v2334_v3  ;;  %vm2355_vm13 = vcmp.lt.f32.partialorder %v2354_v62, 0.0004427343 }
0x137b   :  { %v2353_v13 = vmul.f32 %v6694_v2, %v2352_v18  ;;  %vm2337_vm15 = vcmp.lt.f32.partialorder %v2336_v15, 0.0004427343  ;;  %vm2346_vm0 = vcmp.lt.f32.partialorder %v2345_v21, 0.0004427343  ;;  %v9236_v2 = vmov 0.0  }
0x137c   :  { %v2344_v56 = vmul.f32 %v6696_v4, %v2343_v7  ;;  %v7841_v4 = vld [vmem:[%s9092_s12 + $0x38] sm:$0xff]  ;;  %v7897_v21 = vld [vmem:[%s9091_s11 + $0x140] ss:$0 sm:$0xff] }
0x1385   :  { %v6698_v5 = vpop.eup %6697 }
0x1386   :  { %v6700_v63 = vpop.eup %6699  ;;  %v2332_v14 = vmul.f32 0.6931472, %v6698_v5 }
0x1387   :  { %v2350_v17 = vmul.f32 0.6931472, %v6700_v63  ;;  %v6702_v58 = vpop.eup %6701 }
0x1388   :  { %v2341_v20 = vmul.f32 0.6931472, %v6702_v58  ;;  %v2338_v19 = vsel %vm2337_vm15, %v2335_v57, %v2332_v14  ;;  %v7883_v57 = vld [vmem:[%s9092_s12 + $0x8] sm:$0xff]  ;;  %v7889_v58 = vld [vmem:[%s9092_s12] sm:$0xff] }
0x1389   :  { %v2356_v8 = vsel %vm2355_vm13, %v2353_v13, %v2350_v17  ;;  %v2357_v63 = vadd.f32 %v2338_v19, %v2315_v53  ;;  %v7862_v53 = vld [vmem:[%s9092_s12 + $0x20] sm:$0xff] }
0x138a   :  { %v2359_v60 = vadd.f32 %v2356_v8, %v2317_v1  ;;  %v2347_v11 = vsel %vm2346_vm0, %v2344_v56, %v2341_v20  ;;  %v7876_v56 = vld [vmem:[%s9092_s12 + $0x10] sm:$0xff] }
0x138b   :  { %v2358_v5 = vadd.f32 %v2347_v11, %v2316_v54  ;;  %v7869_v54 = vld [vmem:[%s9092_s12 + $0x18] sm:$0xff] }
0x138c   :  { %6313 = vmatmul.mubr.msk.f32.vlgmr.msra.gmra.mxu0 %vm2364_vm14, %v2359_v60 }
0x138d   :  { %6331 = vmatprep.mubr.msk.f32.mxu0 %vm6978_vm1, %v9236_v2  ;;  %2432 = vmatprep.mubr.f32.mxu1 %v2358_v5  ;;  %v5601_v5 = vld [vmem:[%s9084_s4 + $0x8] sm:$0xff] }
0x138e   :  { %2433 = vmatmul.mubr.f32.vlgmr.msra.gmra.mxu1 %v2357_v63  ;;  %6316 = vmatpush3.msra.mxu0 %v7841_v4  ;;  %v5608_v63 = vld [vmem:[%s9084_s4 + $0x10] sm:$0xff] }
0x138f   :  { %2670 = vmatpush1.msra.mxu1 %v7499_v59  ;;  %2703 = vmatprep.mubr.f32.mxu1 %v9236_v2 }
0x1390   :  { %5784 = vmatprep.subr.mxu1 %v7539_v23  ;;  %6317 = vmatprep.subr.mxu0 %v9236_v2 }
0x1391   :  { %6318 = vmatpush3.msra.mxu0 %v7848_v0  ;;  %3085 = vrot.lane.b32.xlu1 %v5601_v5, %s6988_s20 }
0x1392   :  { %6319 = vmatprep.subr.mxu0 %v9236_v2 }
0x1393   :  { %6320 = vmatpush3.msra.mxu0 %v7855_v9 }
0x1394   :  { %6321 = vmatprep.subr.mxu0 %v9236_v2 }
0x1395   :  { %6322 = vmatpush3.msra.mxu0 %v7862_v53  ;;  %3545 = vrot.lane.b32.xlu1 %v5608_v63, %s6988_s20 }
0x1396   :  { %6323 = vmatprep.subr.mxu0 %v9236_v2 }
0x1397   :  { %6324 = vmatpush3.msra.mxu0 %v7869_v54 }
0x1398   :  { %6325 = vmatprep.subr.mxu0 %v9236_v2 }
0x1399   :  { %6326 = vmatpush3.msra.mxu0 %v7876_v56 }
0x139a   :  { %6327 = vmatprep.subr.mxu0 %v9236_v2 }
0x139b   :  { %6328 = vmatpush3.msra.mxu0 %v7883_v57 }
0x139c   :  { %6329 = vmatprep.subr.mxu0 %v9236_v2 }
0x139d   :  { %6330 = vmatpush3.msra.mxu0 %v7889_v58 }
0x139e   :  { %6334 = vmatprep.subr.mxu0 %v9236_v2 }
0x144c   :  { %v2504_v13 = vpop.f32.mrf.mxu0 }
0x144e   :  { %v6314_v17 = vpop.f32.mrf.mxu0  ;;  %v5761_v22 = vpop.f32.mrf.mxu1 }
0x144f   :  { %v5615_v17 = vld [vmem:[%s9084_s4 + $0x18] sm:$0xff] }
0x1450   :  { %v5762_v6 = vpop.f32.mrf.mxu1  ;;  %4005 = vrot.lane.b32.xlu1 %v5615_v17, %s6988_s20 }
0x1451   :  { %v5763_v18 = vadd.f32 %v5762_v6, %v5761_v22  ;;  %v2621_v22 = vstv %s2155_s25 }
0x1453   :  { %v2435_v3 = vadd.f32 %v5763_v18, %v7897_v21 }
0x1455   :  { %v2505_v62 = vadd.f32 %v2504_v13, %v2435_v3 }
0x1457   :  { %v2509_v15 = vand.u32 2147483647, %v2505_v62  ;;  %v2600_v7 = vsub.f32 0.0, %v2505_v62  ;;  %v2508_v5 = vmax.f32 %v2505_v62, 0.0  ;;  %v7935_v62 = vld [vmem:[%s9092_s12 + $0x40] ss:$0 sm:$0xff] }
0x1459   :  { %v2510_v14 = vsub.f32 0.0, %v2509_v15  ;;  %v2601_v1 = vmul.f32 1.442695, %v2600_v7  ;;  %v2626_v15 = vpop.permute.xlu1 %2625 }
0x145b   :  { %v2511_v8 = vmul.f32 1.442695, %v2510_v14  ;;  %6703 = vpow2.f32 %v2601_v1  ;;  %v5622_v14 = vld [vmem:[%s9084_s4 + $0x20] sm:$0xff] }
0x145c   :  { %4465 = vrot.lane.b32.xlu1 %v5622_v14, %s6988_s20 }
0x145d   :  { %6705 = vpow2.f32 %v2511_v8 }
0x1468   :  { %v6704_v20 = vpop.eup %6703 }
0x1469   :  { %v2603_v19 = vadd.f32 1.0, %v6704_v20 }
0x146a   :  { %v6706_v60 = vpop.eup %6705 }
0x146b   :  { %v2513_v11 = vadd.f32 1.0, %v6706_v60  ;;  %6707 = vrcp.f32 %v2603_v19  ;;  %v2516_v13 = vmul.f32 -0.5, %v6706_v60  ;;  %v2519_v3 = vand.u32 2147483647, %v6706_v60 }
0x146d   :  { %6709 = vlog2.f32 %v2513_v11  ;;  %v2517_v6 = vadd.f32 1.0, %v2516_v13  ;;  %vm2520_vm2 = vcmp.lt.f32.partialorder %v2519_v3, 0.0004427343  ;;  %v5629_v13 = vld [vmem:[%s9084_s4 + $0x28] sm:$0xff] }
0x146e   :  { %4925 = vrot.lane.b32.xlu1 %v5629_v13, %s6988_s20  ;;  %v9245_v13 = vld [vmem:[#allocation37_spill] sm:$0xff] }
0x146f   :  { %v2518_v20 = vmul.f32 %v6706_v60, %v2517_v6  ;;  %v5636_v60 = vld [vmem:[%s9084_s4 + $0x30] sm:$0xff]  ;;  %v9125_v6 = vstv %s7930_s18  ;;  %s5596_s4 = sld [smem:[#allocation4 + $0x1]] }
0x1472   :  { %5385 = vrot.lane.b32.xlu1 %v5636_v60, %s6988_s20 }
0x1478   :  { %v6708_v18 = vpop.eup %6707 }
0x1479   :  { %v2622_v7 = vmul.f32 %v6708_v18, %v2621_v22 }
0x147a   :  { %v6710_v1 = vpop.eup %6709 }
0x147b   :  { %v2515_v8 = vmul.f32 0.6931472, %v6710_v1  ;;  %v2628_v11 = vmul.f32 %v2626_v15, %v2622_v7 }
0x147d   :  { %v2521_v63 = vsel %vm2520_vm2, %v2518_v20, %v2515_v8  ;;  %2630 = vrot.lane.b32.xlu0 %v2628_v11, %s6988_s20  ;;  %v9240_v8 = vld [vmem:[#allocation31_spill] sm:$0xff]  ;;  %v9241_v20 = vld [vmem:[#allocation32_spill] sm:$0xff]  ;;  %v9242_v11 = vld [vmem:[#allocation33_spill] sm:$0xff] }
0x147e   :  { %v2522_v17 = vadd.f32 %v2521_v63, %v2508_v5  ;;  %v9243_v5 = vld [vmem:[#allocation35_spill] sm:$0xff]  ;;  %v9244_v63 = vld [vmem:[#allocation36_spill] sm:$0xff] }
0x1480   :  { %6332 = vmatmul.mubr.msk.f32.vlgmr.msra.gmra.mxu0 %vm2364_vm14, %v2522_v17  ;;  %v9246_v17 = vld [vmem:[#allocation9_spill] sm:$0xff] }
0x1481   :  { %6335 = vmatpush3.msra.mxu0 %v7489_v47  ;;  %6336 = vmatprep.mubr.msk.f32.mxu0 %vm6978_vm1, %v9236_v2 }
0x1482   :  { %6339 = vmatprep.subr.mxu0 %v9236_v2 }
0x14ef   :  { %v2631_v14 = vpop.permute.xlu0 %2630 }
0x1540   :  { %v2596_v22 = vpop.f32.mrf.mxu0 }
0x1541   :  { %v7939_v18 = vadd.f32 %v7935_v62, %v2596_v22 }
0x1542   :  { %v6333_v3 = vpop.f32.mrf.mxu0 }
0x1543   :  { %9237 = vst [vmem:[#allocation53_spill] sm:$0xff] %v7939_v18  ;;  %v2619_v15 = vmul.f32 %v9125_v6, %v7939_v18  ;;  %2606 = vrot.lane.b32.xlu1 %v7939_v18, %s6987_s27  ;;  %v9247_v3 = vld [vmem:[#allocation38_spill] sm:$0xff] }
0x1545   :  { %v2620_v7 = vadd.f32 %v2619_v15, %v7528_v16  ;;  %v9249_v16 = vld [vmem:[#allocation50_spill] sm:$0xff] }
0x1547   :  { %v7947_v1 = vadd.f32 %v2631_v14, %v2620_v7  ;;  %2611 = vrot.lane.b32.xlu1 %v2603_v19, %s6988_s20  ;;  %v9239_v19 = vld [vmem:[#allocation30_spill] sm:$0xff]  ;;  %v9248_v7 = vld [vmem:[#allocation11_spill] sm:$0xff] }
0x1549   :  { %9238 = vst [vmem:[#allocation54_spill] sm:$0xff] %v7947_v1  ;;  %5597 = vmatmul.mubr.msk.f32.vlgmr.msra.gmra.mxu1 %vm2150_vm12, %v7947_v1  ;;  %6337 = vmatmul.mubr.msk.f32.vlgmr.msra.gmra.mxu0 %vm2150_vm12, %v7947_v1 }
0x154a   :  { %5785 = vmatpush3.msra.mxu1 %v7545_v24  ;;  %6340 = vmatpush3.msra.mxu0 %v7628_v41 }
0x154b   :  { %5786 = vmatprep.subr.mxu1 %v7551_v25  ;;  %6341 = vmatprep.subr.mxu0 %v9236_v2 }
0x154c   :  { %5787 = vmatpush3.msra.mxu1 %v7557_v26  ;;  %6342 = vmatpush3.msra.mxu0 %v7647_v43 }
0x154d   :  { %5788 = vmatprep.subr.mxu1 %v7563_v28  ;;  %6343 = vmatprep.subr.mxu0 %v9236_v2 }
0x154e   :  { %5789 = vmatpush3.msra.mxu1 %v7569_v30  ;;  %6344 = vmatpush3.msra.mxu0 %v7666_v61 }
0x154f   :  { %5790 = vmatprep.subr.mxu1 %v7575_v31  ;;  %6345 = vmatprep.subr.mxu0 %v9236_v2 }
0x1550   :  { %5791 = vmatpush3.msra.mxu1 %v7581_v32  ;;  %6346 = vmatpush3.msra.mxu0 %v7685_v49 }
0x1551   :  { %5792 = vmatprep.subr.mxu1 %v7587_v33  ;;  %6347 = vmatprep.subr.mxu0 %v9236_v2 }
0x1552   :  { %5793 = vmatpush3.msra.mxu1 %v7593_v34  ;;  %6348 = vmatpush3.msra.mxu0 %v7704_v48 }
0x1553   :  { %5794 = vmatprep.subr.mxu1 %v7599_v35  ;;  %6349 = vmatprep.subr.mxu0 %v9236_v2 }
0x1554   :  { %5795 = vmatpush3.msra.mxu1 %v7605_v36  ;;  %6350 = vmatpush3.msra.mxu0 %v7723_v52 }
0x1555   :  { %5796 = vmatprep.subr.mxu1 %v7611_v37  ;;  %6351 = vmatprep.subr.mxu0 %v9236_v2 }
0x1556   :  { %5797 = vmatpush3.msra.mxu1 %v7617_v38  ;;  %6352 = vmatpush3.msra.mxu0 %v7742_v55 }
0x1557   :  { %5798 = vmatprep.subr.mxu1 %v7623_v27  ;;  %6353 = vmatprep.subr.mxu0 %v9236_v2 }
0x1558   :  { %5799 = vmatpush3.msra.mxu1 %v7635_v10  ;;  %6354 = vmatpush3.msra.mxu0 %v7761_v12 }
0x1559   :  { %5800 = vmatprep.subr.mxu1 %v7642_v42  ;;  %6355 = vmatprep.mubr.msk.f32.mxu0 %vm6978_vm1, %v9236_v2 }
0x155a   :  { %5801 = vmatpush3.msra.mxu1 %v7654_v44  ;;  %6358 = vmatprep.subr.mxu0 %v9236_v2 }
0x155b   :  { %5802 = vmatprep.subr.mxu1 %v7661_v40 }
0x155c   :  { %5803 = vmatpush3.msra.mxu1 %v7673_v45 }
0x155d   :  { %5804 = vmatprep.subr.mxu1 %v7680_v46 }
0x155e   :  { %5805 = vmatpush3.msra.mxu1 %v7692_v39 }
0x155f   :  { %5806 = vmatprep.subr.mxu1 %v7699_v29 }
0x1560   :  { %5807 = vmatpush3.msra.mxu1 %v7711_v50  ;;  %v9252_v50 = vld [vmem:[#allocation52_spill] sm:$0xff] }
0x1561   :  { %5808 = vmatprep.subr.mxu1 %v7718_v51 }
0x1562   :  { %5809 = vmatpush3.msra.mxu1 %v9239_v19  ;;  %v9251_v19 = vld [vmem:[#allocation39_spill] sm:$0xff] }
0x1563   :  { %5810 = vmatprep.subr.mxu1 %v9240_v8  ;;  %v9250_v8 = vld [vmem:[#allocation51_spill] sm:$0xff] }
0x1564   :  { %5811 = vmatpush3.msra.mxu1 %v9241_v20 }
0x1565   :  { %5812 = vmatprep.subr.mxu1 %v9242_v11 }
0x1566   :  { %5813 = vmatpush3.msra.mxu1 %v9243_v5 }
0x1567   :  { %5814 = vmatprep.subr.mxu1 %v9244_v63 }
0x1568   :  { %5815 = vmatpush3.msra.mxu1 %v9245_v13 }
0x1569   :  { %3129 = vmatprep.subr.mxu1 %v9246_v17 }
0x1609   :  { %v2705_v60 = vpop.f32.mrf.mxu1  ;;  %v2776_v22 = vpop.f32.mrf.mxu0 }
0x160a   :  { %v2706_v15 = vadd.f32 %v2705_v60, %v9247_v3  ;;  %v2777_v14 = vadd.f32 %v2776_v22, %v9248_v7 }
0x160b   :  { %v2707_v6 = vpop.f32.mrf.mxu1  ;;  %v6338_v18 = vpop.f32.mrf.mxu0 }
0x160c   :  { %v2780_v20 = vadd.f32 %v9249_v16, %v2706_v15  ;;  %v2782_v11 = vadd.f32 %v9250_v8, %v2777_v14  ;;  %v2708_v5 = vadd.f32 %v2707_v6, %v9251_v19 }
0x160e   :  { %v2786_v51 = vand.u32 2147483647, %v2780_v20  ;;  %v2788_v63 = vand.u32 2147483647, %v2782_v11  ;;  %v2781_v13 = vadd.f32 %v9252_v50, %v2708_v5  ;;  %v2783_v10 = vmax.f32 %v2780_v20, 0.0 }
0x1610   :  { %v2789_v29 = vsub.f32 0.0, %v2786_v51  ;;  %v2791_v17 = vsub.f32 0.0, %v2788_v63  ;;  %v2787_v39 = vand.u32 2147483647, %v2781_v13 }
0x1612   :  { %v2792_v46 = vmul.f32 1.442695, %v2789_v29  ;;  %v2796_v45 = vmul.f32 1.442695, %v2791_v17  ;;  %v2790_v60 = vsub.f32 0.0, %v2787_v39 }
0x1614   :  { %6711 = vpow2.f32 %v2792_v46  ;;  %v2794_v22 = vmul.f32 1.442695, %v2790_v60 }
0x1615   :  { %6713 = vpow2.f32 %v2796_v45 }
0x1616   :  { %6715 = vpow2.f32 %v2794_v22 }
0x1621   :  { %v6712_v18 = vpop.eup %6711 }
0x1622   :  { %v6714_v3 = vpop.eup %6713  ;;  %v2798_v15 = vadd.f32 1.0, %v6712_v18  ;;  %v2801_v51 = vmul.f32 -0.5, %v6712_v18  ;;  %v2804_v46 = vand.u32 2147483647, %v6712_v18 }
0x1623   :  { %v2816_v7 = vadd.f32 1.0, %v6714_v3  ;;  %v6716_v14 = vpop.eup %6715  ;;  %v2819_v19 = vmul.f32 -0.5, %v6714_v3  ;;  %v2822_v17 = vand.u32 2147483647, %v6714_v3 }
0x1624   :  { %6717 = vlog2.f32 %v2798_v15  ;;  %v2807_v6 = vadd.f32 1.0, %v6716_v14  ;;  %v2810_v5 = vmul.f32 -0.5, %v6716_v14  ;;  %v2802_v29 = vadd.f32 1.0, %v2801_v51 }
0x1625   :  { %6719 = vlog2.f32 %v2816_v7  ;;  %v2820_v63 = vadd.f32 1.0, %v2819_v19  ;;  %v2813_v50 = vand.u32 2147483647, %v6716_v14  ;;  %v2785_v15 = vmax.f32 %v2782_v11, 0.0 }
0x1626   :  { %6721 = vlog2.f32 %v2807_v6  ;;  %v2811_v45 = vadd.f32 1.0, %v2810_v5  ;;  %v2803_v44 = vmul.f32 %v6712_v18, %v2802_v29  ;;  %vm2823_vm3 = vcmp.lt.f32.partialorder %v2822_v17, 0.0004427343 }
0x1627   :  { %v2821_v16 = vmul.f32 %v6714_v3, %v2820_v63  ;;  %vm2805_vm4 = vcmp.lt.f32.partialorder %v2804_v46, 0.0004427343  ;;  %v2784_v51 = vmax.f32 %v2781_v13, 0.0  ;;  %vm2814_vm5 = vcmp.lt.f32.partialorder %v2813_v50, 0.0004427343 }
0x1628   :  { %v2812_v42 = vmul.f32 %v6716_v14, %v2811_v45  ;;  %v3080_v63 = vstv %s5596_s4 }
0x1631   :  { %v6718_v39 = vpop.eup %6717 }
0x1632   :  { %v6720_v60 = vpop.eup %6719  ;;  %v2800_v22 = vmul.f32 0.6931472, %v6718_v39 }
0x1633   :  { %v2818_v8 = vmul.f32 0.6931472, %v6720_v60  ;;  %v6722_v40 = vpop.eup %6721 }
0x1634   :  { %v2809_v6 = vmul.f32 0.6931472, %v6722_v40  ;;  %v2806_v12 = vsel %vm2805_vm4, %v2803_v44, %v2800_v22  ;;  %v3086_v22 = vpop.permute.xlu1 %3085 }
0x1635   :  { %v2824_v7 = vsel %vm2823_vm3, %v2821_v16, %v2818_v8  ;;  %v2825_v39 = vadd.f32 %v2806_v12, %v2783_v10 }
0x1636   :  { %v2827_v19 = vadd.f32 %v2824_v7, %v2785_v15  ;;  %v2815_v27 = vsel %vm2814_vm5, %v2812_v42, %v2809_v6 }
0x1637   :  { %v2826_v5 = vadd.f32 %v2815_v27, %v2784_v51 }
0x1638   :  { %6356 = vmatmul.mubr.msk.f32.vlgmr.msra.gmra.mxu0 %vm2364_vm14, %v2827_v19 }
0x1639   :  { %6359 = vmatpush3.msra.mxu0 %v7841_v4  ;;  %6374 = vmatprep.mubr.msk.f32.mxu0 %vm6978_vm1, %v9236_v2 }
0x163a   :  { %2895 = vmatprep.mubr.f32.mxu1 %v2826_v5  ;;  %6360 = vmatprep.subr.mxu0 %v9236_v2 }
0x163b   :  { %2896 = vmatmul.mubr.f32.vlgmr.msra.gmra.mxu1 %v2825_v39  ;;  %6361 = vmatpush3.msra.mxu0 %v7848_v0 }
0x163c   :  { %6362 = vmatprep.subr.mxu0 %v9236_v2  ;;  %3130 = vmatpush1.msra.mxu1 %v7499_v59 }
0x163d   :  { %6363 = vmatpush3.msra.mxu0 %v7855_v9  ;;  %3163 = vmatprep.mubr.f32.mxu1 %v9236_v2 }
0x163e   :  { %6364 = vmatprep.subr.mxu0 %v9236_v2  ;;  %5839 = vmatprep.subr.mxu1 %v7539_v23 }
0x163f   :  { %6365 = vmatpush3.msra.mxu0 %v7862_v53 }
0x1640   :  { %6366 = vmatprep.subr.mxu0 %v9236_v2 }
0x1641   :  { %6367 = vmatpush3.msra.mxu0 %v7869_v54 }
0x1642   :  { %6368 = vmatprep.subr.mxu0 %v9236_v2 }
0x1643   :  { %6369 = vmatpush3.msra.mxu0 %v7876_v56 }
0x1644   :  { %6370 = vmatprep.subr.mxu0 %v9236_v2 }
0x1645   :  { %6371 = vmatpush3.msra.mxu0 %v7883_v57 }
0x1646   :  { %6372 = vmatprep.subr.mxu0 %v9236_v2 }
0x1647   :  { %6373 = vmatpush3.msra.mxu0 %v7889_v58 }
0x1648   :  { %6377 = vmatprep.subr.mxu0 %v9236_v2 }
0x16f8   :  { %v2967_v59 = vpop.f32.mrf.mxu0 }
0x16fa   :  { %v6357_v16 = vpop.f32.mrf.mxu0 }
0x16fb   :  { %v5816_v23 = vpop.f32.mrf.mxu1 }
0x16fd   :  { %v5817_v27 = vpop.f32.mrf.mxu1 }
0x16fe   :  { %v5818_v10 = vadd.f32 %v5817_v27, %v5816_v23 }
0x1700   :  { %v2898_v42 = vadd.f32 %v5818_v10, %v7897_v21 }
0x1702   :  { %v2968_v44 = vadd.f32 %v2967_v59, %v2898_v42  ;;  %v9142_v59 = vstv %s8042_s3 }
0x1704   :  { %v2972_v40 = vand.u32 2147483647, %v2968_v44  ;;  %v3059_v50 = vsub.f32 0.0, %v2968_v44  ;;  %v2971_v19 = vmax.f32 %v2968_v44, 0.0 }
0x1706   :  { %v2973_v12 = vsub.f32 0.0, %v2972_v40  ;;  %v3060_v8 = vmul.f32 1.442695, %v3059_v50  ;;  %v9276_v50 = vld [vmem:[#allocation40_spill] sm:$0xff] }
0x1708   :  { %v2974_v20 = vmul.f32 1.442695, %v2973_v12  ;;  %6723 = vpow2.f32 %v3060_v8  ;;  %v9277_v8 = vld [vmem:[#allocation10_spill] sm:$0xff] }
0x170a   :  { %6725 = vpow2.f32 %v2974_v20 }
0x1715   :  { %v6724_v11 = vpop.eup %6723 }
0x1716   :  { %v8033_v13 = vadd.f32 1.0, %v6724_v11 }
0x1717   :  { %v6726_v18 = vpop.eup %6725 }
0x1718   :  { %9253 = vst [vmem:[#allocation9_spill] sm:$0xff] %v8033_v13  ;;  %v2976_v3 = vadd.f32 1.0, %v6726_v18  ;;  %6727 = vrcp.f32 %v8033_v13  ;;  %v2979_v14 = vmul.f32 -0.5, %v6726_v18  ;;  %v2982_v46 = vand.u32 2147483647, %v6726_v18 }
0x171a   :  { %6729 = vlog2.f32 %v2976_v3  ;;  %v2980_v29 = vadd.f32 1.0, %v2979_v14  ;;  %vm2983_vm6 = vcmp.lt.f32.partialorder %v2982_v46, 0.0004427343  ;;  %v9278_v3 = vld [vmem:[#allocation50_spill] sm:$0xff] }
0x171c   :  { %v2981_v7 = vmul.f32 %v6726_v18, %v2980_v29 }
0x1725   :  { %v6728_v17 = vpop.eup %6727 }
0x1726   :  { %v3081_v45 = vmul.f32 %v6728_v17, %v3080_v63  ;;  %v9279_v63 = vld [vmem:[#allocation51_spill] sm:$0xff]  ;;  %v9280_v17 = vld [vmem:[#allocation41_spill] sm:$0xff] }
0x1727   :  { %v6730_v60 = vpop.eup %6729 }
0x1728   :  { %v2978_v15 = vmul.f32 0.6931472, %v6730_v60  ;;  %v3088_v6 = vmul.f32 %v3086_v22, %v3081_v45  ;;  %v9281_v22 = vld [vmem:[#allocation52_spill] sm:$0xff] }
0x172a   :  { %v2984_v51 = vsel %vm2983_vm6, %v2981_v7, %v2978_v15  ;;  %3090 = vrot.lane.b32.xlu0 %v3088_v6, %s6988_s20 }
0x172b   :  { %v2985_v5 = vadd.f32 %v2984_v51, %v2971_v19 }
0x172d   :  { %6375 = vmatmul.mubr.msk.f32.vlgmr.msra.gmra.mxu0 %vm2364_vm14, %v2985_v5 }
0x172e   :  { %6378 = vmatpush3.msra.mxu0 %v7489_v47  ;;  %6379 = vmatprep.mubr.msk.f32.mxu0 %vm6978_vm1, %v9236_v2 }
0x172f   :  { %6382 = vmatprep.subr.mxu0 %v9236_v2 }
0x179c   :  { %v3091_v10 = vpop.permute.xlu0 %3090 }
0x17ed   :  { %v3055_v39 = vpop.f32.mrf.mxu0 }
0x17ee   :  { %v8046_v16 = vadd.f32 %v7935_v62, %v3055_v39 }
0x17ef   :  { %v6376_v23 = vpop.f32.mrf.mxu0 }
0x17f0   :  { %9254 = vst [vmem:[#allocation38_spill] sm:$0xff] %v8046_v16  ;;  %v3078_v27 = vmul.f32 %v9142_v59, %v8046_v16  ;;  %v9308_v59 = vld [vmem:[#allocation43_spill] sm:$0xff] }
0x17f2   :  { %v3079_v47 = vadd.f32 %v3078_v27, %v7947_v1 }
0x17f4   :  { %v8052_v42 = vadd.f32 %v3091_v10, %v3079_v47 }
0x17f6   :  { %9255 = vst [vmem:[#allocation11_spill] sm:$0xff] %v8052_v42  ;;  %5604 = vmatmul.mubr.msk.f32.vlgmr.msra.gmra.mxu1 %vm2150_vm12, %v8052_v42  ;;  %6380 = vmatmul.mubr.msk.f32.vlgmr.msra.gmra.mxu0 %vm2150_vm12, %v8052_v42 }
0x17f7   :  { %5840 = vmatpush3.msra.mxu1 %v7545_v24  ;;  %6383 = vmatpush3.msra.mxu0 %v7628_v41  ;;  %v9256_v24 = vld [vmem:[#allocation19_spill] sm:$0xff] }
0x17f8   :  { %5841 = vmatprep.subr.mxu1 %v7551_v25  ;;  %6384 = vmatprep.subr.mxu0 %v9236_v2  ;;  %v9257_v25 = vld [vmem:[#allocation20_spill] sm:$0xff]  ;;  %v9269_v41 = vld [vmem:[#allocation31_spill] sm:$0xff] }
0x17f9   :  { %5842 = vmatpush3.msra.mxu1 %v7557_v26  ;;  %6385 = vmatpush3.msra.mxu0 %v7647_v43  ;;  %v9258_v26 = vld [vmem:[#allocation34_spill] sm:$0xff]  ;;  %v9270_v43 = vld [vmem:[#allocation32_spill] sm:$0xff] }
0x17fa   :  { %5843 = vmatprep.subr.mxu1 %v7563_v28  ;;  %6386 = vmatprep.subr.mxu0 %v9236_v2  ;;  %v9259_v28 = vld [vmem:[#allocation21_spill] sm:$0xff] }
0x17fb   :  { %5844 = vmatpush3.msra.mxu1 %v7569_v30  ;;  %6387 = vmatpush3.msra.mxu0 %v7666_v61  ;;  %v9260_v30 = vld [vmem:[#allocation22_spill] sm:$0xff]  ;;  %v9271_v61 = vld [vmem:[#allocation33_spill] sm:$0xff] }
0x17fc   :  { %5845 = vmatprep.subr.mxu1 %v7575_v31  ;;  %6388 = vmatprep.subr.mxu0 %v9236_v2  ;;  %v9261_v31 = vld [vmem:[#allocation23_spill] sm:$0xff] }
0x17fd   :  { %5846 = vmatpush3.msra.mxu1 %v7581_v32  ;;  %6389 = vmatpush3.msra.mxu0 %v7685_v49  ;;  %v9262_v32 = vld [vmem:[#allocation24_spill] sm:$0xff]  ;;  %v9272_v49 = vld [vmem:[#allocation35_spill] sm:$0xff] }
0x17fe   :  { %5847 = vmatprep.subr.mxu1 %v7587_v33  ;;  %6390 = vmatprep.subr.mxu0 %v9236_v2  ;;  %v9263_v33 = vld [vmem:[#allocation25_spill] sm:$0xff] }
0x17ff   :  { %5848 = vmatpush3.msra.mxu1 %v7593_v34  ;;  %6391 = vmatpush3.msra.mxu0 %v7704_v48  ;;  %v9264_v34 = vld [vmem:[#allocation26_spill] sm:$0xff]  ;;  %v9273_v48 = vld [vmem:[#allocation36_spill] sm:$0xff] }
0x1800   :  { %5849 = vmatprep.subr.mxu1 %v7599_v35  ;;  %6392 = vmatprep.subr.mxu0 %v9236_v2  ;;  %v9265_v35 = vld [vmem:[#allocation27_spill] sm:$0xff] }
0x1801   :  { %5850 = vmatpush3.msra.mxu1 %v7605_v36  ;;  %6393 = vmatpush3.msra.mxu0 %v7723_v52  ;;  %v9266_v36 = vld [vmem:[#allocation28_spill] sm:$0xff]  ;;  %v9274_v52 = vld [vmem:[#allocation37_spill] sm:$0xff] }
0x1802   :  { %5851 = vmatprep.subr.mxu1 %v7611_v37  ;;  %6394 = vmatprep.subr.mxu0 %v9236_v2  ;;  %v9267_v37 = vld [vmem:[#allocation29_spill] sm:$0xff] }
0x1803   :  { %5852 = vmatpush3.msra.mxu1 %v7617_v38  ;;  %6395 = vmatpush3.msra.mxu0 %v7742_v55  ;;  %v9268_v38 = vld [vmem:[#allocation30_spill] sm:$0xff]  ;;  %v8110_v55 = vld [vmem:[%s9090_s10 + $0x8] sm:$0xff] }
0x1804   :  { %5853 = vmatprep.subr.mxu1 %v9256_v24  ;;  %6396 = vmatprep.subr.mxu0 %v9236_v2  ;;  %9275 = vst [vmem:[#allocation39_spill] sm:$0xff] %v8110_v55 }
0x1805   :  { %5854 = vmatpush3.msra.mxu1 %v9257_v25  ;;  %6397 = vmatpush3.msra.mxu0 %v9258_v26 }
0x1806   :  { %5855 = vmatprep.subr.mxu1 %v9259_v28  ;;  %6398 = vmatprep.mubr.msk.f32.mxu0 %vm6978_vm1, %v9236_v2 }
0x1807   :  { %5856 = vmatpush3.msra.mxu1 %v9260_v30  ;;  %6401 = vmatprep.subr.mxu0 %v9236_v2 }
0x1808   :  { %5857 = vmatprep.subr.mxu1 %v9261_v31 }
0x1809   :  { %5858 = vmatpush3.msra.mxu1 %v9262_v32 }
0x180a   :  { %5859 = vmatprep.subr.mxu1 %v9263_v33 }
0x180b   :  { %5860 = vmatpush3.msra.mxu1 %v9264_v34 }
0x180c   :  { %5861 = vmatprep.subr.mxu1 %v9265_v35 }
0x180d   :  { %5862 = vmatpush3.msra.mxu1 %v9266_v36 }
0x180e   :  { %5863 = vmatprep.subr.mxu1 %v9267_v37 }
0x180f   :  { %5864 = vmatpush3.msra.mxu1 %v9268_v38 }
0x1810   :  { %5865 = vmatprep.subr.mxu1 %v9269_v41 }
0x1811   :  { %5866 = vmatpush3.msra.mxu1 %v9270_v43 }
0x1812   :  { %5867 = vmatprep.subr.mxu1 %v9271_v61 }
0x1813   :  { %5868 = vmatpush3.msra.mxu1 %v9272_v49 }
0x1814   :  { %5869 = vmatprep.subr.mxu1 %v9273_v48 }
0x1815   :  { %5870 = vmatpush3.msra.mxu1 %v9274_v52 }
0x1816   :  { %3589 = vmatprep.subr.mxu1 %v8110_v55 }
0x18b6   :  { %v3165_v44 = vpop.f32.mrf.mxu1  ;;  %v3236_v40 = vpop.f32.mrf.mxu0 }
0x18b7   :  { %v3166_v12 = vadd.f32 %v3165_v44, %v9276_v50  ;;  %v3237_v20 = vadd.f32 %v9277_v8, %v3236_v40 }
0x18b8   :  { %v3167_v11 = vpop.f32.mrf.mxu1  ;;  %v6381_v18 = vpop.f32.mrf.mxu0 }
0x18b9   :  { %v3240_v14 = vadd.f32 %v9278_v3, %v3166_v12  ;;  %v3242_v29 = vadd.f32 %v9279_v63, %v3237_v20  ;;  %v3168_v46 = vadd.f32 %v3167_v11, %v9280_v17 }
0x18bb   :  { %v3246_v45 = vand.u32 2147483647, %v3240_v14  ;;  %v3248_v60 = vand.u32 2147483647, %v3242_v29  ;;  %v3241_v15 = vadd.f32 %v9281_v22, %v3168_v46  ;;  %v3245_v44 = vmax.f32 %v3242_v29, 0.0 }
0x18bc   :  { %v3243_v18 = vmax.f32 %v3240_v14, 0.0  ;;  %v8129_v14 = vld [vmem:[%s9090_s10] sm:$0xff] }
0x18bd   :  { %v3249_v7 = vsub.f32 0.0, %v3246_v45  ;;  %v3251_v6 = vsub.f32 0.0, %v3248_v60  ;;  %v3247_v19 = vand.u32 2147483647, %v3241_v15  ;;  %v3244_v11 = vmax.f32 %v3241_v15, 0.0 }
0x18bf   :  { %v3252_v51 = vmul.f32 1.442695, %v3249_v7  ;;  %v3256_v5 = vmul.f32 1.442695, %v3251_v6  ;;  %v3250_v39 = vsub.f32 0.0, %v3247_v19 }
0x18c1   :  { %6731 = vpow2.f32 %v3252_v51  ;;  %v3254_v23 = vmul.f32 1.442695, %v3250_v39 }
0x18c2   :  { %6733 = vpow2.f32 %v3256_v5  ;;  %v3540_v5 = vstv %s5603_s9 }
0x18c3   :  { %6735 = vpow2.f32 %v3254_v23 }
0x18ce   :  { %v6732_v27 = vpop.eup %6731 }
0x18cf   :  { %v6734_v47 = vpop.eup %6733  ;;  %v3258_v10 = vadd.f32 1.0, %v6732_v27  ;;  %v3261_v30 = vmul.f32 -0.5, %v6732_v27  ;;  %v3264_v36 = vand.u32 2147483647, %v6732_v27 }
0x18d0   :  { %v3276_v24 = vadd.f32 1.0, %v6734_v47  ;;  %v6736_v25 = vpop.eup %6735  ;;  %v3279_v28 = vmul.f32 -0.5, %v6734_v47  ;;  %v3282_v34 = vand.u32 2147483647, %v6734_v47 }
0x18d1   :  { %6737 = vlog2.f32 %v3258_v10  ;;  %v3267_v26 = vadd.f32 1.0, %v6736_v25  ;;  %v3270_v31 = vmul.f32 -0.5, %v6736_v25  ;;  %v3262_v33 = vadd.f32 1.0, %v3261_v30  ;;  %v3546_v10 = vpop.permute.xlu1 %3545 }
0x18d2   :  { %6739 = vlog2.f32 %v3276_v24  ;;  %v3280_v32 = vadd.f32 1.0, %v3279_v28  ;;  %v3273_v43 = vand.u32 2147483647, %v6736_v25  ;;  %vm3283_vm7 = vcmp.lt.f32.partialorder %v3282_v34, 0.0004427343 }
0x18d3   :  { %6741 = vlog2.f32 %v3267_v26  ;;  %v3271_v37 = vadd.f32 1.0, %v3270_v31  ;;  %v3263_v52 = vmul.f32 %v6732_v27, %v3262_v33  ;;  %vm3265_vm8 = vcmp.lt.f32.partialorder %v3264_v36, 0.0004427343 }
0x18d4   :  { %v3281_v49 = vmul.f32 %v6734_v47, %v3280_v32  ;;  %vm3274_vm9 = vcmp.lt.f32.partialorder %v3273_v43, 0.0004427343  ;;  %v8160_v32 = vld [vmem:[%s9090_s10 + $0x10] sm:$0xff]  ;;  %v9141_v34 = vstv %s8166_s8 }
0x18d5   :  { %v3272_v12 = vmul.f32 %v6736_v25, %v3271_v37 }
0x18de   :  { %v6738_v35 = vpop.eup %6737 }
0x18df   :  { %v6740_v38 = vpop.eup %6739  ;;  %v3260_v41 = vmul.f32 0.6931472, %v6738_v35 }
0x18e0   :  { %v3278_v61 = vmul.f32 0.6931472, %v6740_v38  ;;  %v6742_v48 = vpop.eup %6741 }
0x18e1   :  { %v3269_v50 = vmul.f32 0.6931472, %v6742_v48  ;;  %v3266_v8 = vsel %vm3265_vm8, %v3263_v52, %v3260_v41  ;;  %v8206_v48 = vld [vmem:[%s9091_s11 + $0x70] sm:$0xff] }
0x18e2   :  { %v3284_v40 = vsel %vm3283_vm7, %v3281_v49, %v3278_v61  ;;  %v3285_v17 = vadd.f32 %v3266_v8, %v3243_v18  ;;  %v8193_v61 = vld [vmem:[%s9091_s11 + $0x138] sm:$0xff]  ;;  %v8199_v49 = vld [vmem:[%s9091_s11 + $0xf0] sm:$0xff]  ;;  %v8244_v8 = vld [vmem:[%s9091_s11 + $0x60] sm:$0xff] }
0x18e3   :  { %v3287_v20 = vadd.f32 %v3284_v40, %v3245_v44  ;;  %v3275_v3 = vsel %vm3274_vm9, %v3272_v12, %v3269_v50  ;;  %v8212_v52 = vld [vmem:[%s9091_s11 + $0x130] sm:$0xff]  ;;  %v8218_v44 = vld [vmem:[%s9091_s11 + $0xe8] sm:$0xff]  ;;  %v8237_v12 = vld [vmem:[%s9091_s11 + $0xe0] sm:$0xff] }
0x18e4   :  { %v3286_v63 = vadd.f32 %v3275_v3, %v3244_v11  ;;  %v8225_v40 = vld [vmem:[%s9091_s11 + $0x68] sm:$0xff]  ;;  %v8256_v11 = vld [vmem:[%s9091_s11 + $0xd8] sm:$0xff] }
0x18e5   :  { %6399 = vmatmul.mubr.msk.f32.vlgmr.msra.gmra.mxu0 %vm2364_vm14, %v3287_v20  ;;  %v8231_v50 = vld [vmem:[%s9091_s11 + $0x128] sm:$0xff]  ;;  %v8250_v20 = vld [vmem:[%s9091_s11 + $0x120] sm:$0xff]  ;;  %v8263_v18 = vld [vmem:[%s9091_s11 + $0x58] sm:$0xff] }
0x18e6   :  { %6402 = vmatpush3.msra.mxu0 %v7841_v4  ;;  %6417 = vmatprep.mubr.msk.f32.mxu0 %vm6978_vm1, %v9236_v2  ;;  %v8138_v4 = vld [vmem:[%s9091_s11 + $0xf8] sm:$0xff] }
0x18e7   :  { %3355 = vmatprep.mubr.f32.mxu1 %v3286_v63  ;;  %6403 = vmatprep.subr.mxu0 %v9236_v2  ;;  %v8269_v3 = vld [vmem:[%s9091_s11 + $0x118] sm:$0xff]  ;;  %v8275_v63 = vld [vmem:[%s9091_s11 + $0xd0] sm:$0xff] }
0x18e8   :  { %3356 = vmatmul.mubr.f32.vlgmr.msra.gmra.mxu1 %v3285_v17  ;;  %6404 = vmatpush3.msra.mxu0 %v7848_v0  ;;  %v8282_v17 = vld [vmem:[%s9091_s11 + $0x50] sm:$0xff] }
0x18e9   :  { %6405 = vmatprep.subr.mxu0 %v9236_v2  ;;  %3590 = vmatpush1.msra.mxu1 %v8129_v14 }
0x18ea   :  { %6406 = vmatpush3.msra.mxu0 %v7855_v9  ;;  %3623 = vmatprep.mubr.f32.mxu1 %v9236_v2 }
0x18eb   :  { %6407 = vmatprep.subr.mxu0 %v9236_v2  ;;  %5894 = vmatprep.subr.mxu1 %v8138_v4 }
0x18ec   :  { %6408 = vmatpush3.msra.mxu0 %v7862_v53 }
0x18ed   :  { %6409 = vmatprep.subr.mxu0 %v9236_v2 }
0x18ee   :  { %6410 = vmatpush3.msra.mxu0 %v7869_v54 }
0x18ef   :  { %6411 = vmatprep.subr.mxu0 %v9236_v2 }
0x18f0   :  { %6412 = vmatpush3.msra.mxu0 %v7876_v56 }
0x18f1   :  { %6413 = vmatprep.subr.mxu0 %v9236_v2 }
0x18f2   :  { %6414 = vmatpush3.msra.mxu0 %v7883_v57 }
0x18f3   :  { %6415 = vmatprep.subr.mxu0 %v9236_v2 }
0x18f4   :  { %6416 = vmatpush3.msra.mxu0 %v7889_v58 }
0x18f5   :  { %6420 = vmatprep.subr.mxu0 %v9236_v2 }
0x19a5   :  { %v3427_v0 = vpop.f32.mrf.mxu0 }
0x19a7   :  { %v6400_v9 = vpop.f32.mrf.mxu0 }
0x19a8   :  { %v5871_v53 = vpop.f32.mrf.mxu1  ;;  %v8294_v9 = vld [vmem:[%s9091_s11 + $0xc8] sm:$0xff] }
0x19aa   :  { %v5872_v29 = vpop.f32.mrf.mxu1 }
0x19ab   :  { %v5873_v46 = vadd.f32 %v5872_v29, %v5871_v53  ;;  %v8301_v53 = vld [vmem:[%s9091_s11 + $0x48] sm:$0xff] }
0x19ac   :  { %v8307_v29 = vld [vmem:[%s9091_s11 + $0x108] sm:$0xff] }
0x19ad   :  { %v3358_v54 = vadd.f32 %v5873_v46, %v7897_v21  ;;  %v8313_v46 = vld [vmem:[%s9091_s11 + $0xc0] sm:$0xff] }
0x19ae   :  { %9285 = vst [vmem:[#allocation21_spill] sm:$0xff] %v8313_v46 }
0x19af   :  { %v3428_v45 = vadd.f32 %v3427_v0, %v3358_v54  ;;  %v8288_v0 = vld [vmem:[%s9091_s11 + $0x110] sm:$0xff]  ;;  %v8320_v54 = vld [vmem:[%s9091_s11 + $0x40] sm:$0xff] }
0x19b0   :  { %9286 = vst [vmem:[#allocation22_spill] sm:$0xff] %v8320_v54 }
0x19b1   :  { %v3432_v60 = vand.u32 2147483647, %v3428_v45  ;;  %v3519_v56 = vsub.f32 0.0, %v3428_v45  ;;  %v3431_v28 = vmax.f32 %v3428_v45, 0.0  ;;  %v8326_v45 = vld [vmem:[%s9091_s11 + $0x100] sm:$0xff] }
0x19b2   :  { %9287 = vst [vmem:[#allocation23_spill] sm:$0xff] %v8326_v45 }
0x19b3   :  { %v3433_v22 = vsub.f32 0.0, %v3432_v60  ;;  %v3520_v15 = vmul.f32 1.442695, %v3519_v56  ;;  %v8332_v60 = vld [vmem:[%s9091_s11 + $0xb8] sm:$0xff] }
0x19b4   :  { %9288 = vst [vmem:[#allocation24_spill] sm:$0xff] %v8332_v60  ;;  %v8340_v56 = vld [vmem:[%s9091_s11 + $0x38] sm:$0xff] }
0x19b5   :  { %v3434_v7 = vmul.f32 1.442695, %v3433_v22  ;;  %6743 = vpow2.f32 %v3520_v15  ;;  %9289 = vst [vmem:[#allocation25_spill] sm:$0xff] %v8340_v56  ;;  %v8347_v22 = vld [vmem:[%s9091_s11 + $0xb0] sm:$0xff] }
0x19b6   :  { %9290 = vst [vmem:[#allocation26_spill] sm:$0xff] %v8347_v22  ;;  %v8353_v15 = vld [vmem:[%s9091_s11 + $0x30] sm:$0xff] }
0x19b7   :  { %6745 = vpow2.f32 %v3434_v7  ;;  %9291 = vst [vmem:[#allocation27_spill] sm:$0xff] %v8353_v15  ;;  %v8359_v7 = vld [vmem:[%s9091_s11 + $0xa8] sm:$0xff] }
0x19b8   :  { %9292 = vst [vmem:[#allocation28_spill] sm:$0xff] %v8359_v7 }
0x19c2   :  { %v6744_v57 = vpop.eup %6743 }
0x19c3   :  { %v8152_v6 = vadd.f32 1.0, %v6744_v57  ;;  %v8365_v57 = vld [vmem:[%s9091_s11 + $0x28] sm:$0xff] }
0x19c4   :  { %v6746_v58 = vpop.eup %6745  ;;  %9293 = vst [vmem:[#allocation29_spill] sm:$0xff] %v8365_v57 }
0x19c5   :  { %9282 = vst [vmem:[#allocation19_spill] sm:$0xff] %v8152_v6  ;;  %v3436_v19 = vadd.f32 1.0, %v6746_v58  ;;  %6747 = vrcp.f32 %v8152_v6  ;;  %v3439_v51 = vmul.f32 -0.5, %v6746_v58  ;;  %v3442_v23 = vand.u32 2147483647, %v6746_v58 }
0x19c7   :  { %6749 = vlog2.f32 %v3436_v19  ;;  %v3440_v21 = vadd.f32 1.0, %v3439_v51  ;;  %vm3443_vm10 = vcmp.lt.f32.partialorder %v3442_v23, 0.0004427343  ;;  %v8377_v19 = vld [vmem:[%s9091_s11 + $0x20] sm:$0xff]  ;;  %v8383_v51 = vld [vmem:[%s9091_s11 + $0x98] sm:$0xff]  ;;  %v8407_v23 = vld [vmem:[%s9091_s11 + $0x88] sm:$0xff] }
0x19c8   :  { %9295 = vst [vmem:[#allocation31_spill] sm:$0xff] %v8377_v19  ;;  %9296 = vst [vmem:[#allocation32_spill] sm:$0xff] %v8383_v51 }
0x19c9   :  { %v3441_v25 = vmul.f32 %v6746_v58, %v3440_v21  ;;  %v8371_v58 = vld [vmem:[%s9091_s11 + $0xa0] sm:$0xff]  ;;  %v8395_v21 = vld [vmem:[%s9091_s11 + $0x90] sm:$0xff]  ;;  %9300 = vst [vmem:[#allocation37_spill] sm:$0xff] %v8407_v23 }
0x19ca   :  { %9294 = vst [vmem:[#allocation30_spill] sm:$0xff] %v8371_v58  ;;  %9298 = vst [vmem:[#allocation35_spill] sm:$0xff] %v8395_v21 }
0x19d2   :  { %v6748_v39 = vpop.eup %6747 }
0x19d3   :  { %v3541_v27 = vmul.f32 %v6748_v39, %v3540_v5  ;;  %v8389_v5 = vld [vmem:[%s9091_s11 + $0x18] sm:$0xff]  ;;  %v8401_v39 = vld [vmem:[%s9091_s11 + $0x10] sm:$0xff] }
0x19d4   :  { %v6750_v47 = vpop.eup %6749  ;;  %9297 = vst [vmem:[#allocation33_spill] sm:$0xff] %v8389_v5  ;;  %9299 = vst [vmem:[#allocation36_spill] sm:$0xff] %v8401_v39 }
0x19d5   :  { %v3438_v24 = vmul.f32 0.6931472, %v6750_v47  ;;  %v3548_v26 = vmul.f32 %v3546_v10, %v3541_v27  ;;  %v8413_v27 = vld [vmem:[%s9091_s11 + $0x8] sm:$0xff]  ;;  %v8419_v47 = vld [vmem:[%s9091_s11 + $0x80] sm:$0xff] }
0x19d6   :  { %9301 = vst [vmem:[#allocation40_spill] sm:$0xff] %v8413_v27  ;;  %9302 = vst [vmem:[#allocation10_spill] sm:$0xff] %v8419_v47  ;;  %v8425_v10 = vld [vmem:[%s9091_s11] sm:$0xff] }
0x19d7   :  { %v3444_v30 = vsel %vm3443_vm10, %v3441_v25, %v3438_v24  ;;  %3550 = vrot.lane.b32.xlu0 %v3548_v26, %s6988_s20  ;;  %9303 = vst [vmem:[#allocation50_spill] sm:$0xff] %v8425_v10  ;;  %v9304_v26 = vld [vmem:[#allocation42_spill] sm:$0xff] }
0x19d8   :  { %v3445_v31 = vadd.f32 %v3444_v30, %v3431_v28  ;;  %v9305_v30 = vld [vmem:[#allocation13_spill] sm:$0xff] }
0x19da   :  { %6418 = vmatmul.mubr.msk.f32.vlgmr.msra.gmra.mxu0 %vm2364_vm14, %v3445_v31 }
0x19db   :  { %6421 = vmatpush3.msra.mxu0 %v8160_v32  ;;  %6422 = vmatprep.mubr.msk.f32.mxu0 %vm6978_vm1, %v9236_v2 }
0x19dc   :  { %6425 = vmatprep.subr.mxu0 %v9236_v2 }
0x1a49   :  { %v3551_v41 = vpop.permute.xlu0 %3550 }
0x1a9a   :  { %v3515_v33 = vpop.f32.mrf.mxu0 }
0x1a9b   :  { %v8170_v35 = vadd.f32 %v7935_v62, %v3515_v33  ;;  %v8187_v62 = vld [vmem:[%s9091_s11 + $0x78] sm:$0xff] }
0x1a9c   :  { %v6419_v36 = vpop.f32.mrf.mxu0 }
0x1a9d   :  { %9283 = vst [vmem:[#allocation20_spill] sm:$0xff] %v8170_v35  ;;  %v3538_v37 = vmul.f32 %v9141_v34, %v8170_v35  ;;  %3525 = vrot.lane.b32.xlu1 %v8170_v35, %s6987_s27 }
0x1a9f   :  { %v3539_v38 = vadd.f32 %v3538_v37, %v8052_v42  ;;  %v8434_v37 = vld [vmem:[%s9090_s10 + $0x48] ss:$0 sm:$0xff] }
0x1aa0   :  { %9306 = vst [vmem:[#allocation51_spill] sm:$0xff] %v8434_v37 }
0x1aa1   :  { %v8178_v43 = vadd.f32 %v3551_v41, %v3539_v38  ;;  %v8440_v41 = vld [vmem:[%s9090_s10 + $0x58] ss:$0 sm:$0xff] }
0x1aa2   :  { %9307 = vst [vmem:[#allocation41_spill] sm:$0xff] %v8440_v41 }
0x1aa3   :  { %9284 = vst [vmem:[#allocation34_spill] sm:$0xff] %v8178_v43  ;;  %5611 = vmatmul.mubr.msk.f32.vlgmr.msra.gmra.mxu1 %vm2150_vm12, %v8178_v43  ;;  %6423 = vmatmul.mubr.msk.f32.vlgmr.msra.gmra.mxu0 %vm2150_vm12, %v8178_v43 }
0x1aa4   :  { %5895 = vmatpush3.msra.mxu1 %v8187_v62  ;;  %6426 = vmatpush3.msra.mxu0 %v8193_v61 }
0x1aa5   :  { %5896 = vmatprep.subr.mxu1 %v8199_v49  ;;  %6427 = vmatprep.subr.mxu0 %v9236_v2 }
0x1aa6   :  { %5897 = vmatpush3.msra.mxu1 %v8206_v48  ;;  %6428 = vmatpush3.msra.mxu0 %v8212_v52 }
0x1aa7   :  { %5898 = vmatprep.subr.mxu1 %v8218_v44  ;;  %6429 = vmatprep.subr.mxu0 %v9236_v2 }
0x1aa8   :  { %5899 = vmatpush3.msra.mxu1 %v8225_v40  ;;  %6430 = vmatpush3.msra.mxu0 %v8231_v50 }
0x1aa9   :  { %5900 = vmatprep.subr.mxu1 %v8237_v12  ;;  %6431 = vmatprep.subr.mxu0 %v9236_v2 }
0x1aaa   :  { %5901 = vmatpush3.msra.mxu1 %v8244_v8  ;;  %6432 = vmatpush3.msra.mxu0 %v8250_v20 }
0x1aab   :  { %5902 = vmatprep.subr.mxu1 %v8256_v11  ;;  %6433 = vmatprep.subr.mxu0 %v9236_v2 }
0x1aac   :  { %5903 = vmatpush3.msra.mxu1 %v8263_v18  ;;  %6434 = vmatpush3.msra.mxu0 %v8269_v3 }
0x1aad   :  { %5904 = vmatprep.subr.mxu1 %v8275_v63  ;;  %6435 = vmatprep.subr.mxu0 %v9236_v2 }
0x1aae   :  { %5905 = vmatpush3.msra.mxu1 %v8282_v17  ;;  %6436 = vmatpush3.msra.mxu0 %v8288_v0 }
0x1aaf   :  { %5906 = vmatprep.subr.mxu1 %v8294_v9  ;;  %6437 = vmatprep.subr.mxu0 %v9236_v2 }
0x1ab0   :  { %5907 = vmatpush3.msra.mxu1 %v8301_v53  ;;  %6438 = vmatpush3.msra.mxu0 %v8307_v29 }
0x1ab1   :  { %5908 = vmatprep.subr.mxu1 %v8313_v46  ;;  %6439 = vmatprep.subr.mxu0 %v9236_v2 }
0x1ab2   :  { %5909 = vmatpush3.msra.mxu1 %v8320_v54  ;;  %6440 = vmatpush3.msra.mxu0 %v8326_v45 }
0x1ab3   :  { %5910 = vmatprep.subr.mxu1 %v8332_v60  ;;  %6441 = vmatprep.mubr.msk.f32.mxu0 %vm6978_vm1, %v9236_v2 }
0x1ab4   :  { %5911 = vmatpush3.msra.mxu1 %v8340_v56  ;;  %6444 = vmatprep.subr.mxu0 %v9236_v2 }
0x1ab5   :  { %5912 = vmatprep.subr.mxu1 %v8347_v22 }
0x1ab6   :  { %5913 = vmatpush3.msra.mxu1 %v8353_v15 }
0x1ab7   :  { %5914 = vmatprep.subr.mxu1 %v8359_v7 }
0x1ab8   :  { %5915 = vmatpush3.msra.mxu1 %v8365_v57 }
0x1ab9   :  { %5916 = vmatprep.subr.mxu1 %v8371_v58 }
0x1aba   :  { %5917 = vmatpush3.msra.mxu1 %v8377_v19 }
0x1abb   :  { %5918 = vmatprep.subr.mxu1 %v8383_v51 }
0x1abc   :  { %5919 = vmatpush3.msra.mxu1 %v8389_v5 }
0x1abd   :  { %5920 = vmatprep.subr.mxu1 %v8395_v21 }
0x1abe   :  { %5921 = vmatpush3.msra.mxu1 %v8401_v39 }
0x1abf   :  { %5922 = vmatprep.subr.mxu1 %v8407_v23 }
0x1ac0   :  { %5923 = vmatpush3.msra.mxu1 %v8413_v27 }
0x1ac1   :  { %5924 = vmatprep.subr.mxu1 %v8419_v47 }
0x1ac2   :  { %5925 = vmatpush3.msra.mxu1 %v8425_v10 }
0x1ac3   :  { %4049 = vmatprep.subr.mxu1 %v8110_v55 }
0x1b63   :  { %v3625_v24 = vpop.f32.mrf.mxu1  ;;  %v3696_v25 = vpop.f32.mrf.mxu0 }
0x1b64   :  { %v3626_v28 = vadd.f32 %v3625_v24, %v9304_v26  ;;  %v3697_v31 = vadd.f32 %v3696_v25, %v9305_v30  ;;  %v8447_v30 = vld [vmem:[%s9090_s10 + $0x50] ss:$0 sm:$0xff] }
0x1b65   :  { %v3627_v33 = vpop.f32.mrf.mxu1  ;;  %v6424_v36 = vpop.f32.mrf.mxu0  ;;  %9309 = vst [vmem:[#allocation52_spill] sm:$0xff] %v8447_v30 }
0x1b66   :  { %v3700_v38 = vadd.f32 %v8434_v37, %v3626_v28  ;;  %v3702_v34 = vadd.f32 %v8440_v41, %v3697_v31  ;;  %v3628_v24 = vadd.f32 %v3627_v33, %v9308_v59 }
0x1b68   :  { %v3706_v26 = vand.u32 2147483647, %v3700_v38  ;;  %v3708_v25 = vand.u32 2147483647, %v3702_v34  ;;  %v3701_v36 = vadd.f32 %v8447_v30, %v3628_v24  ;;  %v3703_v51 = vmax.f32 %v3700_v38, 0.0 }
0x1b6a   :  { %v3709_v35 = vsub.f32 0.0, %v3706_v26  ;;  %v3711_v28 = vsub.f32 0.0, %v3708_v25  ;;  %v3707_v6 = vand.u32 2147483647, %v3701_v36 }
0x1b6c   :  { %v3712_v13 = vmul.f32 1.442695, %v3709_v35  ;;  %v3716_v16 = vmul.f32 1.442695, %v3711_v28  ;;  %v3710_v42 = vsub.f32 0.0, %v3707_v6 }
0x1b6e   :  { %6751 = vpow2.f32 %v3712_v13  ;;  %v3714_v31 = vmul.f32 1.442695, %v3710_v42 }
0x1b6f   :  { %6753 = vpow2.f32 %v3716_v16 }
0x1b70   :  { %6755 = vpow2.f32 %v3714_v31 }
0x1b7b   :  { %v6752_v59 = vpop.eup %6751 }
0x1b7c   :  { %v6754_v33 = vpop.eup %6753  ;;  %v3718_v1 = vadd.f32 1.0, %v6752_v59  ;;  %v3721_v26 = vmul.f32 -0.5, %v6752_v59  ;;  %v3724_v13 = vand.u32 2147483647, %v6752_v59 }
0x1b7d   :  { %v3736_v41 = vadd.f32 1.0, %v6754_v33  ;;  %v6756_v37 = vpop.eup %6755  ;;  %v3739_v24 = vmul.f32 -0.5, %v6754_v33  ;;  %v3742_v28 = vand.u32 2147483647, %v6754_v33 }
0x1b7e   :  { %6757 = vlog2.f32 %v3718_v1  ;;  %v3727_v55 = vadd.f32 1.0, %v6756_v37  ;;  %v3730_v25 = vmul.f32 -0.5, %v6756_v37  ;;  %v3722_v35 = vadd.f32 1.0, %v3721_v26 }
0x1b7f   :  { %6759 = vlog2.f32 %v3736_v41  ;;  %v3740_v30 = vadd.f32 1.0, %v3739_v24  ;;  %v3733_v10 = vand.u32 2147483647, %v6756_v37  ;;  %v3705_v1 = vmax.f32 %v3702_v34, 0.0  ;;  %v8463_v34 = vld [vmem:[%s9092_s12 + $0x30] sm:$0xff] }
0x1b80   :  { %6761 = vlog2.f32 %v3727_v55  ;;  %v3731_v16 = vadd.f32 1.0, %v3730_v25  ;;  %v3723_v39 = vmul.f32 %v6752_v59, %v3722_v35  ;;  %vm3743_vm11 = vcmp.lt.f32.partialorder %v3742_v28, 0.0004427343 }
0x1b81   :  { %v3741_v27 = vmul.f32 %v6754_v33, %v3740_v30  ;;  %vm3725_vm13 = vcmp.lt.f32.partialorder %v3724_v13, 0.0004427343  ;;  %v3704_v26 = vmax.f32 %v3701_v36, 0.0  ;;  %vm3734_vm15 = vcmp.lt.f32.partialorder %v3733_v10, 0.0004427343  ;;  %v8454_v30 = vld [vmem:[%s9092_s12 + $0x38] sm:$0xff] }
0x1b82   :  { %v3732_v21 = vmul.f32 %v6756_v37, %v3731_v16  ;;  %v8515_v36 = vld [vmem:[%s9091_s11 + $0x140] ss:$0 sm:$0xff] }
0x1b8b   :  { %v6758_v6 = vpop.eup %6757 }
0x1b8c   :  { %v6760_v42 = vpop.eup %6759  ;;  %v3720_v31 = vmul.f32 0.6931472, %v6758_v6 }
0x1b8d   :  { %v3738_v47 = vmul.f32 0.6931472, %v6760_v42  ;;  %v6762_v23 = vpop.eup %6761 }
0x1b8e   :  { %v3729_v41 = vmul.f32 0.6931472, %v6762_v23  ;;  %v3726_v5 = vsel %vm3725_vm13, %v3723_v39, %v3720_v31  ;;  %v8501_v39 = vld [vmem:[%s9092_s12 + $0x8] sm:$0xff]  ;;  %v8508_v23 = vld [vmem:[%s9092_s12] sm:$0xff] }
0x1b8f   :  { %v3744_v55 = vsel %vm3743_vm11, %v3741_v27, %v3738_v47  ;;  %v3745_v6 = vadd.f32 %v3726_v5, %v3703_v51  ;;  %v8480_v51 = vld [vmem:[%s9092_s12 + $0x20] sm:$0xff]  ;;  %v8487_v5 = vld [vmem:[%s9092_s12 + $0x18] sm:$0xff] }
0x1b90   :  { %v3747_v24 = vadd.f32 %v3744_v55, %v3705_v1  ;;  %v3735_v19 = vsel %vm3734_vm15, %v3732_v21, %v3729_v41  ;;  %v8494_v21 = vld [vmem:[%s9092_s12 + $0x10] sm:$0xff] }
0x1b91   :  { %v3746_v25 = vadd.f32 %v3735_v19, %v3704_v26  ;;  %v8471_v19 = vld [vmem:[%s9092_s12 + $0x28] sm:$0xff]  ;;  %v4000_v26 = vstv %s5610_s6  ;;  %s9020_s6 = sld [smem:[#allocation2 + $0x6]] }
0x1b92   :  { %6442 = vmatmul.mubr.msk.f32.vlgmr.msra.gmra.mxu0 %vm2364_vm14, %v3747_v24 }
0x1b93   :  { %6445 = vmatpush3.msra.mxu0 %v8454_v30  ;;  %6460 = vmatprep.mubr.msk.f32.mxu0 %vm6978_vm1, %v9236_v2 }
0x1b94   :  { %3815 = vmatprep.mubr.f32.mxu1 %v3746_v25  ;;  %6446 = vmatprep.subr.mxu0 %v9236_v2 }
0x1b95   :  { %3816 = vmatmul.mubr.f32.vlgmr.msra.gmra.mxu1 %v3745_v6  ;;  %6447 = vmatpush3.msra.mxu0 %v8463_v34 }
0x1b96   :  { %6448 = vmatprep.subr.mxu0 %v9236_v2  ;;  %4050 = vmatpush1.msra.mxu1 %v8129_v14 }
0x1b97   :  { %6449 = vmatpush3.msra.mxu0 %v8471_v19  ;;  %4083 = vmatprep.mubr.f32.mxu1 %v9236_v2 }
0x1b98   :  { %6450 = vmatprep.subr.mxu0 %v9236_v2  ;;  %5949 = vmatprep.subr.mxu1 %v8138_v4 }
0x1b99   :  { %6451 = vmatpush3.msra.mxu0 %v8480_v51 }
0x1b9a   :  { %6452 = vmatprep.subr.mxu0 %v9236_v2 }
0x1b9b   :  { %6453 = vmatpush3.msra.mxu0 %v8487_v5 }
0x1b9c   :  { %6454 = vmatprep.subr.mxu0 %v9236_v2 }
0x1b9d   :  { %6455 = vmatpush3.msra.mxu0 %v8494_v21 }
0x1b9e   :  { %6456 = vmatprep.subr.mxu0 %v9236_v2 }
0x1b9f   :  { %6457 = vmatpush3.msra.mxu0 %v8501_v39 }
0x1ba0   :  { %6458 = vmatprep.subr.mxu0 %v9236_v2 }
0x1ba1   :  { %6459 = vmatpush3.msra.mxu0 %v8508_v23 }
0x1ba2   :  { %6463 = vmatprep.subr.mxu0 %v9236_v2 }
0x1c52   :  { %v3887_v27 = vpop.f32.mrf.mxu0 }
0x1c54   :  { %v6443_v47 = vpop.f32.mrf.mxu0 }
0x1c55   :  { %v5926_v10 = vpop.f32.mrf.mxu1 }
0x1c57   :  { %v5927_v37 = vpop.f32.mrf.mxu1 }
0x1c58   :  { %v5928_v38 = vadd.f32 %v5927_v37, %v5926_v10  ;;  %v4006_v37 = vpop.permute.xlu1 %4005 }
0x1c5a   :  { %v3818_v59 = vadd.f32 %v8515_v36, %v5928_v38 }
0x1c5c   :  { %v3888_v33 = vadd.f32 %v3887_v27, %v3818_v59 }
0x1c5e   :  { %v3892_v35 = vand.u32 2147483647, %v3888_v33  ;;  %v3979_v28 = vsub.f32 0.0, %v3888_v33 }
0x1c60   :  { %v3893_v13 = vsub.f32 0.0, %v3892_v35  ;;  %v3980_v16 = vmul.f32 1.442695, %v3979_v28  ;;  %v3891_v28 = vmax.f32 %v3888_v33, 0.0  ;;  %v9175_v33 = vstv %s8527_s19 }
0x1c62   :  { %v3894_v42 = vmul.f32 1.442695, %v3893_v13  ;;  %6763 = vpow2.f32 %v3980_v16 }
0x1c64   :  { %6765 = vpow2.f32 %v3894_v42 }
0x1c6f   :  { %v6764_v31 = vpop.eup %6763 }
0x1c70   :  { %v8518_v1 = vadd.f32 1.0, %v6764_v31  ;;  %v8533_v31 = vld [vmem:[%s9092_s12 + $0x40] ss:$0 sm:$0xff] }
0x1c71   :  { %v6766_v55 = vpop.eup %6765 }
0x1c72   :  { %9310 = vst [vmem:[#allocation42_spill] sm:$0xff] %v8518_v1  ;;  %v3896_v41 = vadd.f32 1.0, %v6766_v55  ;;  %6767 = vrcp.f32 %v8518_v1  ;;  %v3899_v24 = vmul.f32 -0.5, %v6766_v55  ;;  %v3902_v27 = vand.u32 2147483647, %v6766_v55 }
0x1c74   :  { %6769 = vlog2.f32 %v3896_v41  ;;  %v3900_v25 = vadd.f32 1.0, %v3899_v24  ;;  %vm3903_vm0 = vcmp.lt.f32.partialorder %v3902_v27, 0.0004427343  ;;  %v9312_v27 = vld [vmem:[#allocation31_spill] sm:$0xff] }
0x1c76   :  { %v3901_v59 = vmul.f32 %v6766_v55, %v3900_v25 }
0x1c7f   :  { %v6768_v6 = vpop.eup %6767 }
0x1c80   :  { %v4001_v47 = vmul.f32 %v6768_v6, %v4000_v26 }
0x1c81   :  { %v6770_v10 = vpop.eup %6769 }
0x1c82   :  { %v3898_v38 = vmul.f32 0.6931472, %v6770_v10  ;;  %v4008_v35 = vmul.f32 %v4006_v37, %v4001_v47  ;;  %v9313_v47 = vld [vmem:[#allocation32_spill] sm:$0xff]  ;;  %v9314_v10 = vld [vmem:[#allocation33_spill] sm:$0xff]  ;;  %v9315_v37 = vld [vmem:[#allocation35_spill] sm:$0xff] }
0x1c84   :  { %v3904_v13 = vsel %vm3903_vm0, %v3901_v59, %v3898_v38  ;;  %4010 = vrot.lane.b32.xlu0 %v4008_v35, %s6988_s20  ;;  %v9316_v38 = vld [vmem:[#allocation36_spill] sm:$0xff]  ;;  %v9317_v59 = vld [vmem:[#allocation37_spill] sm:$0xff] }
0x1c85   :  { %v3905_v16 = vadd.f32 %v3904_v13, %v3891_v28  ;;  %v9318_v35 = vld [vmem:[#allocation40_spill] sm:$0xff]  ;;  %v9319_v28 = vld [vmem:[#allocation10_spill] sm:$0xff] }
0x1c86   :  { %v9320_v13 = vld [vmem:[#allocation50_spill] sm:$0xff] }
0x1c87   :  { %6461 = vmatmul.mubr.msk.f32.vlgmr.msra.gmra.mxu0 %vm2364_vm14, %v3905_v16  ;;  %v9321_v16 = vld [vmem:[#allocation39_spill] sm:$0xff] }
0x1c88   :  { %6464 = vmatpush3.msra.mxu0 %v8160_v32  ;;  %6465 = vmatprep.mubr.msk.f32.mxu0 %vm6978_vm1, %v9236_v2 }
0x1c89   :  { %6468 = vmatprep.subr.mxu0 %v9236_v2 }
0x1cf6   :  { %v4011_v25 = vpop.permute.xlu0 %4010 }
0x1d47   :  { %v3975_v42 = vpop.f32.mrf.mxu0 }
0x1d48   :  { %v8536_v55 = vadd.f32 %v8533_v31, %v3975_v42 }
0x1d49   :  { %v6462_v41 = vpop.f32.mrf.mxu0 }
0x1d4a   :  { %9311 = vst [vmem:[#allocation13_spill] sm:$0xff] %v8536_v55  ;;  %v3998_v24 = vmul.f32 %v9175_v33, %v8536_v55  ;;  %3985 = vrot.lane.b32.xlu1 %v8536_v55, %s6987_s27 }
0x1d4c   :  { %v3999_v26 = vadd.f32 %v3998_v24, %v8178_v43  ;;  %v9322_v24 = vld [vmem:[#allocation44_spill] sm:$0xff]  ;;  %v9324_v43 = vld [vmem:[#allocation51_spill] sm:$0xff] }
0x1d4e   :  { %v8544_v6 = vadd.f32 %v4011_v25, %v3999_v26  ;;  %v9323_v25 = vld [vmem:[#allocation12_spill] sm:$0xff] }
0x1d50   :  { %5618 = vmatmul.mubr.msk.f32.vlgmr.msra.gmra.mxu1 %vm2150_vm12, %v8544_v6  ;;  %6466 = vmatmul.mubr.msk.f32.vlgmr.msra.gmra.mxu0 %vm2150_vm12, %v8544_v6 }
0x1d51   :  { %5950 = vmatpush3.msra.mxu1 %v8187_v62  ;;  %6469 = vmatpush3.msra.mxu0 %v8193_v61 }
0x1d52   :  { %5951 = vmatprep.subr.mxu1 %v8199_v49  ;;  %6470 = vmatprep.subr.mxu0 %v9236_v2 }
0x1d53   :  { %5952 = vmatpush3.msra.mxu1 %v8206_v48  ;;  %6471 = vmatpush3.msra.mxu0 %v8212_v52 }
0x1d54   :  { %5953 = vmatprep.subr.mxu1 %v8218_v44  ;;  %6472 = vmatprep.subr.mxu0 %v9236_v2 }
0x1d55   :  { %5954 = vmatpush3.msra.mxu1 %v8225_v40  ;;  %6473 = vmatpush3.msra.mxu0 %v8231_v50 }
0x1d56   :  { %5955 = vmatprep.subr.mxu1 %v8237_v12  ;;  %6474 = vmatprep.subr.mxu0 %v9236_v2 }
0x1d57   :  { %5956 = vmatpush3.msra.mxu1 %v8244_v8  ;;  %6475 = vmatpush3.msra.mxu0 %v8250_v20 }
0x1d58   :  { %5957 = vmatprep.subr.mxu1 %v8256_v11  ;;  %6476 = vmatprep.subr.mxu0 %v9236_v2 }
0x1d59   :  { %5958 = vmatpush3.msra.mxu1 %v8263_v18  ;;  %6477 = vmatpush3.msra.mxu0 %v8269_v3 }
0x1d5a   :  { %5959 = vmatprep.subr.mxu1 %v8275_v63  ;;  %6478 = vmatprep.subr.mxu0 %v9236_v2 }
0x1d5b   :  { %5960 = vmatpush3.msra.mxu1 %v8282_v17  ;;  %6479 = vmatpush3.msra.mxu0 %v8288_v0 }
0x1d5c   :  { %5961 = vmatprep.subr.mxu1 %v8294_v9  ;;  %6480 = vmatprep.subr.mxu0 %v9236_v2 }
0x1d5d   :  { %5962 = vmatpush3.msra.mxu1 %v8301_v53  ;;  %6481 = vmatpush3.msra.mxu0 %v8307_v29 }
0x1d5e   :  { %5963 = vmatprep.subr.mxu1 %v8313_v46  ;;  %6482 = vmatprep.subr.mxu0 %v9236_v2 }
0x1d5f   :  { %5964 = vmatpush3.msra.mxu1 %v8320_v54  ;;  %6483 = vmatpush3.msra.mxu0 %v8326_v45 }
0x1d60   :  { %5965 = vmatprep.subr.mxu1 %v8332_v60  ;;  %6484 = vmatprep.mubr.msk.f32.mxu0 %vm6978_vm1, %v9236_v2 }
0x1d61   :  { %5966 = vmatpush3.msra.mxu1 %v8340_v56  ;;  %6487 = vmatprep.subr.mxu0 %v9236_v2 }
0x1d62   :  { %5967 = vmatprep.subr.mxu1 %v8347_v22 }
0x1d63   :  { %5968 = vmatpush3.msra.mxu1 %v8353_v15 }
0x1d64   :  { %5969 = vmatprep.subr.mxu1 %v8359_v7 }
0x1d65   :  { %5970 = vmatpush3.msra.mxu1 %v8365_v57 }
0x1d66   :  { %5971 = vmatprep.subr.mxu1 %v8371_v58 }
0x1d67   :  { %5972 = vmatpush3.msra.mxu1 %v9312_v27  ;;  %v9327_v27 = vld [vmem:[#allocation52_spill] sm:$0xff] }
0x1d68   :  { %5973 = vmatprep.subr.mxu1 %v9313_v47 }
0x1d69   :  { %5974 = vmatpush3.msra.mxu1 %v9314_v10  ;;  %v9326_v10 = vld [vmem:[#allocation45_spill] sm:$0xff] }
0x1d6a   :  { %5975 = vmatprep.subr.mxu1 %v9315_v37  ;;  %v9325_v37 = vld [vmem:[#allocation41_spill] sm:$0xff] }
0x1d6b   :  { %5976 = vmatpush3.msra.mxu1 %v9316_v38 }
0x1d6c   :  { %5977 = vmatprep.subr.mxu1 %v9317_v59 }
0x1d6d   :  { %5978 = vmatpush3.msra.mxu1 %v9318_v35 }
0x1d6e   :  { %5979 = vmatprep.subr.mxu1 %v9319_v28 }
0x1d6f   :  { %5980 = vmatpush3.msra.mxu1 %v9320_v13 }
0x1d70   :  { %4509 = vmatprep.subr.mxu1 %v9321_v16 }
0x1e10   :  { %v4085_v42 = vpop.f32.mrf.mxu1  ;;  %v4156_v41 = vpop.f32.mrf.mxu0 }
0x1e11   :  { %v4086_v26 = vadd.f32 %v4085_v42, %v9322_v24  ;;  %v4157_v33 = vadd.f32 %v9323_v25, %v4156_v41 }
0x1e12   :  { %v4087_v55 = vpop.f32.mrf.mxu1  ;;  %v6467_v1 = vpop.f32.mrf.mxu0 }
0x1e13   :  { %v4160_v38 = vadd.f32 %v9324_v43, %v4086_v26  ;;  %v4162_v59 = vadd.f32 %v9325_v37, %v4157_v33  ;;  %v4088_v35 = vadd.f32 %v4087_v55, %v9326_v10 }
0x1e15   :  { %v4166_v47 = vand.u32 2147483647, %v4160_v38  ;;  %v4168_v28 = vand.u32 2147483647, %v4162_v59  ;;  %v4161_v13 = vadd.f32 %v9327_v27, %v4088_v35  ;;  %v4163_v54 = vmax.f32 %v4160_v38, 0.0 }
0x1e17   :  { %v4169_v58 = vsub.f32 0.0, %v4166_v47  ;;  %v4171_v16 = vsub.f32 0.0, %v4168_v28  ;;  %v4167_v57 = vand.u32 2147483647, %v4161_v13 }
0x1e19   :  { %v4172_v7 = vmul.f32 1.442695, %v4169_v58  ;;  %v4176_v15 = vmul.f32 1.442695, %v4171_v16  ;;  %v4170_v42 = vsub.f32 0.0, %v4167_v57 }
0x1e1b   :  { %6771 = vpow2.f32 %v4172_v7  ;;  %v4174_v41 = vmul.f32 1.442695, %v4170_v42 }
0x1e1c   :  { %6773 = vpow2.f32 %v4176_v15 }
0x1e1d   :  { %6775 = vpow2.f32 %v4174_v41 }
0x1e28   :  { %v6772_v1 = vpop.eup %6771 }
0x1e29   :  { %v6774_v24 = vpop.eup %6773  ;;  %v4178_v26 = vadd.f32 1.0, %v6772_v1  ;;  %v4181_v47 = vmul.f32 -0.5, %v6772_v1  ;;  %v4184_v7 = vand.u32 2147483647, %v6772_v1 }
0x1e2a   :  { %v4196_v33 = vadd.f32 1.0, %v6774_v24  ;;  %v6776_v25 = vpop.eup %6775  ;;  %v4199_v10 = vmul.f32 -0.5, %v6774_v24  ;;  %v4202_v16 = vand.u32 2147483647, %v6774_v24 }
0x1e2b   :  { %6777 = vlog2.f32 %v4178_v26  ;;  %v4187_v55 = vadd.f32 1.0, %v6776_v25  ;;  %v4190_v35 = vmul.f32 -0.5, %v6776_v25  ;;  %v4182_v58 = vadd.f32 1.0, %v4181_v47 }
0x1e2c   :  { %6779 = vlog2.f32 %v4196_v33  ;;  %v4200_v28 = vadd.f32 1.0, %v4199_v10  ;;  %v4193_v27 = vand.u32 2147483647, %v6776_v25  ;;  %v4165_v26 = vmax.f32 %v4162_v59, 0.0 }
0x1e2d   :  { %6781 = vlog2.f32 %v4187_v55  ;;  %v4191_v15 = vadd.f32 1.0, %v4190_v35  ;;  %v4183_v56 = vmul.f32 %v6772_v1, %v4182_v58  ;;  %vm4203_vm2 = vcmp.lt.f32.partialorder %v4202_v16, 0.0004427343 }
0x1e2e   :  { %v4201_v43 = vmul.f32 %v6774_v24, %v4200_v28  ;;  %vm4185_vm3 = vcmp.lt.f32.partialorder %v4184_v7, 0.0004427343  ;;  %v4164_v47 = vmax.f32 %v4161_v13, 0.0  ;;  %vm4194_vm4 = vcmp.lt.f32.partialorder %v4193_v27, 0.0004427343 }
0x1e2f   :  { %v4192_v60 = vmul.f32 %v6776_v25, %v4191_v15  ;;  %v4460_v28 = vstv %s5617_s2 }
0x1e38   :  { %v6778_v57 = vpop.eup %6777 }
0x1e39   :  { %v6780_v42 = vpop.eup %6779  ;;  %v4180_v41 = vmul.f32 0.6931472, %v6778_v57 }
0x1e3a   :  { %v4198_v37 = vmul.f32 0.6931472, %v6780_v42  ;;  %v6782_v22 = vpop.eup %6781 }
0x1e3b   :  { %v4189_v55 = vmul.f32 0.6931472, %v6782_v22  ;;  %v4186_v45 = vsel %vm4185_vm3, %v4183_v56, %v4180_v41  ;;  %v4466_v41 = vpop.permute.xlu1 %4465 }
0x1e3c   :  { %v4204_v33 = vsel %vm4203_vm2, %v4201_v43, %v4198_v37  ;;  %v4205_v57 = vadd.f32 %v4186_v45, %v4163_v54 }
0x1e3d   :  { %v4207_v10 = vadd.f32 %v4204_v33, %v4165_v26  ;;  %v4195_v46 = vsel %vm4194_vm4, %v4192_v60, %v4189_v55 }
0x1e3e   :  { %v4206_v35 = vadd.f32 %v4195_v46, %v4164_v47 }
0x1e3f   :  { %6485 = vmatmul.mubr.msk.f32.vlgmr.msra.gmra.mxu0 %vm2364_vm14, %v4207_v10 }
0x1e40   :  { %6488 = vmatpush3.msra.mxu0 %v8454_v30  ;;  %6503 = vmatprep.mubr.msk.f32.mxu0 %vm6978_vm1, %v9236_v2 }
0x1e41   :  { %4275 = vmatprep.mubr.f32.mxu1 %v4206_v35  ;;  %6489 = vmatprep.subr.mxu0 %v9236_v2 }
0x1e42   :  { %4276 = vmatmul.mubr.f32.vlgmr.msra.gmra.mxu1 %v4205_v57  ;;  %6490 = vmatpush3.msra.mxu0 %v8463_v34 }
0x1e43   :  { %6491 = vmatprep.subr.mxu0 %v9236_v2  ;;  %4510 = vmatpush1.msra.mxu1 %v8129_v14 }
0x1e44   :  { %6492 = vmatpush3.msra.mxu0 %v8471_v19  ;;  %4543 = vmatprep.mubr.f32.mxu1 %v9236_v2 }
0x1e45   :  { %6493 = vmatprep.subr.mxu0 %v9236_v2  ;;  %6004 = vmatprep.subr.mxu1 %v8138_v4 }
0x1e46   :  { %6494 = vmatpush3.msra.mxu0 %v8480_v51 }
0x1e47   :  { %6495 = vmatprep.subr.mxu0 %v9236_v2 }
0x1e48   :  { %6496 = vmatpush3.msra.mxu0 %v8487_v5 }
0x1e49   :  { %6497 = vmatprep.subr.mxu0 %v9236_v2 }
0x1e4a   :  { %6498 = vmatpush3.msra.mxu0 %v8494_v21 }
0x1e4b   :  { %6499 = vmatprep.subr.mxu0 %v9236_v2 }
0x1e4c   :  { %6500 = vmatpush3.msra.mxu0 %v8501_v39 }
0x1e4d   :  { %6501 = vmatprep.subr.mxu0 %v9236_v2 }
0x1e4e   :  { %6502 = vmatpush3.msra.mxu0 %v8508_v23 }
0x1e4f   :  { %6506 = vmatprep.subr.mxu0 %v9236_v2 }
0x1eff   :  { %v4347_v14 = vpop.f32.mrf.mxu0 }
0x1f01   :  { %v6486_v4 = vpop.f32.mrf.mxu0 }
0x1f02   :  { %v5981_v43 = vpop.f32.mrf.mxu1 }
0x1f04   :  { %v5982_v46 = vpop.f32.mrf.mxu1 }
0x1f05   :  { %v5983_v54 = vadd.f32 %v5982_v46, %v5981_v43 }
0x1f07   :  { %v4278_v45 = vadd.f32 %v8515_v36, %v5983_v54 }
0x1f09   :  { %v4348_v60 = vadd.f32 %v4347_v14, %v4278_v45  ;;  %v4455_v14 = vstv %s8638_s23 }
0x1f0b   :  { %v4352_v56 = vand.u32 2147483647, %v4348_v60  ;;  %v4439_v22 = vsub.f32 0.0, %v4348_v60  ;;  %v4351_v10 = vmax.f32 %v4348_v60, 0.0 }
0x1f0d   :  { %v4353_v27 = vsub.f32 0.0, %v4352_v56  ;;  %v4440_v37 = vmul.f32 1.442695, %v4439_v22  ;;  %v9347_v22 = vld [vmem:[#allocation46_spill] sm:$0xff] }
0x1f0f   :  { %v4354_v38 = vmul.f32 1.442695, %v4353_v27  ;;  %6783 = vpow2.f32 %v4440_v37  ;;  %v9348_v37 = vld [vmem:[#allocation15_spill] sm:$0xff] }
0x1f11   :  { %6785 = vpow2.f32 %v4354_v38 }
0x1f1c   :  { %v6784_v59 = vpop.eup %6783 }
0x1f1d   :  { %v8629_v13 = vadd.f32 1.0, %v6784_v59 }
0x1f1e   :  { %v6786_v1 = vpop.eup %6785 }
0x1f1f   :  { %v4356_v24 = vadd.f32 1.0, %v6786_v1  ;;  %6787 = vrcp.f32 %v8629_v13  ;;  %v4359_v25 = vmul.f32 -0.5, %v6786_v1  ;;  %v4362_v7 = vand.u32 2147483647, %v6786_v1 }
0x1f21   :  { %6789 = vlog2.f32 %v4356_v24  ;;  %v4360_v58 = vadd.f32 1.0, %v4359_v25  ;;  %vm4363_vm5 = vcmp.lt.f32.partialorder %v4362_v7, 0.0004427343  ;;  %v9349_v24 = vld [vmem:[#allocation51_spill] sm:$0xff] }
0x1f23   :  { %v4361_v33 = vmul.f32 %v6786_v1, %v4360_v58 }
0x1f2c   :  { %v6788_v16 = vpop.eup %6787 }
0x1f2d   :  { %v4461_v15 = vmul.f32 %v6788_v16, %v4460_v28  ;;  %v9350_v28 = vld [vmem:[#allocation41_spill] sm:$0xff]  ;;  %v9351_v16 = vld [vmem:[#allocation47_spill] sm:$0xff] }
0x1f2e   :  { %v6790_v42 = vpop.eup %6789 }
0x1f2f   :  { %v4358_v26 = vmul.f32 0.6931472, %v6790_v42  ;;  %v4468_v55 = vmul.f32 %v4466_v41, %v4461_v15  ;;  %v9352_v41 = vld [vmem:[#allocation52_spill] sm:$0xff] }
0x1f31   :  { %v4364_v47 = vsel %vm4363_vm5, %v4361_v33, %v4358_v26  ;;  %4470 = vrot.lane.b32.xlu0 %v4468_v55, %s6988_s20 }
0x1f32   :  { %v4365_v35 = vadd.f32 %v4364_v47, %v4351_v10 }
0x1f34   :  { %6504 = vmatmul.mubr.msk.f32.vlgmr.msra.gmra.mxu0 %vm2364_vm14, %v4365_v35 }
0x1f35   :  { %6507 = vmatpush3.msra.mxu0 %v8160_v32  ;;  %6508 = vmatprep.mubr.msk.f32.mxu0 %vm6978_vm1, %v9236_v2 }
0x1f36   :  { %6511 = vmatprep.subr.mxu0 %v9236_v2 }
0x1fa3   :  { %v4471_v54 = vpop.permute.xlu0 %4470 }
0x1ff4   :  { %v4435_v57 = vpop.f32.mrf.mxu0 }
0x1ff5   :  { %v8642_v4 = vadd.f32 %v8533_v31, %v4435_v57 }
0x1ff6   :  { %v6505_v43 = vpop.f32.mrf.mxu0 }
0x1ff7   :  { %v4458_v46 = vmul.f32 %v4455_v14, %v8642_v4  ;;  %4445 = vrot.lane.b32.xlu1 %v8642_v4, %s6987_s27 }
0x1ff9   :  { %v4459_v32 = vadd.f32 %v4458_v46, %v8544_v6 }
0x1ffb   :  { %v8650_v45 = vadd.f32 %v4471_v54, %v4459_v32 }
0x1ffd   :  { %5625 = vmatmul.mubr.msk.f32.vlgmr.msra.gmra.mxu1 %vm2150_vm12, %v8650_v45  ;;  %6509 = vmatmul.mubr.msk.f32.vlgmr.msra.gmra.mxu0 %vm2150_vm12, %v8650_v45 }
0x1ffe   :  { %6005 = vmatpush3.msra.mxu1 %v8187_v62  ;;  %6512 = vmatpush3.msra.mxu0 %v8193_v61  ;;  %v9328_v62 = vld [vmem:[#allocation21_spill] sm:$0xff]  ;;  %v9329_v61 = vld [vmem:[#allocation22_spill] sm:$0xff] }
0x1fff   :  { %6006 = vmatprep.subr.mxu1 %v8199_v49  ;;  %6513 = vmatprep.subr.mxu0 %v9236_v2  ;;  %v9330_v49 = vld [vmem:[#allocation23_spill] sm:$0xff] }
0x2000   :  { %6007 = vmatpush3.msra.mxu1 %v8206_v48  ;;  %6514 = vmatpush3.msra.mxu0 %v8212_v52  ;;  %v9331_v48 = vld [vmem:[#allocation24_spill] sm:$0xff]  ;;  %v9332_v52 = vld [vmem:[#allocation25_spill] sm:$0xff] }
0x2001   :  { %6008 = vmatprep.subr.mxu1 %v8218_v44  ;;  %6515 = vmatprep.subr.mxu0 %v9236_v2  ;;  %v9333_v44 = vld [vmem:[#allocation26_spill] sm:$0xff] }
0x2002   :  { %6009 = vmatpush3.msra.mxu1 %v8225_v40  ;;  %6516 = vmatpush3.msra.mxu0 %v8231_v50  ;;  %v9334_v40 = vld [vmem:[#allocation27_spill] sm:$0xff]  ;;  %v9335_v50 = vld [vmem:[#allocation28_spill] sm:$0xff] }
0x2003   :  { %6010 = vmatprep.subr.mxu1 %v8237_v12  ;;  %6517 = vmatprep.subr.mxu0 %v9236_v2  ;;  %v9336_v12 = vld [vmem:[#allocation29_spill] sm:$0xff] }
0x2004   :  { %6011 = vmatpush3.msra.mxu1 %v8244_v8  ;;  %6518 = vmatpush3.msra.mxu0 %v8250_v20  ;;  %v9337_v8 = vld [vmem:[#allocation30_spill] sm:$0xff]  ;;  %v9338_v20 = vld [vmem:[#allocation31_spill] sm:$0xff] }
0x2005   :  { %6012 = vmatprep.subr.mxu1 %v8256_v11  ;;  %6519 = vmatprep.subr.mxu0 %v9236_v2  ;;  %v9339_v11 = vld [vmem:[#allocation32_spill] sm:$0xff] }
0x2006   :  { %6013 = vmatpush3.msra.mxu1 %v8263_v18  ;;  %6520 = vmatpush3.msra.mxu0 %v8269_v3  ;;  %v9340_v18 = vld [vmem:[#allocation33_spill] sm:$0xff]  ;;  %v9341_v3 = vld [vmem:[#allocation35_spill] sm:$0xff] }
0x2007   :  { %6014 = vmatprep.subr.mxu1 %v8275_v63  ;;  %6521 = vmatprep.subr.mxu0 %v9236_v2  ;;  %v9342_v63 = vld [vmem:[#allocation36_spill] sm:$0xff] }
0x2008   :  { %6015 = vmatpush3.msra.mxu1 %v8282_v17  ;;  %6522 = vmatpush3.msra.mxu0 %v8288_v0  ;;  %v9343_v17 = vld [vmem:[#allocation37_spill] sm:$0xff]  ;;  %v9344_v0 = vld [vmem:[#allocation40_spill] sm:$0xff] }
0x2009   :  { %6016 = vmatprep.subr.mxu1 %v8294_v9  ;;  %6523 = vmatprep.subr.mxu0 %v9236_v2  ;;  %v9345_v9 = vld [vmem:[#allocation10_spill] sm:$0xff] }
0x200a   :  { %6017 = vmatpush3.msra.mxu1 %v8301_v53  ;;  %6524 = vmatpush3.msra.mxu0 %v8307_v29  ;;  %v9346_v53 = vld [vmem:[#allocation50_spill] sm:$0xff]  ;;  %v6891_v29 = vld [vmem:[%s9090_s10 + $0x8] sm:$0xff] }
0x200b   :  { %6018 = vmatprep.subr.mxu1 %v9328_v62  ;;  %6525 = vmatprep.subr.mxu0 %v9236_v2 }
0x200c   :  { %6019 = vmatpush3.msra.mxu1 %v9329_v61  ;;  %6526 = vmatpush3.msra.mxu0 %v9330_v49 }
0x200d   :  { %6020 = vmatprep.subr.mxu1 %v9331_v48  ;;  %6527 = vmatprep.mubr.msk.f32.mxu0 %vm6978_vm1, %v9236_v2 }
0x200e   :  { %6021 = vmatpush3.msra.mxu1 %v9332_v52  ;;  %6530 = vmatprep.subr.mxu0 %v9236_v2 }
0x200f   :  { %6022 = vmatprep.subr.mxu1 %v9333_v44 }
0x2010   :  { %6023 = vmatpush3.msra.mxu1 %v9334_v40 }
0x2011   :  { %6024 = vmatprep.subr.mxu1 %v9335_v50 }
0x2012   :  { %6025 = vmatpush3.msra.mxu1 %v9336_v12 }
0x2013   :  { %6026 = vmatprep.subr.mxu1 %v9337_v8 }
0x2014   :  { %6027 = vmatpush3.msra.mxu1 %v9338_v20 }
0x2015   :  { %6028 = vmatprep.subr.mxu1 %v9339_v11 }
0x2016   :  { %6029 = vmatpush3.msra.mxu1 %v9340_v18 }
0x2017   :  { %6030 = vmatprep.subr.mxu1 %v9341_v3 }
0x2018   :  { %6031 = vmatpush3.msra.mxu1 %v9342_v63 }
0x2019   :  { %6032 = vmatprep.subr.mxu1 %v9343_v17 }
0x201a   :  { %6033 = vmatpush3.msra.mxu1 %v9344_v0 }
0x201b   :  { %6034 = vmatprep.subr.mxu1 %v9345_v9 }
0x201c   :  { %6035 = vmatpush3.msra.mxu1 %v9346_v53 }
0x201d   :  { %4969 = vmatprep.subr.mxu1 %v6891_v29 }
0x20bd   :  { %v4545_v60 = vpop.f32.mrf.mxu1  ;;  %v4616_v56 = vpop.f32.mrf.mxu0 }
0x20be   :  { %v4546_v27 = vadd.f32 %v4545_v60, %v9347_v22  ;;  %v4617_v38 = vadd.f32 %v4616_v56, %v9348_v37 }
0x20bf   :  { %v4547_v59 = vpop.f32.mrf.mxu1  ;;  %v6510_v1 = vpop.f32.mrf.mxu0 }
0x20c0   :  { %v4620_v25 = vadd.f32 %v9349_v24, %v4546_v27  ;;  %v4622_v58 = vadd.f32 %v9350_v28, %v4617_v38  ;;  %v4548_v7 = vadd.f32 %v4547_v59, %v9351_v16 }
0x20c2   :  { %v4626_v15 = vand.u32 2147483647, %v4620_v25  ;;  %v4628_v42 = vand.u32 2147483647, %v4622_v58  ;;  %v4621_v26 = vadd.f32 %v9352_v41, %v4548_v7  ;;  %v4625_v29 = vmax.f32 %v4622_v58, 0.0 }
0x20c3   :  { %v4623_v59 = vmax.f32 %v4620_v25, 0.0  ;;  %v6892_v25 = vld [vmem:[%s9090_s10] sm:$0xff] }
0x20c4   :  { %v4629_v33 = vsub.f32 0.0, %v4626_v15  ;;  %v4631_v55 = vsub.f32 0.0, %v4628_v42  ;;  %v4627_v10 = vand.u32 2147483647, %v4621_v26  ;;  %v4624_v38 = vmax.f32 %v4621_v26, 0.0 }
0x20c6   :  { %v4632_v47 = vmul.f32 1.442695, %v4629_v33  ;;  %v4636_v35 = vmul.f32 1.442695, %v4631_v55  ;;  %v4630_v57 = vsub.f32 0.0, %v4627_v10 }
0x20c8   :  { %6791 = vpow2.f32 %v4632_v47  ;;  %v4634_v43 = vmul.f32 1.442695, %v4630_v57  ;;  %v4920_v47 = vstv %s5624_s30 }
0x20c9   :  { %6793 = vpow2.f32 %v4636_v35 }
0x20ca   :  { %6795 = vpow2.f32 %v4634_v43 }
0x20d5   :  { %v6792_v46 = vpop.eup %6791 }
0x20d6   :  { %v6794_v32 = vpop.eup %6793  ;;  %v4638_v54 = vadd.f32 1.0, %v6792_v46  ;;  %v4641_v52 = vmul.f32 -0.5, %v6792_v46  ;;  %v4644_v20 = vand.u32 2147483647, %v6792_v46 }
0x20d7   :  { %v4656_v62 = vadd.f32 1.0, %v6794_v32  ;;  %v6796_v61 = vpop.eup %6795  ;;  %v4659_v48 = vmul.f32 -0.5, %v6794_v32  ;;  %v4662_v12 = vand.u32 2147483647, %v6794_v32 }
0x20d8   :  { %6797 = vlog2.f32 %v4638_v54  ;;  %v4647_v49 = vadd.f32 1.0, %v6796_v61  ;;  %v4650_v44 = vmul.f32 -0.5, %v6796_v61  ;;  %v4642_v50 = vadd.f32 1.0, %v4641_v52 }
0x20d9   :  { %6799 = vlog2.f32 %v4656_v62  ;;  %v4660_v40 = vadd.f32 1.0, %v4659_v48  ;;  %v4653_v63 = vand.u32 2147483647, %v6796_v61  ;;  %vm4663_vm6 = vcmp.lt.f32.partialorder %v4662_v12, 0.0004427343 }
0x20da   :  { %6801 = vlog2.f32 %v4647_v49  ;;  %v4651_v11 = vadd.f32 1.0, %v4650_v44  ;;  %v4643_v53 = vmul.f32 %v6792_v46, %v4642_v50  ;;  %vm4645_vm7 = vcmp.lt.f32.partialorder %v4644_v20, 0.0004427343  ;;  %v6894_v44 = vld [vmem:[%s9090_s10 + $0x10] sm:$0xff] }
0x20db   :  { %v4661_v0 = vmul.f32 %v6794_v32, %v4660_v40  ;;  %vm4654_vm8 = vcmp.lt.f32.partialorder %v4653_v63, 0.0004427343  ;;  %v4926_v32 = vpop.permute.xlu1 %4925  ;;  %v4915_v50 = vstv %s8752_s7  ;;  %v6896_v63 = vld [vmem:[%s9091_s11 + $0x138] sm:$0xff] }
0x20dc   :  { %v4652_v22 = vmul.f32 %v6796_v61, %v4651_v11 }
0x20e5   :  { %v6798_v8 = vpop.eup %6797 }
0x20e6   :  { %v6800_v18 = vpop.eup %6799  ;;  %v4640_v3 = vmul.f32 0.6931472, %v6798_v8 }
0x20e7   :  { %v4658_v17 = vmul.f32 0.6931472, %v6800_v18  ;;  %v6802_v9 = vpop.eup %6801 }
0x20e8   :  { %v4649_v56 = vmul.f32 0.6931472, %v6802_v9  ;;  %v4646_v27 = vsel %vm4645_vm7, %v4643_v53, %v4640_v3  ;;  %v6899_v9 = vld [vmem:[%s9091_s11 + $0x130] sm:$0xff]  ;;  %v6900_v53 = vld [vmem:[%s9091_s11 + $0xe8] sm:$0xff] }
0x20e9   :  { %v4664_v60 = vsel %vm4663_vm6, %v4661_v0, %v4658_v17  ;;  %v4665_v28 = vadd.f32 %v4646_v27, %v4623_v59  ;;  %v6897_v17 = vld [vmem:[%s9091_s11 + $0xf0] sm:$0xff]  ;;  %v6905_v27 = vld [vmem:[%s9091_s11 + $0x120] sm:$0xff]  ;;  %v6908_v59 = vld [vmem:[%s9091_s11 + $0x118] sm:$0xff] }
0x20ea   :  { %v4667_v37 = vadd.f32 %v4664_v60, %v4625_v29  ;;  %v4655_v1 = vsel %vm4654_vm8, %v4652_v22, %v4649_v56  ;;  %v6898_v0 = vld [vmem:[%s9091_s11 + $0x70] sm:$0xff]  ;;  %v6901_v29 = vld [vmem:[%s9091_s11 + $0x68] sm:$0xff]  ;;  %v6903_v56 = vld [vmem:[%s9091_s11 + $0xe0] sm:$0xff] }
0x20eb   :  { %v4666_v24 = vadd.f32 %v4655_v1, %v4624_v38  ;;  %v6902_v60 = vld [vmem:[%s9091_s11 + $0x128] sm:$0xff]  ;;  %v6904_v22 = vld [vmem:[%s9091_s11 + $0x60] sm:$0xff]  ;;  %v6907_v38 = vld [vmem:[%s9091_s11 + $0x58] sm:$0xff] }
0x20ec   :  { %6528 = vmatmul.mubr.msk.f32.vlgmr.msra.gmra.mxu0 %vm2364_vm14, %v4667_v37  ;;  %v6906_v37 = vld [vmem:[%s9091_s11 + $0xd8] sm:$0xff]  ;;  %v6909_v1 = vld [vmem:[%s9091_s11 + $0xd0] sm:$0xff] }
0x20ed   :  { %6531 = vmatpush3.msra.mxu0 %v8454_v30  ;;  %6546 = vmatprep.mubr.msk.f32.mxu0 %vm6978_vm1, %v9236_v2  ;;  %v6893_v30 = vld [vmem:[%s9091_s11 + $0xf8] sm:$0xff] }
0x20ee   :  { %4735 = vmatprep.mubr.f32.mxu1 %v4666_v24  ;;  %6532 = vmatprep.subr.mxu0 %v9236_v2  ;;  %v6910_v24 = vld [vmem:[%s9091_s11 + $0x50] sm:$0xff] }
0x20ef   :  { %4736 = vmatmul.mubr.f32.vlgmr.msra.gmra.mxu1 %v4665_v28  ;;  %6533 = vmatpush3.msra.mxu0 %v8463_v34  ;;  %v6911_v28 = vld [vmem:[%s9091_s11 + $0x110] sm:$0xff] }
0x20f0   :  { %6534 = vmatprep.subr.mxu0 %v9236_v2  ;;  %4970 = vmatpush1.msra.mxu1 %v6892_v25  ;;  %v6912_v25 = vld [vmem:[%s9091_s11 + $0xc8] sm:$0xff] }
0x20f1   :  { %6535 = vmatpush3.msra.mxu0 %v8471_v19  ;;  %5003 = vmatprep.mubr.f32.mxu1 %v9236_v2 }
0x20f2   :  { %6536 = vmatprep.subr.mxu0 %v9236_v2  ;;  %6059 = vmatprep.subr.mxu1 %v6893_v30  ;;  %v6913_v30 = vld [vmem:[%s9091_s11 + $0x48] sm:$0xff] }
0x20f3   :  { %6537 = vmatpush3.msra.mxu0 %v8480_v51 }
0x20f4   :  { %6538 = vmatprep.subr.mxu0 %v9236_v2 }
0x20f5   :  { %6539 = vmatpush3.msra.mxu0 %v8487_v5 }
0x20f6   :  { %6540 = vmatprep.subr.mxu0 %v9236_v2 }
0x20f7   :  { %6541 = vmatpush3.msra.mxu0 %v8494_v21 }
0x20f8   :  { %6542 = vmatprep.subr.mxu0 %v9236_v2 }
0x20f9   :  { %6543 = vmatpush3.msra.mxu0 %v8501_v39 }
0x20fa   :  { %6544 = vmatprep.subr.mxu0 %v9236_v2 }
0x20fb   :  { %6545 = vmatpush3.msra.mxu0 %v8508_v23 }
0x20fc   :  { %6549 = vmatprep.subr.mxu0 %v9236_v2 }
0x21ac   :  { %v4807_v34 = vpop.f32.mrf.mxu0 }
0x21ae   :  { %v6529_v19 = vpop.f32.mrf.mxu0 }
0x21af   :  { %v6036_v51 = vpop.f32.mrf.mxu1  ;;  %v6915_v19 = vld [vmem:[%s9091_s11 + $0xc0] sm:$0xff] }
0x21b1   :  { %v6037_v58 = vpop.f32.mrf.mxu1 }
0x21b2   :  { %v6038_v16 = vadd.f32 %v6037_v58, %v6036_v51  ;;  %v6916_v51 = vld [vmem:[%s9091_s11 + $0x40] sm:$0xff] }
0x21b3   :  { %v6917_v58 = vld [vmem:[%s9091_s11 + $0x100] sm:$0xff] }
0x21b4   :  { %v4738_v5 = vadd.f32 %v8515_v36, %v6038_v16  ;;  %v6918_v16 = vld [vmem:[%s9091_s11 + $0xb8] sm:$0xff] }
0x21b6   :  { %v4808_v7 = vadd.f32 %v4807_v34, %v4738_v5  ;;  %v6914_v34 = vld [vmem:[%s9091_s11 + $0x108] sm:$0xff]  ;;  %v6919_v5 = vld [vmem:[%s9091_s11 + $0x38] sm:$0xff] }
0x21b8   :  { %v4812_v15 = vand.u32 2147483647, %v4808_v7  ;;  %v4899_v21 = vsub.f32 0.0, %v4808_v7  ;;  %v4811_v49 = vmax.f32 %v4808_v7, 0.0  ;;  %v6920_v7 = vld [vmem:[%s9091_s11 + $0xb0] sm:$0xff] }
0x21ba   :  { %v4813_v42 = vsub.f32 0.0, %v4812_v15  ;;  %v4900_v41 = vmul.f32 1.442695, %v4899_v21  ;;  %v6921_v15 = vld [vmem:[%s9091_s11 + $0x30] sm:$0xff]  ;;  %v6922_v21 = vld [vmem:[%s9091_s11 + $0xa8] sm:$0xff] }
0x21bc   :  { %v4814_v26 = vmul.f32 1.442695, %v4813_v42  ;;  %6803 = vpow2.f32 %v4900_v41  ;;  %v6923_v42 = vld [vmem:[%s9091_s11 + $0x28] sm:$0xff]  ;;  %v6924_v41 = vld [vmem:[%s9091_s11 + $0xa0] sm:$0xff] }
0x21be   :  { %6805 = vpow2.f32 %v4814_v26  ;;  %v6925_v26 = vld [vmem:[%s9091_s11 + $0x20] sm:$0xff] }
0x21c9   :  { %v6804_v39 = vpop.eup %6803 }
0x21ca   :  { %v8741_v33 = vadd.f32 1.0, %v6804_v39  ;;  %v6926_v39 = vld [vmem:[%s9091_s11 + $0x98] sm:$0xff] }
0x21cb   :  { %v6806_v23 = vpop.eup %6805 }
0x21cc   :  { %v4816_v55 = vadd.f32 1.0, %v6806_v23  ;;  %6807 = vrcp.f32 %v8741_v33  ;;  %v4819_v10 = vmul.f32 -0.5, %v6806_v23  ;;  %v4822_v57 = vand.u32 2147483647, %v6806_v23 }
0x21ce   :  { %6809 = vlog2.f32 %v4816_v55  ;;  %v4820_v36 = vadd.f32 1.0, %v4819_v10  ;;  %vm4823_vm9 = vcmp.lt.f32.partialorder %v4822_v57, 0.0004427343  ;;  %v6928_v55 = vld [vmem:[%s9091_s11 + $0x90] sm:$0xff]  ;;  %v6933_v57 = vld [vmem:[%s9091_s11] sm:$0xff] }
0x21cf   :  { %v6929_v10 = vld [vmem:[%s9091_s11 + $0x10] sm:$0xff] }
0x21d0   :  { %v4821_v62 = vmul.f32 %v6806_v23, %v4820_v36  ;;  %v6927_v23 = vld [vmem:[%s9091_s11 + $0x18] sm:$0xff]  ;;  %v6931_v36 = vld [vmem:[%s9091_s11 + $0x8] sm:$0xff] }
0x21d9   :  { %v6808_v35 = vpop.eup %6807 }
0x21da   :  { %v4921_v43 = vmul.f32 %v6808_v35, %v4920_v47  ;;  %v6930_v47 = vld [vmem:[%s9091_s11 + $0x88] sm:$0xff]  ;;  %v6932_v35 = vld [vmem:[%s9091_s11 + $0x80] sm:$0xff] }
0x21db   :  { %v6810_v46 = vpop.eup %6809 }
0x21dc   :  { %v4818_v54 = vmul.f32 0.6931472, %v6810_v46  ;;  %v4928_v61 = vmul.f32 %v4926_v32, %v4921_v43  ;;  %v8900_v43 = vld [vmem:[%s9094_s14] sm:$0xff] }
0x21de   :  { %v4824_v48 = vsel %vm4823_vm9, %v4821_v62, %v4818_v54  ;;  %4930 = vrot.lane.b32.xlu0 %v4928_v61, %s6988_s20  ;;  %v9353_v54 = vld [vmem:[#allocation48_spill] sm:$0xff]  ;;  %v9354_v61 = vld [vmem:[#allocation14_spill] sm:$0xff] }
0x21df   :  { %v4825_v52 = vadd.f32 %v4824_v48, %v4811_v49 }
0x21e1   :  { %6547 = vmatmul.mubr.msk.f32.vlgmr.msra.gmra.mxu0 %vm2364_vm14, %v4825_v52 }
0x21e2   :  { %6550 = vmatpush3.msra.mxu0 %v6894_v44  ;;  %6551 = vmatprep.mubr.msk.f32.mxu0 %vm6978_vm1, %v9236_v2  ;;  %v6934_v44 = vld [vmem:[%s9090_s10 + $0x48] ss:$0 sm:$0xff] }
0x21e3   :  { %6554 = vmatprep.subr.mxu0 %v9236_v2 }
0x2250   :  { %v4931_v18 = vpop.permute.xlu0 %4930 }
0x22a1   :  { %v4895_v40 = vpop.f32.mrf.mxu0 }
0x22a2   :  { %v8756_v12 = vadd.f32 %v8533_v31, %v4895_v40  ;;  %v6895_v31 = vld [vmem:[%s9091_s11 + $0x78] sm:$0xff] }
0x22a3   :  { %v6548_v8 = vpop.f32.mrf.mxu0 }
0x22a4   :  { %v4918_v20 = vmul.f32 %v4915_v50, %v8756_v12  ;;  %4905 = vrot.lane.b32.xlu1 %v8756_v12, %s6987_s27  ;;  %v6935_v8 = vld [vmem:[%s9090_s10 + $0x58] ss:$0 sm:$0xff] }
0x22a6   :  { %v4919_v11 = vadd.f32 %v4918_v20, %v8650_v45 }
0x22a8   :  { %v8764_v3 = vadd.f32 %v4931_v18, %v4919_v11  ;;  %v9355_v11 = vld [vmem:[#allocation49_spill] sm:$0xff] }
0x22aa   :  { %5632 = vmatmul.mubr.msk.f32.vlgmr.msra.gmra.mxu1 %vm2150_vm12, %v8764_v3  ;;  %6552 = vmatmul.mubr.msk.f32.vlgmr.msra.gmra.mxu0 %vm2150_vm12, %v8764_v3 }
0x22ab   :  { %6060 = vmatpush3.msra.mxu1 %v6895_v31  ;;  %6555 = vmatpush3.msra.mxu0 %v6896_v63 }
0x22ac   :  { %6061 = vmatprep.subr.mxu1 %v6897_v17  ;;  %6556 = vmatprep.subr.mxu0 %v9236_v2  ;;  %v6936_v17 = vld [vmem:[%s9090_s10 + $0x50] ss:$0 sm:$0xff] }
0x22ad   :  { %6062 = vmatpush3.msra.mxu1 %v6898_v0  ;;  %6557 = vmatpush3.msra.mxu0 %v6899_v9 }
0x22ae   :  { %6063 = vmatprep.subr.mxu1 %v6900_v53  ;;  %6558 = vmatprep.subr.mxu0 %v9236_v2 }
0x22af   :  { %6064 = vmatpush3.msra.mxu1 %v6901_v29  ;;  %6559 = vmatpush3.msra.mxu0 %v6902_v60 }
0x22b0   :  { %6065 = vmatprep.subr.mxu1 %v6903_v56  ;;  %6560 = vmatprep.subr.mxu0 %v9236_v2 }
0x22b1   :  { %6066 = vmatpush3.msra.mxu1 %v6904_v22  ;;  %6561 = vmatpush3.msra.mxu0 %v6905_v27 }
0x22b2   :  { %6067 = vmatprep.subr.mxu1 %v6906_v37  ;;  %6562 = vmatprep.subr.mxu0 %v9236_v2 }
0x22b3   :  { %6068 = vmatpush3.msra.mxu1 %v6907_v38  ;;  %6563 = vmatpush3.msra.mxu0 %v6908_v59 }
0x22b4   :  { %6069 = vmatprep.subr.mxu1 %v6909_v1  ;;  %6564 = vmatprep.subr.mxu0 %v9236_v2 }
0x22b5   :  { %6070 = vmatpush3.msra.mxu1 %v6910_v24  ;;  %6565 = vmatpush3.msra.mxu0 %v6911_v28 }
0x22b6   :  { %6071 = vmatprep.subr.mxu1 %v6912_v25  ;;  %6566 = vmatprep.subr.mxu0 %v9236_v2 }
0x22b7   :  { %6072 = vmatpush3.msra.mxu1 %v6913_v30  ;;  %6567 = vmatpush3.msra.mxu0 %v6914_v34 }
0x22b8   :  { %6073 = vmatprep.subr.mxu1 %v6915_v19  ;;  %6568 = vmatprep.subr.mxu0 %v9236_v2 }
0x22b9   :  { %6074 = vmatpush3.msra.mxu1 %v6916_v51  ;;  %6569 = vmatpush3.msra.mxu0 %v6917_v58 }
0x22ba   :  { %6075 = vmatprep.subr.mxu1 %v6918_v16  ;;  %6570 = vmatprep.mubr.msk.f32.mxu0 %vm6978_vm1, %v9236_v2 }
0x22bb   :  { %6076 = vmatpush3.msra.mxu1 %v6919_v5  ;;  %6573 = vmatprep.subr.mxu0 %v9236_v2 }
0x22bc   :  { %6077 = vmatprep.subr.mxu1 %v6920_v7 }
0x22bd   :  { %6078 = vmatpush3.msra.mxu1 %v6921_v15 }
0x22be   :  { %6079 = vmatprep.subr.mxu1 %v6922_v21 }
0x22bf   :  { %6080 = vmatpush3.msra.mxu1 %v6923_v42 }
0x22c0   :  { %6081 = vmatprep.subr.mxu1 %v6924_v41 }
0x22c1   :  { %6082 = vmatpush3.msra.mxu1 %v6925_v26 }
0x22c2   :  { %6083 = vmatprep.subr.mxu1 %v6926_v39 }
0x22c3   :  { %6084 = vmatpush3.msra.mxu1 %v6927_v23 }
0x22c4   :  { %6085 = vmatprep.subr.mxu1 %v6928_v55 }
0x22c5   :  { %6086 = vmatpush3.msra.mxu1 %v6929_v10 }
0x22c6   :  { %6087 = vmatprep.subr.mxu1 %v6930_v47 }
0x22c7   :  { %6088 = vmatpush3.msra.mxu1 %v6931_v36 }
0x22c8   :  { %6089 = vmatprep.subr.mxu1 %v6932_v35 }
0x22c9   :  { %6090 = vmatpush3.msra.mxu1 %v6933_v57 }
0x22ca   :  { %6592 = vmatprep.subr.mxu1 %v8900_v43 }
0x236a   :  { %v5005_v46 = vpop.f32.mrf.mxu1  ;;  %v5076_v32 = vpop.f32.mrf.mxu0 }
0x236b   :  { %v5006_v62 = vadd.f32 %v5005_v46, %v9353_v54  ;;  %v5077_v49 = vadd.f32 %v9354_v61, %v5076_v32 }
0x236c   :  { %v5007_v48 = vpop.f32.mrf.mxu1  ;;  %v6553_v52 = vpop.f32.mrf.mxu0 }
0x236d   :  { %v5080_v40 = vadd.f32 %v6934_v44, %v5006_v62  ;;  %v5082_v20 = vadd.f32 %v6935_v8, %v5077_v49  ;;  %v5008_v18 = vadd.f32 %v5007_v48, %v9355_v11  ;;  %v6937_v49 = vld [vmem:[%s9092_s12 + $0x38] sm:$0xff]  ;;  %v6938_v48 = vld [vmem:[%s9092_s12 + $0x30] sm:$0xff]  ;;  %v6939_v44 = vld [vmem:[%s9092_s12 + $0x28] sm:$0xff] }
0x236e   :  { %v9356_v52 = vld [vmem:[#allocation18_spill] sm:$0xff]  ;;  %v9358_v8 = vld [vmem:[#allocation11_spill] sm:$0xff] }
0x236f   :  { %v5086_v31 = vand.u32 2147483647, %v5080_v40  ;;  %v5088_v63 = vand.u32 2147483647, %v5082_v20  ;;  %v5081_v0 = vadd.f32 %v6936_v17, %v5008_v18  ;;  %v5085_v55 = vmax.f32 %v5082_v20, 0.0  ;;  %v6940_v20 = vld [vmem:[%s9092_s12 + $0x20] sm:$0xff] }
0x2370   :  { %v5083_v32 = vmax.f32 %v5080_v40, 0.0  ;;  %v9357_v40 = vld [vmem:[#allocation54_spill] sm:$0xff] }
0x2371   :  { %v5089_v9 = vsub.f32 0.0, %v5086_v31  ;;  %v5091_v53 = vsub.f32 0.0, %v5088_v63  ;;  %v5087_v29 = vand.u32 2147483647, %v5081_v0  ;;  %v5084_v46 = vmax.f32 %v5081_v0, 0.0  ;;  %v9359_v11 = vld [vmem:[#allocation34_spill] sm:$0xff] }
0x2372   :  { %v6942_v18 = vld [vmem:[%s9092_s12 + $0x10] sm:$0xff]  ;;  %v6943_v31 = vld [vmem:[%s9092_s12 + $0x8] sm:$0xff] }
0x2373   :  { %v5092_v60 = vmul.f32 1.442695, %v5089_v9  ;;  %v5096_v56 = vmul.f32 1.442695, %v5091_v53  ;;  %v5090_v22 = vsub.f32 0.0, %v5087_v29 }
0x2374   :  { %v8967_v53 = vld [vmem:[%s9094_s14 + $0x8] ss:$0 sm:$0xff] }
0x2375   :  { %6811 = vpow2.f32 %v5092_v60  ;;  %v5094_v27 = vmul.f32 1.442695, %v5090_v22 }
0x2376   :  { %6813 = vpow2.f32 %v5096_v56 }
0x2377   :  { %6815 = vpow2.f32 %v5094_v27 }
0x2382   :  { %v6812_v37 = vpop.eup %6811 }
0x2383   :  { %v6814_v38 = vpop.eup %6813  ;;  %v5098_v59 = vadd.f32 1.0, %v6812_v37  ;;  %v5101_v30 = vmul.f32 -0.5, %v6812_v37  ;;  %v5104_v5 = vand.u32 2147483647, %v6812_v37 }
0x2384   :  { %v5116_v1 = vadd.f32 1.0, %v6814_v38  ;;  %v6816_v24 = vpop.eup %6815  ;;  %v5119_v25 = vmul.f32 -0.5, %v6814_v38  ;;  %v5122_v58 = vand.u32 2147483647, %v6814_v38 }
0x2385   :  { %6817 = vlog2.f32 %v5098_v59  ;;  %v5107_v28 = vadd.f32 1.0, %v6816_v24  ;;  %v5110_v34 = vmul.f32 -0.5, %v6816_v24  ;;  %v5102_v51 = vadd.f32 1.0, %v5101_v30 }
0x2386   :  { %6819 = vlog2.f32 %v5116_v1  ;;  %v5120_v19 = vadd.f32 1.0, %v5119_v25  ;;  %v5113_v42 = vand.u32 2147483647, %v6816_v24  ;;  %vm5123_vm10 = vcmp.lt.f32.partialorder %v5122_v58, 0.0004427343 }
0x2387   :  { %6821 = vlog2.f32 %v5107_v28  ;;  %v5111_v7 = vadd.f32 1.0, %v5110_v34  ;;  %v5103_v23 = vmul.f32 %v6812_v37, %v5102_v51  ;;  %vm5105_vm11 = vcmp.lt.f32.partialorder %v5104_v5, 0.0004427343 }
0x2388   :  { %v5121_v26 = vmul.f32 %v6814_v38, %v5120_v19  ;;  %vm5114_vm13 = vcmp.lt.f32.partialorder %v5113_v42, 0.0004427343 }
0x2389   :  { %v5112_v36 = vmul.f32 %v6816_v24, %v5111_v7 }
0x2392   :  { %v6818_v16 = vpop.eup %6817 }
0x2393   :  { %v6820_v15 = vpop.eup %6819  ;;  %v5100_v21 = vmul.f32 0.6931472, %v6818_v16 }
0x2394   :  { %v5118_v41 = vmul.f32 0.6931472, %v6820_v15  ;;  %v6822_v39 = vpop.eup %6821 }
0x2395   :  { %v5109_v47 = vmul.f32 0.6931472, %v6822_v39  ;;  %v5106_v35 = vsel %vm5105_vm11, %v5103_v23, %v5100_v21 }
0x2396   :  { %v5124_v10 = vsel %vm5123_vm10, %v5121_v26, %v5118_v41  ;;  %v5125_v61 = vadd.f32 %v5106_v35, %v5083_v32  ;;  %v5380_v26 = vstv %s5631_s17 }
0x2397   :  { %v5127_v57 = vadd.f32 %v5124_v10, %v5085_v55  ;;  %v5115_v54 = vsel %vm5114_vm13, %v5112_v36, %v5109_v47  ;;  %v5386_v36 = vpop.permute.xlu1 %5385 }
0x2398   :  { %v5126_v62 = vadd.f32 %v5115_v54, %v5084_v46 }
0x2399   :  { %6571 = vmatmul.mubr.msk.f32.vlgmr.msra.gmra.mxu0 %vm2364_vm14, %v5127_v57 }
0x239a   :  { %6574 = vmatpush3.msra.mxu0 %v6937_v49  ;;  %6589 = vmatprep.mubr.msk.f32.mxu0 %vm6978_vm1, %v9236_v2  ;;  %vm5506_vm1 = vcmask 23552   ;;  %v9361_v49 = vld [vmem:[#allocation9_spill] sm:$0xff] }
0x239b   :  { %5195 = vmatprep.mubr.f32.mxu1 %v5126_v62  ;;  %6575 = vmatprep.subr.mxu0 %v9236_v2 }
0x239c   :  { %5196 = vmatmul.mubr.f32.vlgmr.msra.gmra.mxu1 %v5125_v61  ;;  %6576 = vmatpush3.msra.mxu0 %v6938_v48  ;;  %v9360_v61 = vld [vmem:[#allocation38_spill] sm:$0xff]  ;;  %v9362_v48 = vld [vmem:[#allocation19_spill] sm:$0xff] }
0x239d   :  { %6594 = vmatprep.mubr.msk.f32.mxu1 %vm2150_vm12, %v9356_v52  ;;  %6593 = vmatpush3.msra.mxu1 %v8900_v43  ;;  %v6941_v43 = vld [vmem:[%s9092_s12 + $0x18] sm:$0xff] }
0x239e   :  { %6577 = vmatprep.subr.mxu0 %v9236_v2 }
0x239f   :  { %6578 = vmatpush3.msra.mxu0 %v6939_v44  ;;  %v9363_v44 = vld [vmem:[#allocation42_spill] sm:$0xff] }
0x23a0   :  { %6595 = vmatmul.mubr.msk.f32.vlgmr.msra.gmra.mxu1 %vm2150_vm12, %v9357_v40  ;;  %6579 = vmatprep.subr.mxu0 %v9236_v2  ;;  %v9364_v40 = vld [vmem:[#allocation17_spill] sm:$0xff] }
0x23a1   :  { %6597 = vmatprep.mubr.msk.f32.mxu1 %vm2150_vm12, %v9358_v8  ;;  %6580 = vmatpush3.msra.mxu0 %v6940_v20  ;;  %v2114_v8 = vmul.f32 -2.0, %v9364_v40 }
0x23a2   :  { %6581 = vmatprep.subr.mxu0 %v9236_v2 }
0x23a3   :  { %6582 = vmatpush3.msra.mxu0 %v6941_v43  ;;  %v2115_v20 = vmul.f32 1.442695, %v2114_v8 }
0x23a4   :  { %6598 = vmatmul.mubr.msk.f32.gmra.mxu1 %vm2150_vm12, %v9359_v11  ;;  %6583 = vmatprep.subr.mxu0 %v9236_v2  ;;  %v5375_v11 = vstv %s9020_s6 }
0x23a5   :  { %6600 = vmatprep.mubr.msk.f32.mxu1 %vm2150_vm12, %v8544_v6  ;;  %6584 = vmatpush3.msra.mxu0 %v6942_v18  ;;  %v6944_v6 = vld [vmem:[%s9092_s12] sm:$0xff] }
0x23a6   :  { %6585 = vmatprep.subr.mxu0 %v9236_v2 }
0x23a7   :  { %6586 = vmatpush3.msra.mxu0 %v6943_v31 }
0x23a8   :  { %6601 = vmatmul.mubr.msk.f32.gmra.mxu1 %vm2150_vm12, %v8650_v45  ;;  %6587 = vmatprep.subr.mxu0 %v9236_v2  ;;  %v6945_v2 = vld [vmem:[%s9091_s11 + $0x140] ss:$0 sm:$0xff] }
0x23a9   :  { %6603 = vmatprep.mubr.msk.f32.mxu1 %vm2150_vm12, %v8764_v3  ;;  %6588 = vmatpush3.msra.mxu0 %v6944_v6 }
0x2459   :  { %v5267_v63 = vpop.f32.mrf.mxu0 }
0x245b   :  { %v6572_v17 = vpop.f32.mrf.mxu0 }
0x245c   :  { %v6091_v0 = vpop.f32.mrf.mxu1 }
0x245e   :  { %v6092_v9 = vpop.f32.mrf.mxu1 }
0x245f   :  { %v6093_v45 = vadd.f32 %v6092_v9, %v6091_v0 }
0x2460   :  { %v6596_v29 = vpop.f32.mrf.mxu1 }
0x2461   :  { %v5198_v60 = vadd.f32 %v6945_v2, %v6093_v45  ;;  %v5473_v56 = vadd.f32 %v6596_v29, %v8967_v53  ;;  %v2607_v45 = vpop.permute.xlu1 %2606  ;;  %v154_v2 = vld [vmem:[%s9093_s13] sm:$0x3] }
0x2462   :  { %v5467_v22 = vpop.f32.mrf.mxu1 }
0x2463   :  { %v5268_v27 = vadd.f32 %v5267_v63, %v5198_v60  ;;  %5508 = vst.msk [vmem:[%s9095_s15 + $0x8] sm:$0xff] %vm5506_vm1, %v5473_v56  ;;  %v5468_v37 = vadd.f32 %v8967_v53, %v5467_v22  ;;  %v2135_v60 = vmul.f32 -2.0, %v154_v2 }
0x2464   :  { %v6599_v38 = vpop.f32.mrf.mxu1 }
0x2465   :  { %v5272_v59 = vand.u32 2147483647, %v5268_v27  ;;  %v5359_v1 = vsub.f32 0.0, %v5268_v27  ;;  %5507 = vst.msk [vmem:[%s9095_s15] sm:$0xff] %vm5506_vm1, %v5468_v37  ;;  %v5483_v24 = vadd.f32 %v6599_v38, %v8967_v53  ;;  %v5271_v32 = vmax.f32 %v5268_v27, 0.0  ;;  %v2612_v56 = vpop.permute.xlu1 %2611  ;;  %v9365_v38 = vld [vmem:[#allocation8_spill] sm:$0xff] }
0x2466   :  { %v5477_v28 = vpop.f32.mrf.mxu1  ;;  %v2136_v27 = vmul.f32 1.442695, %v2135_v60 }
0x2467   :  { %v5273_v25 = vsub.f32 0.0, %v5272_v59  ;;  %v5360_v30 = vmul.f32 1.442695, %v5359_v1  ;;  %5510 = vst.msk [vmem:[%s9095_s15 + $0x18] sm:$0xff] %vm5506_vm1, %v5483_v24  ;;  %v5478_v34 = vadd.f32 %v8967_v53, %v5477_v28  ;;  %v2130_v59 = vsub.s32 0, %v9365_v38 }
0x2468   :  { %v6602_v19 = vpop.f32.mrf.mxu1 }
0x2469   :  { %v5274_v51 = vmul.f32 1.442695, %v5273_v25  ;;  %6823 = vpow2.f32 %v5360_v30  ;;  %5509 = vst.msk [vmem:[%s9095_s15 + $0x10] sm:$0xff] %vm5506_vm1, %v5478_v34  ;;  %v5493_v58 = vadd.f32 %v6602_v19, %v8967_v53  ;;  %v3526_v37 = vpop.permute.xlu1 %3525  ;;  %v2131_v24 = vrot.slane %v154_v2, %v2130_v59  ;;  %v9366_v34 = vld [vmem:[#allocation53_spill] sm:$0xff] }
0x246a   :  { %v5487_v16 = vpop.f32.mrf.mxu1  ;;  %v2609_v19 = vsub.f32 %v9366_v34, %v2607_v45 }
0x246b   :  { %6825 = vpow2.f32 %v5274_v51  ;;  %5512 = vst.msk [vmem:[%s9095_s15 + $0x28] sm:$0xff] %vm5506_vm1, %v5493_v58  ;;  %v5488_v5 = vadd.f32 %v8967_v53, %v5487_v16  ;;  %v9367_v51 = vld [vmem:[#allocation20_spill] sm:$0xff] }
0x246c   :  { %v3528_v58 = vsub.f32 %v9367_v51, %v3526_v37 }
0x246d   :  { %5511 = vst.msk [vmem:[%s9095_s15 + $0x20] sm:$0xff] %vm5506_vm1, %v5488_v5  ;;  %v3986_v1 = vpop.permute.xlu1 %3985  ;;  %v2132_v5 = vsub.f32 %v9356_v52, %v2131_v24 }
0x2471   :  { %v4446_v25 = vpop.permute.xlu1 %4445 }
0x2476   :  { %v6824_v7 = vpop.eup %6823 }
0x2477   :  { %v5362_v15 = vadd.f32 1.0, %v6824_v7  ;;  %v2614_v7 = vmul.f32 %v2612_v56, %v2609_v19 }
0x2478   :  { %v6826_v21 = vpop.eup %6825 }
0x2479   :  { %v5276_v42 = vadd.f32 1.0, %v6826_v21  ;;  %6827 = vrcp.f32 %v5362_v15  ;;  %v5279_v41 = vmul.f32 -0.5, %v6826_v21  ;;  %v5282_v55 = vand.u32 2147483647, %v6826_v21 }
0x247b   :  { %6829 = vlog2.f32 %v5276_v42  ;;  %v5280_v39 = vadd.f32 1.0, %v5279_v41  ;;  %vm5283_vm15 = vcmp.lt.f32.partialorder %v5282_v55, 0.0004427343  ;;  %v4906_v41 = vpop.permute.xlu1 %4905 }
0x247c   :  { %6831 = vpow2.f32 %v2115_v20  ;;  %v9372_v20 = vstv %s8166_s8 }
0x247d   :  { %v5281_v57 = vmul.f32 %v6826_v21, %v5280_v39  ;;  %6833 = vpow2.f32 %v2136_v27 }
0x2486   :  { %v6828_v23 = vpop.eup %6827 }
0x2487   :  { %v5381_v10 = vmul.f32 %v6828_v23, %v5380_v26  ;;  %v4448_v26 = vsub.f32 %v8642_v4, %v4446_v25 }
0x2488   :  { %v6830_v47 = vpop.eup %6829 }
0x2489   :  { %v5278_v35 = vmul.f32 0.6931472, %v6830_v47  ;;  %v5388_v46 = vmul.f32 %v5386_v36, %v5381_v10  ;;  %v6832_v63 = vpop.eup %6831  ;;  %v2133_v10 = vmul.f32 %v2132_v5, %v2132_v5  ;;  %v2140_v47 = vsub.s32 1, %v9365_v38 }
0x248a   :  { %v6834_v36 = vpop.eup %6833 }
0x248b   :  { %v5284_v54 = vsel %vm5283_vm15, %v5281_v57, %v5278_v35  ;;  %5390 = vrot.lane.b32.xlu0 %v5388_v46, %s6988_s20  ;;  %v2615_v35 = vmul.f32 %v2614_v7, %v2614_v7  ;;  %v4908_v57 = vsub.f32 %v8756_v12, %v4906_v41  ;;  %v9373_v12 = vstv %s8527_s19 }
0x248c   :  { %v5285_v62 = vadd.f32 %v5284_v54, %v5271_v32  ;;  %v9369_v54 = vstv %s8042_s3  ;;  %v2146_v45 = vrot.slane %v154_v2, %v2140_v47 }
0x248e   :  { %6590 = vmatmul.mubr.msk.f32.vlgmr.msra.gmra.mxu0 %vm2364_vm14, %v5285_v62 }
0x248f   :  { %3065 = vrot.lane.b32.xlu0 %v9360_v61, %s6987_s27 }
0x2493   :  { %3070 = vrot.lane.b32.xlu0 %v9361_v49, %s6988_s20  ;;  %v9370_v49 = vld [vmem:[#allocation16_spill] sm:$0xff] }
0x2497   :  { %3530 = vrot.lane.b32.xlu0 %v9362_v48, %s6988_s20  ;;  %v2111_v48 = vsub.f32 %v9356_v52, %v9370_v49 }
0x249b   :  { %3990 = vrot.lane.b32.xlu0 %v9363_v44, %s6988_s20  ;;  %v2141_v44 = vrot.slane %v6834_v36, %v2140_v47 }
0x249f   :  { %4450 = vrot.lane.b32.xlu0 %v8629_v13, %s6988_s20  ;;  %v6946_v13 = vld [vmem:[%s9092_s12 + $0x40] ss:$0 sm:$0xff] }
0x24a3   :  { %4910 = vrot.lane.b32.xlu0 %v8741_v33, %s6988_s20 }
0x24a7   :  { %5370 = vrot.lane.b32.xlu0 %v5362_v15, %s6988_s20  ;;  %v9368_v15 = vld [vmem:[#allocation13_spill] sm:$0xff] }
0x24a8   :  { %v3988_v21 = vsub.f32 %v9368_v15, %v3986_v1 }
0x24ab   :  { %2123 = vrot.lane.b32.xlu0 %v9364_v40, %s6987_s27  ;;  %v9371_v40 = vstv %s7930_s18 }
0x24ac   :  { %v2617_v8 = vmul.f32 %v9371_v40, %v2615_v35 }
0x24fd   :  { %v5391_v17 = vpop.permute.xlu0 %5390 }
0x2501   :  { %v3066_v9 = vpop.permute.xlu0 %3065 }
0x2502   :  { %v3068_v28 = vsub.f32 %v9360_v61, %v3066_v9 }
0x2505   :  { %v3071_v29 = vpop.permute.xlu0 %3070 }
0x2506   :  { %v3073_v16 = vmul.f32 %v3071_v29, %v3068_v28 }
0x2508   :  { %v3074_v39 = vmul.f32 %v3073_v16, %v3073_v16 }
0x2509   :  { %v3531_v22 = vpop.permute.xlu0 %3530 }
0x250a   :  { %v3533_v42 = vmul.f32 %v3531_v22, %v3528_v58  ;;  %v3076_v62 = vmul.f32 %v9369_v54, %v3074_v39 }
0x250c   :  { %v3534_v46 = vmul.f32 %v3533_v42, %v3533_v42 }
0x254e   :  { %v5355_v43 = vpop.f32.mrf.mxu0 }
0x254f   :  { %v9026_v33 = vadd.f32 %v6946_v13, %v5355_v43  ;;  %v3536_v43 = vmul.f32 %v9372_v20, %v3534_v46 }
0x2550   :  { %v6591_v18 = vpop.f32.mrf.mxu0 }
0x2551   :  { %v5378_v31 = vmul.f32 %v5375_v11, %v9026_v33  ;;  %5365 = vrot.lane.b32.xlu1 %v9026_v33, %s6987_s27  ;;  %v2134_v18 = vmul.f32 -0.5, %v2133_v10 }
0x2553   :  { %v5379_v6 = vadd.f32 %v5378_v31, %v8764_v3  ;;  %v3991_v3 = vpop.permute.xlu0 %3990  ;;  %v3077_v31 = vadd.f32 %v3076_v62, %v2617_v8  ;;  %v2142_v56 = vmul.f32 %v2141_v44, %v2134_v18 }
0x2554   :  { %v3993_v23 = vmul.f32 %v3991_v3, %v3988_v21 }
0x2555   :  { %2118 = vrot.lane.b32.xlu1 %v6832_v63, %s6987_s27  ;;  %v5393_v0 = vadd.f32 %v5391_v17, %v5379_v6  ;;  %v2112_v17 = vmul.f32 %v2111_v48, %v2111_v48  ;;  %v3537_v29 = vadd.f32 %v3536_v43, %v3077_v31  ;;  %v2147_v28 = vsub.f32 %v2142_v56, %v2146_v45 }
0x2556   :  { %v3994_v61 = vmul.f32 %v3993_v23, %v3993_v23 }
0x2557   :  { %6604 = vmatmul.mubr.msk.f32.gmra.mxu1 %vm2150_vm12, %v5393_v0  ;;  %v4451_v30 = vpop.permute.xlu0 %4450  ;;  %v2113_v3 = vmul.f32 -0.5, %v2112_v17  ;;  %v5585_v51 = vadd.f32 -0.9189385, %v2147_v28 }
0x2558   :  { %v4453_v32 = vmul.f32 %v4451_v30, %v4448_v26  ;;  %v3996_v6 = vmul.f32 %v9373_v12, %v3994_v61 }
0x255a   :  { %v4454_v13 = vmul.f32 %v4453_v32, %v4453_v32  ;;  %v3997_v22 = vadd.f32 %v3996_v6, %v3537_v29 }
0x255b   :  { %v4911_v55 = vpop.permute.xlu0 %4910 }
0x255c   :  { %v4913_v4 = vmul.f32 %v4911_v55, %v4908_v57  ;;  %v4456_v52 = vmul.f32 %v4455_v14, %v4454_v13 }
0x255e   :  { %v4914_v63 = vmul.f32 %v4913_v4, %v4913_v4  ;;  %v4457_v59 = vadd.f32 %v4456_v52, %v3997_v22 }
0x255f   :  { %v5371_v0 = vpop.permute.xlu0 %5370 }
0x2560   :  { %v4916_v27 = vmul.f32 %v4915_v50, %v4914_v63 }
0x2562   :  { %v4917_v2 = vadd.f32 %v4916_v27, %v4457_v59 }
0x2563   :  { %v2124_v25 = vpop.permute.xlu0 %2123 }
0x25c3   :  { %v5366_v9 = vpop.permute.xlu1 %5365 }
0x25c4   :  { %v5368_v60 = vsub.f32 %v9026_v33, %v5366_v9 }
0x25c6   :  { %v5373_v37 = vmul.f32 %v5371_v0, %v5368_v60 }
0x25c7   :  { %v2119_v38 = vpop.permute.xlu1 %2118 }
0x25c8   :  { %v5374_v1 = vmul.f32 %v5373_v37, %v5373_v37  ;;  %v2121_v24 = vmul.f32 %v2119_v38, %v2113_v3 }
0x25ca   :  { %v2126_v30 = vsub.f32 %v2121_v24, %v2124_v25  ;;  %v5376_v34 = vmul.f32 %v5375_v11, %v5374_v1 }
0x25cc   :  { %v5584_v19 = vadd.f32 -0.9189385, %v2126_v30  ;;  %v5377_v14 = vadd.f32 %v5376_v34, %v4917_v2 }
0x25ce   :  { %v5515_v33 = vsel %vm2150_vm12, %v5377_v14, 0.0  ;;  %v2149_v58 = vsub.f32 %v5585_v51, %v5584_v19 }
0x25cf   :  { %5516 = vadd.xlane.f32.xlu1 %v5515_v33 }
0x25d0   :  { %v2151_v50 = vsel %vm2150_vm12, %v2149_v58, 0.0  ;;  %vm5520_vm12 = vcmask 7168  }
0x25d1   :  { %2152 = vadd.xlane.f32.xlu0 %v2151_v50 }
0x2617   :  { %v6605_v16 = vpop.f32.mrf.mxu1 }
0x2618   :  { %v5503_v5 = vadd.f32 %v6605_v16, %v8967_v53 }
0x2619   :  { %v5497_v7 = vpop.f32.mrf.mxu1 }
0x261a   :  { %5514 = vst.msk [vmem:[%s9095_s15 + $0x38] sm:$0xff] %vm5506_vm1, %v5503_v5  ;;  %v5498_v11 = vadd.f32 %v8967_v53, %v5497_v7 }
0x261c   :  { %5513 = vst.msk [vmem:[%s9095_s15 + $0x30] sm:$0xff] %vm5506_vm1, %v5498_v11 }
0x2658   :  { %v5517_v15 = vpop.xlane.xlu1 %5516 }
0x2659   :  { %v5518_v21 = vmul.f32 0.5, %v5517_v15 }
0x265a   :  { %v2153_v42 = vpop.xlane.xlu0 %2152 }
0x265b   :  { %v5519_v41 = vsub.f32 %v2153_v42, %v5518_v21 }
0x265d   :  { %5521 = vst.msk [vmem:[%s9096_s16] sm:$0xff] %vm5520_vm12, %v5519_v41 }
0x265e   :  { %5530 = vsyncpa [#allocation3], 1 }
0x265f   :  { %5531 = vsyncpa [#allocation5], 1 }

</bundles_post_ra>
